<compile_context>
chip_gen: v7x
topology: tpu7x:2x2x1
jax: 0.10.0
libtpu: 0.0.40
codegen_flags: <defaults>
</compile_context>

<pallas_src>
import functools

import jax
import jax.numpy as jnp
from jax.experimental import pallas as pl
from jax.experimental.pallas import tpu as pltpu


def _round_up(x, m):
    return (x + m - 1) // m * m


def _choose_tiling(n, tile_cap):
    """Pick (n_pad, tile): both multiples of 128, tile divides n_pad, minimal pad."""
    n128 = _round_up(max(n, 1), 128)
    if n128 <= 2 * tile_cap:            # small graph: single row/k tile
        return n128, n128
    nk = -(-n128 // tile_cap)           # cdiv
    tile = _round_up(-(-n128 // nk), 128)
    return tile * nk, tile


# ---------------------------------------------------------------------------
# Fused kernel
#   grid = (layer, row_tile i, k_tile k), all "arbitrary" (sequential):
#     layer 0:  acc_i = sum_k A[i,k] @ XW1[k] ; G[i] = relu(acc_i + b1) @ W2
#     layer 1:  acc_i = sum_k A[i,k] @ G[k]   ; out[i] = acc_i + b2
#   XW1 is VMEM-resident (constant index map); G lives in a VMEM scratch that
#   persists across grid iterations (never round-trips through HBM).
# ---------------------------------------------------------------------------
def _fused_gcn_kernel(a_ref, xw1_ref, b1_ref, w2_ref, b2_ref,
                      out_ref, g_ref, acc_ref, *, tile):
    layer = pl.program_id(0)
    i = pl.program_id(1)
    k = pl.program_id(2)
    nk = pl.num_programs(2)

    # ---- init accumulator at the start of each k-reduction ----
    @pl.when(k == 0)
    def _():
        acc_ref[...] = jnp.zeros_like(acc_ref)

    col0 = pl.multiple_of(k * tile, tile)

    # ---- O(N^2) aggregation: acc += A[i,k] @ Z[k]  (Z = XW1 or G, in VMEM) ----
    @pl.when(layer == 0)
    def _():
        acc_ref[...] += jnp.dot(a_ref[...], xw1_ref[pl.ds(col0, tile), :],
                                preferred_element_type=jnp.float32)

    @pl.when(layer == 1)
    def _():
        acc_ref[...] += jnp.dot(a_ref[...], g_ref[pl.ds(col0, tile), :],
                                preferred_element_type=jnp.float32)

    is_last_k = k == nk - 1

    # ---- layer-0 finalize: G[i] = relu(acc + b1) @ W2  (A@(H@W2) == (A@H)@W2) ----
    @pl.when(jnp.logical_and(is_last_k, layer == 0))
    def _():
        h = jnp.maximum(acc_ref[...] + b1_ref[...], 0.0).astype(jnp.bfloat16)
        g = jnp.dot(h, w2_ref[...], preferred_element_type=jnp.float32)
        row0 = pl.multiple_of(i * tile, tile)
        g_ref[pl.ds(row0, tile), :] = g.astype(g_ref.dtype)

    # ---- layer-1 finalize: out[i] = acc + b2 (no matmul in the epilogue) ----
    @pl.when(jnp.logical_and(is_last_k, layer == 1))
    def _():
        out_ref[...] = (acc_ref[...] + b2_ref[...]).astype(out_ref.dtype)


# ---------------------------------------------------------------------------
# Wrapper: padding / casting (hoistable) + pallas_call
# ---------------------------------------------------------------------------
def prepare_gcn_inputs(adj, x, params, *, tile_cap=512):
    """Pad + cast operands and precompute XW1. Hoist/cache this when the graph
    is static across calls (the O(N^2) pad/cast of A_hat is the expensive part)."""
    w1, b1, w2, b2 = params
    n = x.shape[0]
    in_c, hid_c = w1.shape
    out_c = w2.shape[1]

    f_pad = _round_up(max(in_c, hid_c, out_c), 128)     # lane-dense features
    n_pad, tile = _choose_tiling(n, tile_cap)

    # Reassociated first projection, done once in f32 (tiny: [n, hid]).
    xw1 = x.astype(jnp.float32) @ w1.astype(jnp.float32)

    # Zero padding invariant: padded *columns* of A are exactly zero, so junk in
    # padded rows of G (relu(b1)@W2 once b1 != 0) never leaks into real rows.
    a_p = jnp.zeros((n_pad, n_pad), jnp.bfloat16).at[:n, :n].set(
        adj.astype(jnp.bfloat16))
    xw1_p = jnp.zeros((n_pad, f_pad), jnp.bfloat16).at[:n, :hid_c].set(
        xw1.astype(jnp.bfloat16))
    w2_p = jnp.zeros((f_pad, f_pad), jnp.bfloat16).at[:hid_c, :out_c].set(
        w2.astype(jnp.bfloat16))
    b1_p = jnp.zeros((1, f_pad), jnp.float32).at[:, :hid_c].set(
        b1.reshape(1, -1).astype(jnp.float32))
    b2_p = jnp.zeros((1, f_pad), jnp.float32).at[:, :out_c].set(
        b2.reshape(1, -1).astype(jnp.float32))

    meta = dict(n=n, out_c=out_c, n_pad=n_pad, f_pad=f_pad, tile=tile)
    return (a_p, xw1_p, b1_p, w2_p, b2_p), meta


def gcn_forward_prepared(operands, meta):
    a_p, xw1_p, b1_p, w2_p, b2_p = operands
    n, out_c = meta["n"], meta["out_c"]
    n_pad, f_pad, tile = meta["n_pad"], meta["f_pad"], meta["tile"]
    ni = nk = n_pad // tile

    # VMEM budget from actual sizes (v7x has only 64 MiB per TensorCore).
    vmem_needed = (
        2 * tile * tile * 2          # A_hat blocks, double-buffered (bf16)
        + 2 * n_pad * f_pad * 2      # resident XW1 (bf16)
        + n_pad * f_pad * 2          # fused G scratch (bf16)
        + tile * f_pad * 4           # f32 accumulator scratch
        + 2 * tile * f_pad * 4       # output blocks (f32), double-buffered
        + 2 * f_pad * f_pad * 2      # W2
        + 4 * f_pad * 4)             # biases
    if vmem_needed > (56 << 20):
        # TODO(synk): for very large graphs spill G / XW1 to HBM (two-call
        # split) so the design fits under v7x's 64 MiB VMEM.
        raise ValueError("graph too large for the fully-VMEM-resident fused GCN")
    vmem_limit = min(max(2 * vmem_needed, 4 << 20), 64 << 20)

    # Advisory cost: two N^2 aggregations + one dense projection (layer-0 finalize).
    flops = 2 * (2 * n_pad * n_pad * f_pad) + 2 * n_pad * f_pad * f_pad
    bytes_accessed = (2 * n_pad * n_pad * 2      # A_hat streamed once per layer
                      + n_pad * f_pad * 2        # XW1 fetched once (resident)
                      + f_pad * f_pad * 2        # W2
                      + 2 * f_pad * 4            # biases
                      + n_pad * f_pad * 4)       # output

    kernel = functools.partial(_fused_gcn_kernel, tile=tile)

    out_p = pl.pallas_call(
        kernel,
        out_shape=jax.ShapeDtypeStruct((n_pad, f_pad), jnp.float32),
        grid_spec=pltpu.PrefetchScalarGridSpec(
            num_scalar_prefetch=0,
            grid=(2, ni, nk),                                        # (layer, rows, k)
            in_specs=[
                pl.BlockSpec((tile, tile), lambda l, i, k: (i, k)),     # A_hat streamed
                pl.BlockSpec((n_pad, f_pad), lambda l, i, k: (0, 0)),   # XW1 resident
                pl.BlockSpec((1, f_pad), lambda l, i, k: (0, 0)),       # b1
                pl.BlockSpec((f_pad, f_pad), lambda l, i, k: (0, 0)),   # W2
                pl.BlockSpec((1, f_pad), lambda l, i, k: (0, 0)),       # b2
            ],
            # During layer 0 the output block index is pinned to (0, 0) so no
            # uninitialized writeback ever reaches HBM; layer 1 writes (i, 0).
            out_specs=pl.BlockSpec((tile, f_pad), lambda l, i, k: (l * i, 0)),
            scratch_shapes=[
                pltpu.VMEM((n_pad, f_pad), jnp.bfloat16),   # G = relu(A@XW1+b1)@W2
                pltpu.VMEM((tile, f_pad), jnp.float32),     # f32 accumulator
            ],
        ),
        compiler_params=pltpu.CompilerParams(
            # G lives in per-core VMEM scratch across the whole grid, so all axes
            # must stay sequential (see v7x TODO at the top for the 2-call split).
            dimension_semantics=("arbitrary", "arbitrary", "arbitrary"),
            vmem_limit_bytes=int(vmem_limit),
        ),
        cost_estimate=pl.CostEstimate(flops=int(flops), transcendentals=0,
                                      bytes_accessed=int(bytes_accessed)),
    )(a_p, xw1_p, b1_p, w2_p, b2_p)

    return out_p[:n, :out_c]


def gcn_forward(adj, x, params, *, tile_cap=512):
    """Fused GCN forward. adj: [N,N] normalized adjacency, x: [N,F_in]."""
    operands, meta = prepare_gcn_inputs(adj, x, params, tile_cap=tile_cap)
    return gcn_forward_prepared(operands, meta)


# ---------------------------------------------------------------------------
# Glue: dense normalized adjacency from a kNN connectivity graph
# (stands in for StandardScaler + kneighbors_graph + GCNConv normalization)
# ---------------------------------------------------------------------------
def build_normalized_adj(x_feat, n_neighbors=5):
    n = x_feat.shape[0]
    sq = jnp.sum(x_feat * x_feat, axis=1)
    d2 = sq[:, None] + sq[None, :] - 2.0 * (x_feat @ x_feat.T)
    d2 = d2 + jnp.eye(n, dtype=d2.dtype) * 1e9              # exclude self
    _, nbr_idx = jax.lax.top_k(-d2, n_neighbors)             # [N, k] nearest
    rows = jnp.repeat(jnp.arange(n), n_neighbors)
    cols = nbr_idx.reshape(-1)
    a = jnp.zeros((n, n), jnp.float32).at[rows, cols].set(1.0)
    a_hat = a + jnp.eye(n, dtype=jnp.float32)                 # self-loops
    deg = jnp.sum(a_hat, axis=1)
    dinv = jnp.where(deg > 0, 1.0 / jnp.sqrt(deg), 0.0)
    return dinv[:, None] * a_hat * dinv[None, :]


def init_params(key, in_channels, hidden_channels, out_channels):
    k1, k2 = jax.random.split(key)
    lim1 = (6.0 / (in_channels + hidden_channels)) ** 0.5
    lim2 = (6.0 / (hidden_channels + out_channels)) ** 0.5
    w1 = jax.random.uniform(k1, (in_channels, hidden_channels),
                            jnp.float32, -lim1, lim1)
    w2 = jax.random.uniform(k2, (hidden_channels, out_channels),
                            jnp.float32, -lim2, lim2)
    b1 = jnp.zeros((hidden_channels,), jnp.float32)   # GCNConv bias init = 0
    b2 = jnp.zeros((out_channels,), jnp.float32)
    return (w1, b1, w2, b2)


def gcn_reference(adj, x, params):
    """Pure-JAX f32 reference of the PyTorch forward (conv1 -> relu -> conv2)."""
    w1, b1, w2, b2 = params
    h = jnp.maximum(adj @ (x @ w1) + b1, 0.0)
    return adj @ (h @ w2) + b2


if __name__ == "__main__":
    key = jax.random.PRNGKey(0)
    k_x, k_p = jax.random.split(key)

    # Small synthetic graph consistent with the module: 14 node features
    # (feature_cols), hidden=32, out=4 classes.
    num_nodes = 300
    in_channels = 14
    hidden_channels = 32
    out_channels = 4

    # "Standard-scaled" node features (zero mean / unit std draws).
    x = jax.random.normal(k_x, (num_nodes, in_channels), jnp.float32)

    # 5-NN connectivity graph + GCN symmetric normalization (glue).
    adj_hat = build_normalized_adj(x, n_neighbors=5)

    params = init_params(k_p, in_channels, hidden_channels, out_channels)

    ref = gcn_reference(adj_hat, x, params)

    # 1) Default path: n=300 -> n_pad=384, single tile, grid (2, 1, 1).
    out = gcn_forward(adj_hat, x, params)
    out = jax.block_until_ready(out)

    assert out.shape == (num_nodes, out_channels)
    assert out.dtype == jnp.float32
    assert bool(jnp.all(jnp.isfinite(out)))
    # bf16 operands / f32 accumulation vs f32 reference: loose tolerance.
    assert bool(jnp.allclose(out, ref, atol=2e-1, rtol=2e-1)), \
        float(jnp.max(jnp.abs(out - ref)))

    # 2) Forced multi-tile path (tile=128, grid (2, 3, 3)) to exercise the
    #    streamed/accumulated code path as well.
    out_tiled = gcn_forward(adj_hat, x, params, tile_cap=128)
    out_tiled = jax.block_until_ready(out_tiled)
    assert bool(jnp.allclose(out_tiled, ref, atol=2e-1, rtol=2e-1)), \
        float(jnp.max(jnp.abs(out_tiled - ref)))

    print("KERNEL_OK")
</pallas_src>

<mosaic_0001>
module attributes {stable_mosaic.version = 11 : i64} {
  func.func @_fused_gcn_kernel(%arg0: i32, %arg1: i32, %arg2: i32, %arg3: memref<384x384xbf16, #tpu.memory_space<vmem>>, %arg4: memref<384x128xbf16, #tpu.memory_space<vmem>>, %arg5: memref<1x128xf32, #tpu.memory_space<vmem>>, %arg6: memref<128x128xbf16, #tpu.memory_space<vmem>>, %arg7: memref<1x128xf32, #tpu.memory_space<vmem>>, %arg8: memref<384x128xf32, #tpu.memory_space<vmem>>, %arg9: memref<384x128xbf16, #tpu.memory_space<vmem>>, %arg10: memref<384x128xf32, #tpu.memory_space<vmem>>) attributes {dimension_semantics = [#tpu.dimension_semantics<arbitrary>, #tpu.dimension_semantics<arbitrary>, #tpu.dimension_semantics<arbitrary>], iteration_bounds = array<i64: 2, 1, 1>, scalar_prefetch = 0 : i64, scratch_operands = 2 : i64, tpu.core_type = #tpu.core_type<tc>, window_params = [{transform_indices = @transform_0, window_bounds = array<i64: 384, 384>}, {pipeline_mode = #tpu.pipeline_mode<synchronous>, transform_indices = @transform_1, window_bounds = array<i64: 384, 128>}, {pipeline_mode = #tpu.pipeline_mode<synchronous>, transform_indices = @transform_2, window_bounds = array<i64: 1, 128>}, {pipeline_mode = #tpu.pipeline_mode<synchronous>, transform_indices = @transform_3, window_bounds = array<i64: 128, 128>}, {pipeline_mode = #tpu.pipeline_mode<synchronous>, transform_indices = @transform_4, window_bounds = array<i64: 1, 128>}, {transform_indices = @transform_5, window_bounds = array<i64: 384, 128>}]} {
    %c0_i32 = arith.constant 0 : i32
    %0 = arith.cmpi eq, %arg2, %c0_i32 : i32
    %1 = arith.extui %0 : i1 to i32
    %c0_i32_0 = arith.constant 0 : i32
    %2 = arith.cmpi ne, %1, %c0_i32_0 : i32
    scf.if %2 {
      %cst = arith.constant 0.000000e+00 : f32
      %20 = vector.broadcast %cst : f32 to vector<384x128xf32>
      %c0 = arith.constant 0 : index
      %c0_9 = arith.constant 0 : index
      %21 = vector.load %arg10[%c0, %c0_9] : memref<384x128xf32, #tpu.memory_space<vmem>>, vector<384x128xf32>
      tpu.vector_store %arg10[%c0, %c0_9], %20 {strides = array<i32>} : memref<384x128xf32, #tpu.memory_space<vmem>>, vector<384x128xf32>,
    } else {
    }
    %c384_i32 = arith.constant 384 : i32
    %3 = arith.muli %arg2, %c384_i32 : i32
    %4 = tpu.assume_multiple %3, 384 : i32
    %c0_i32_1 = arith.constant 0 : i32
    %5 = arith.cmpi eq, %arg0, %c0_i32_1 : i32
    %6 = arith.extui %5 : i1 to i32
    %c0_i32_2 = arith.constant 0 : i32
    %7 = arith.cmpi ne, %6, %c0_i32_2 : i32
    scf.if %7 {
      %c0 = arith.constant 0 : index
      %c0_9 = arith.constant 0 : index
      %20 = vector.load %arg10[%c0, %c0_9] : memref<384x128xf32, #tpu.memory_space<vmem>>, vector<384x128xf32>
      %c0_10 = arith.constant 0 : index
      %c0_11 = arith.constant 0 : index
      %21 = vector.load %arg3[%c0_10, %c0_11] : memref<384x384xbf16, #tpu.memory_space<vmem>>, vector<384x384xbf16>
      %22 = arith.index_cast %4 : i32 to index
      %c0_12 = arith.constant 0 : index
      %23 = vector.load %arg4[%22, %c0_12] : memref<384x128xbf16, #tpu.memory_space<vmem>>, vector<384x128xbf16>
      %cst = arith.constant dense<0.000000e+00> : vector<384x128xf32>
      %24 = tpu.matmul %21, %23, %cst {dimension_numbers = #tpu.dot_dimension_numbers<[1], [0], [0], [1], [0, 0, 1, 1], [], []>} : vector<384x384xbf16>, vector<384x128xbf16>, vector<384x128xf32> -> vector<384x128xf32>
      %25 = arith.addf %20, %24 : vector<384x128xf32>
      %c0_13 = arith.constant 0 : index
      %c0_14 = arith.constant 0 : index
      %26 = vector.load %arg10[%c0_13, %c0_14] : memref<384x128xf32, #tpu.memory_space<vmem>>, vector<384x128xf32>
      tpu.vector_store %arg10[%c0_13, %c0_14], %25 {strides = array<i32>} : memref<384x128xf32, #tpu.memory_space<vmem>>, vector<384x128xf32>,
    } else {
    }
    %c1_i32 = arith.constant 1 : i32
    %8 = arith.cmpi eq, %arg0, %c1_i32 : i32
    %9 = arith.extui %8 : i1 to i32
    %c0_i32_3 = arith.constant 0 : i32
    %10 = arith.cmpi ne, %9, %c0_i32_3 : i32
    scf.if %10 {
      %c0 = arith.constant 0 : index
      %c0_9 = arith.constant 0 : index
      %20 = vector.load %arg10[%c0, %c0_9] : memref<384x128xf32, #tpu.memory_space<vmem>>, vector<384x128xf32>
      %c0_10 = arith.constant 0 : index
      %c0_11 = arith.constant 0 : index
      %21 = vector.load %arg3[%c0_10, %c0_11] : memref<384x384xbf16, #tpu.memory_space<vmem>>, vector<384x384xbf16>
      %22 = arith.index_cast %4 : i32 to index
      %c0_12 = arith.constant 0 : index
      %23 = vector.load %arg9[%22, %c0_12] : memref<384x128xbf16, #tpu.memory_space<vmem>>, vector<384x128xbf16>
      %cst = arith.constant dense<0.000000e+00> : vector<384x128xf32>
      %24 = tpu.matmul %21, %23, %cst {dimension_numbers = #tpu.dot_dimension_numbers<[1], [0], [0], [1], [0, 0, 1, 1], [], []>} : vector<384x384xbf16>, vector<384x128xbf16>, vector<384x128xf32> -> vector<384x128xf32>
      %25 = arith.addf %20, %24 : vector<384x128xf32>
      %c0_13 = arith.constant 0 : index
      %c0_14 = arith.constant 0 : index
      %26 = vector.load %arg10[%c0_13, %c0_14] : memref<384x128xf32, #tpu.memory_space<vmem>>, vector<384x128xf32>
      tpu.vector_store %arg10[%c0_13, %c0_14], %25 {strides = array<i32>} : memref<384x128xf32, #tpu.memory_space<vmem>>, vector<384x128xf32>,
    } else {
    }
    %c0_i32_4 = arith.constant 0 : i32
    %11 = arith.cmpi eq, %arg2, %c0_i32_4 : i32
    %c0_i32_5 = arith.constant 0 : i32
    %12 = arith.cmpi eq, %arg0, %c0_i32_5 : i32
    %13 = arith.andi %11, %12 : i1
    %14 = arith.extui %13 : i1 to i32
    %c0_i32_6 = arith.constant 0 : i32
    %15 = arith.cmpi ne, %14, %c0_i32_6 : i32
    scf.if %15 {
      %c0 = arith.constant 0 : index
      %c0_9 = arith.constant 0 : index
      %20 = vector.load %arg10[%c0, %c0_9] : memref<384x128xf32, #tpu.memory_space<vmem>>, vector<384x128xf32>
      %c0_10 = arith.constant 0 : index
      %c0_11 = arith.constant 0 : index
      %21 = vector.load %arg5[%c0_10, %c0_11] : memref<1x128xf32, #tpu.memory_space<vmem>>, vector<1x128xf32>
      %22 = vector.broadcast %21 : vector<1x128xf32> to vector<384x128xf32>
      %23 = arith.addf %20, %22 : vector<384x128xf32>
      %cst = arith.constant 0.000000e+00 : f32
      %24 = vector.broadcast %cst : f32 to vector<384x128xf32>
      %25 = arith.maximumf %23, %24 : vector<384x128xf32>
      %26 = arith.truncf %25 : vector<384x128xf32> to vector<384x128xbf16>
      %c0_12 = arith.constant 0 : index
      %c0_13 = arith.constant 0 : index
      %27 = vector.load %arg6[%c0_12, %c0_13] : memref<128x128xbf16, #tpu.memory_space<vmem>>, vector<128x128xbf16>
      %cst_14 = arith.constant dense<0.000000e+00> : vector<384x128xf32>
      %28 = tpu.matmul %26, %27, %cst_14 {dimension_numbers = #tpu.dot_dimension_numbers<[1], [0], [0], [1], [0, 0, 1, 1], [], []>} : vector<384x128xbf16>, vector<128x128xbf16>, vector<384x128xf32> -> vector<384x128xf32>
      %c384_i32_15 = arith.constant 384 : i32
      %29 = arith.muli %arg1, %c384_i32_15 : i32
      %30 = tpu.assume_multiple %29, 384 : i32
      %31 = arith.truncf %28 : vector<384x128xf32> to vector<384x128xbf16>
      %32 = arith.index_cast %30 : i32 to index
      %c0_16 = arith.constant 0 : index
      %33 = vector.load %arg9[%32, %c0_16] : memref<384x128xbf16, #tpu.memory_space<vmem>>, vector<384x128xbf16>
      tpu.vector_store %arg9[%32, %c0_16], %31 {strides = array<i32>} : memref<384x128xbf16, #tpu.memory_space<vmem>>, vector<384x128xbf16>,
    } else {
    }
    %c1_i32_7 = arith.constant 1 : i32
    %16 = arith.cmpi eq, %arg0, %c1_i32_7 : i32
    %17 = arith.andi %11, %16 : i1
    %18 = arith.extui %17 : i1 to i32
    %c0_i32_8 = arith.constant 0 : i32
    %19 = arith.cmpi ne, %18, %c0_i32_8 : i32
    scf.if %19 {
      %c0 = arith.constant 0 : index
      %c0_9 = arith.constant 0 : index
      %20 = vector.load %arg10[%c0, %c0_9] : memref<384x128xf32, #tpu.memory_space<vmem>>, vector<384x128xf32>
      %c0_10 = arith.constant 0 : index
      %c0_11 = arith.constant 0 : index
      %21 = vector.load %arg7[%c0_10, %c0_11] : memref<1x128xf32, #tpu.memory_space<vmem>>, vector<1x128xf32>
      %22 = vector.broadcast %21 : vector<1x128xf32> to vector<384x128xf32>
      %23 = arith.addf %20, %22 : vector<384x128xf32>
      %c0_12 = arith.constant 0 : index
      %c0_13 = arith.constant 0 : index
      %24 = vector.load %arg8[%c0_12, %c0_13] : memref<384x128xf32, #tpu.memory_space<vmem>>, vector<384x128xf32>
      tpu.vector_store %arg8[%c0_12, %c0_13], %23 {strides = array<i32>} : memref<384x128xf32, #tpu.memory_space<vmem>>, vector<384x128xf32>,
    } else {
    }
    return
  }
  func.func @transform_0(%arg0: i32, %arg1: i32, %arg2: i32) -> (i32, i32) {
    %c0_i32 = arith.constant 0 : i32
    return %arg1, %arg2 : i32, i32
  }
  func.func @transform_1(%arg0: i32, %arg1: i32, %arg2: i32) -> (i32, i32) {
    %c0_i32 = arith.constant 0 : i32
    %c0_i32_0 = arith.constant 0 : i32
    %c0_i32_1 = arith.constant 0 : i32
    return %c0_i32, %c0_i32_0 : i32, i32
  }
  func.func @transform_2(%arg0: i32, %arg1: i32, %arg2: i32) -> (i32, i32) {
    %c0_i32 = arith.constant 0 : i32
    %c0_i32_0 = arith.constant 0 : i32
    %c0_i32_1 = arith.constant 0 : i32
    return %c0_i32, %c0_i32_0 : i32, i32
  }
  func.func @transform_3(%arg0: i32, %arg1: i32, %arg2: i32) -> (i32, i32) {
    %c0_i32 = arith.constant 0 : i32
    %c0_i32_0 = arith.constant 0 : i32
    %c0_i32_1 = arith.constant 0 : i32
    return %c0_i32, %c0_i32_0 : i32, i32
  }
  func.func @transform_4(%arg0: i32, %arg1: i32, %arg2: i32) -> (i32, i32) {
    %c0_i32 = arith.constant 0 : i32
    %c0_i32_0 = arith.constant 0 : i32
    %c0_i32_1 = arith.constant 0 : i32
    return %c0_i32, %c0_i32_0 : i32, i32
  }
  func.func @transform_5(%arg0: i32, %arg1: i32, %arg2: i32) -> (i32, i32) {
    %0 = arith.muli %arg0, %arg1 : i32
    %c0_i32 = arith.constant 0 : i32
    %c0_i32_0 = arith.constant 0 : i32
    return %0, %c0_i32 : i32, i32
  }
}

</mosaic_0001>

<bundles_post_ra>
// kernel: tpu_custom_call.1
= control target key start
LH: loop header
LB: loop body
LE: loop exit
PB: predicated region body
PF: predicated region fallthrough
CT: control target
= control target key end

     0   :  { %10 = vsyncpa [#allocation5], 0  ;;  %s5030_s0 = inlined_call_operand.hbm [shape: bf16[384,384], index: 0, kind: input, shape index: {}]   ;;  %s5031_s1 = inlined_call_operand.hbm [shape: bf16[384,128], index: 1, kind: input, shape index: {}]   ;;  %s5032_s2 = inlined_call_operand.vmem [shape: f32[1,128], index: 2, kind: input, shape index: {}]   ;;  %s5033_s3 = inlined_call_operand.hbm [shape: bf16[128,128], index: 3, kind: input, shape index: {}]   ;;  %s5034_s4 = inlined_call_operand.vmem [shape: f32[1,128], index: 4, kind: input, shape index: {}]   ;;  %s5035_s5 = inlined_call_operand.hbm [shape: f32[384,128], index: 5, kind: output, shape index: {}]  }
   0x1   :  { %11 = vsyncpa [#allocation8], 0 }
   0x2   :  { %12 = vsyncpa [#allocation6], 0 }
   0x3   :  { %14 = vsyncpa [#allocation6 + $0x1], 0  ;;  %s4568_s18 = smov 0   ;;  %s4570_s19 = smov 0  }
   0x4   :  { %s4572_s20 = smov 0  }
   0x5 LB: > { %s4525_s21 = smov [#allocation7]   ;;  %s3513_s23 = sadd.s32 4294967295, %s4523_s20   ;;  %s4523_s20 = sphi %s4572_s20, %s20_s20   ;;  %s4519_s19 = sphi %s4570_s19, %s5050_s19   ;;  %s4515_s18 = sphi %s4568_s18, %s5049_s18  }
   0x6   : > { %s215_s22 = sshll.u32 %s4525_s21, 4  ;;  %p3515_p0 = scmp.ge.s32.totalorder %s4523_s20, 1  ;;  %s216_s22 = int_to_ptr.vmem [resolvable:$true] %s215_s22 }
   0x7   : > { %p184_p1 = scmp.lt.s32.totalorder %s4523_s20, 3  ;;  %p4589_p2 = scmp.eq.s32.totalorder %s3513_s23, 0 }
   0x8   : > { %s39_s28 = sadd.s32 1, %s4519_s19  ;;  %s4379_s7 = scalar_lea.hbm %s5031_s1, 3072 }
   0x9   : > { %s5039_s25 = scalar_select %p4589_p2, 1, 0 }
   0xa   : > { %p4593_p3 = pnand %p3515_p0, %p184_p1  ;;  %p4606_p6 = scmp.ge.s32.totalorder %s39_s28, 2 }
   0xb   : > { %p4380_p7 = scmp.ne.s32.totalorder %s5031_s1, %s4379_s7  ;;  %p4386_p11 = scmp.lt.u32.totalorder %s4379_s7, %s5031_s1 }
   0xc   : > { %s5040_s26 = scalar_select %p4593_p3, 1, 0 }
   0xd   : > { %p4095_p4 = pneg %p4593_p3 }
   0xe   : > { %s5042_s29 = scalar_select %p4606_p6, 1, 0 }
   0xf   : > { %p4601_p5 = pnand %p4589_p2, %p4095_p4 }
  0x11   : > { %p4618_p8 = pneg %p4601_p5 }
  0x13   : > { %p4382_p9 = pnand %p4618_p8, %p4380_p7 }
  0x15   : > { %p4383_p10 = pneg %p4382_p9 }
  0x17   : > { %p4388_p12 = pnand %p4386_p11, %p4383_p10 }
  0x19   : > { %4391 = shalt.err (!%p4388_p12)
}
  0x1a   : > { %s4392_s13 = scalar_lea.vmem %s216_s22, 3072  ;;  %p4400_p4 = scmp.lt.s32.totalorder %s216_s22, %s216_s22 }
  0x1b   : > { %p4393_p13 = scmp.ne.s32.totalorder %s216_s22, %s4392_s13  ;;  %p4401_p2 = scmp.lt.s32.totalorder %s4392_s13, %s4392_s13 }
  0x1d   : > { %p4395_p0 = pnand %p4393_p13, %p4618_p8  ;;  %p4402_p3 = por %p4401_p2, %p4400_p4 }
  0x1f   : > { %p4396_p1 = pneg %p4395_p0 }
  0x21   : > { %p4403_p6 = pnand %p4402_p3, %p4396_p1 }
  0x23   : > { %4406 = shalt.err (!%p4403_p6)
}
  0x24   : > { %s4526_s14 = smov 64   ;;  %s4527_s15 = smov 4  }
  0x25   : > { %4101 = dma.hbm_to_vmem [thread:$0]  (!%p4601_p5), %s5031_s1, 3072, %s216_s22, [#allocation8], %s4526_s14, %s4526_s14, %s4527_s15  }
  0x26   : > { %p5044_p7 = scmp.ne.s32.totalorder %s5042_s29, 0  ;;  %s4528_s21 = smov [#allocation4]  }
  0x27   : > { %s202_s30 = sshll.u32 %s4528_s21, 4  ;;  %s4407_s8 = scalar_lea.hbm %s5030_s0, 9216  ;;  %s203_s30 = int_to_ptr.vmem [resolvable:$true] %s202_s30 }
  0x28   : > { %s5052_s28 = smov (%p5044_p7, %s39_s28), 0  ;;  %p4408_p2 = scmp.ne.s32.totalorder %s5030_s0, %s4407_s8 }
  0x29   : > { %p4414_p9 = scmp.lt.u32.totalorder %s4407_s8, %s5030_s0 }
  0x2a   : > { %p4410_p3 = pnand %p4408_p2, %p4618_p8 }
  0x2c   : > { %p4411_p6 = pneg %p4410_p3 }
  0x2e   : > { %p4416_p10 = pnand %p4414_p9, %p4411_p6 }
  0x30   : > { %4419 = shalt.err (!%p4416_p10)
}
  0x31   : > { %s4420_s22 = scalar_lea.vmem %s203_s30, 9216  ;;  %p4428_p0 = scmp.lt.s32.totalorder %s203_s30, %s203_s30 }
  0x32   : > { %p4421_p11 = scmp.ne.s32.totalorder %s203_s30, %s4420_s22  ;;  %p4429_p1 = scmp.lt.s32.totalorder %s4420_s22, %s4420_s22 }
  0x34   : > { %p4423_p12 = pnand %p4421_p11, %p4618_p8  ;;  %p4430_p4 = por %p4429_p1, %p4428_p0 }
  0x36   : > { %p4424_p13 = pneg %p4423_p12 }
  0x38   : > { %p4431_p7 = pnand %p4430_p4, %p4424_p13 }
  0x3a   : > { %4434 = shalt.err (!%p4431_p7)
}
  0x3b   : > { %s4529_s29 = smov 192   ;;  %s4530_s16 = smov 12  }
  0x3c   : > { %4098 = dma.hbm_to_vmem [thread:$0]  (!%p4601_p5), %s5030_s0, 9216, %s203_s30, [#allocation5], %s4529_s29, %s4529_s29, %s4530_s16  }
  0x3d   : > { %s4531_s6 = smov [#allocation9]   ;;  %s4435_s11 = scalar_lea.hbm %s5033_s3, 1024 }
  0x3e   : > { %s231_s7 = sshll.u32 %s4531_s6, 4  ;;  %p4436_p2 = scmp.ne.s32.totalorder %s5033_s3, %s4435_s11  ;;  %s232_s7 = int_to_ptr.vmem [resolvable:$true] %s231_s7 }
  0x3f   : > { %p4442_p9 = scmp.lt.u32.totalorder %s4435_s11, %s5033_s3 }
  0x40   : > { %p4438_p3 = pnand %p4436_p2, %p4618_p8 }
  0x42   : > { %p4439_p6 = pneg %p4438_p3 }
  0x44   : > { %p4444_p10 = pnand %p4442_p9, %p4439_p6 }
  0x46   : > { %4447 = shalt.err (!%p4444_p10)
}
  0x47   : > { %s4448_s30 = scalar_lea.vmem %s232_s7, 1024  ;;  %p4456_p0 = scmp.lt.s32.totalorder %s232_s7, %s232_s7 }
  0x48   : > { %p4449_p11 = scmp.ne.s32.totalorder %s232_s7, %s4448_s30  ;;  %p4457_p1 = scmp.lt.s32.totalorder %s4448_s30, %s4448_s30 }
  0x4a   : > { %p4451_p12 = pnand %p4449_p11, %p4618_p8  ;;  %p4458_p4 = por %p4457_p1, %p4456_p0 }
  0x4c   : > { %p4452_p13 = pneg %p4451_p12 }
  0x4e   : > { %p4459_p7 = pnand %p4458_p4, %p4452_p13 }
  0x50   : > { %4462 = shalt.err (!%p4459_p7)
}
  0x51   : > { %4104 = dma.hbm_to_vmem [thread:$0]  (!%p4601_p5), %s5033_s3, 1024, %s232_s7, [#allocation8], %s4526_s14, %s4526_s14, %s4527_s15  }
  0x52   : > { %p5045_p2 = scmp.ne.s32.totalorder %s5040_s26, 0 }
  0x53   : > { %p5046_p8 = scmp.ne.s32.totalorder (!%p5045_p2), %s5039_s25, 0 }
  0x54   : > { %250 = sbr.rel (%p5045_p2) target bundleno = 1281 (0x501), region = 40 }
  0x5b   : > { %4502 = dma.done.wait (%p5046_p8), [#allocation5], 9216  }
  0x5c   : > { %4504 = vsyncadd (%p5046_p8), [#allocation5], 4294958080 }
  0x5d   : > { %4506 = dma.done.wait (%p5046_p8), [#allocation8], 4096  }
  0x5e   : > { %4508 = vsyncadd (%p5046_p8), [#allocation8], 4294963200  ;;  %p339_p3 = scmp.eq.s32.totalorder %s4515_s18, 0  ;;  %v4532_v0 = vmov 0.0   ;;  %p3523_p5 = scmp.ne.s32.totalorder %s4515_s18, 0 }
  0x5f   : > { %290 = vst [vmem:[#allocation3] sm:$0xff] %v4532_v0  ;;  %291 = vst [vmem:[#allocation3 + $0x8] sm:$0xff] %v4532_v0  ;;  %v4155_v1 = vld [vmem:[#allocation7] sm:$0xff] (!%p3523_p5)   ;;  %v4533_v2 = vmov (!%p3523_p5), 0   ;;  %v4156_v3 = vld [vmem:[#allocation7 + $0x8] sm:$0xff] (!%p3523_p5)  }
  0x60   : > { %292 = vst [vmem:[#allocation3 + $0x10] sm:$0xff] %v4532_v0  ;;  %293 = vst [vmem:[#allocation3 + $0x18] sm:$0xff] %v4532_v0  ;;  %1067 = vmatprep.subr.bf16.mxu0 (!%p3523_p5), %v4533_v2  ;;  %3999 = vmatprep.subr.bf16.mxu1 (!%p3523_p5), %v4533_v2  ;;  %v4157_v4 = vld [vmem:[#allocation7 + $0x10] sm:$0xff] (!%p3523_p5)   ;;  %v4158_v5 = vld [vmem:[#allocation7 + $0x18] sm:$0xff] (!%p3523_p5)  }
  0x61   : > { %294 = vst [vmem:[#allocation3 + $0x20] sm:$0xff] %v4532_v0  ;;  %295 = vst [vmem:[#allocation3 + $0x28] sm:$0xff] %v4532_v0  ;;  %1068 = vmatpush1.bf16.msra.mxu0 (!%p3523_p5), %v4155_v1  ;;  %4015 = vmatpush1.bf16.msra.mxu1 (!%p3523_p5), %v4155_v1  ;;  %v4159_v6 = vld [vmem:[#allocation7 + $0x20] sm:$0xff] (!%p3523_p5)   ;;  %v4160_v8 = vld [vmem:[#allocation7 + $0x28] sm:$0xff] (!%p3523_p5)  }
  0x62   : > { %296 = vst [vmem:[#allocation3 + $0x30] sm:$0xff] %v4532_v0  ;;  %297 = vst [vmem:[#allocation3 + $0x38] sm:$0xff] %v4532_v0  ;;  %1069 = vmatprep.subr.bf16.mxu0 (!%p3523_p5), %v4533_v2  ;;  %4000 = vmatprep.subr.bf16.mxu1 (!%p3523_p5), %v4533_v2  ;;  %v4173_v7 = vld [vmem:[#allocation4 + $0x4] ss:$12 sps:$4 sm:$0xff] (!%p3523_p5)   ;;  %v4176_v9 = vld [vmem:[#allocation4 + $0x1b4] ss:$12 sps:$4 sm:$0xff] (!%p3523_p5)  }
  0x63   : > { %298 = vst [vmem:[#allocation3 + $0x40] sm:$0xff] %v4532_v0  ;;  %299 = vst [vmem:[#allocation3 + $0x48] sm:$0xff] %v4532_v0  ;;  %1099 = vmatprep.mubr.bf16.mxu0 (!%p3523_p5), %v4173_v7  ;;  %1243 = vmatprep.mubr.bf16.mxu1 (!%p3523_p5), %v4176_v9  ;;  %v4161_v10 = vld [vmem:[#allocation7 + $0x30] sm:$0xff] (!%p3523_p5)   ;;  %v4162_v11 = vld [vmem:[#allocation7 + $0x38] sm:$0xff] (!%p3523_p5)  }
  0x64   : > { %300 = vst [vmem:[#allocation3 + $0x50] sm:$0xff] %v4532_v0  ;;  %301 = vst [vmem:[#allocation3 + $0x58] sm:$0xff] %v4532_v0  ;;  %v4163_v12 = vld [vmem:[#allocation7 + $0x40] sm:$0xff] (!%p3523_p5)   ;;  %v4164_v13 = vld [vmem:[#allocation7 + $0x48] sm:$0xff] (!%p3523_p5)  }
  0x65   : > { %302 = vst [vmem:[#allocation3 + $0x60] sm:$0xff] %v4532_v0  ;;  %303 = vst [vmem:[#allocation3 + $0x68] sm:$0xff] %v4532_v0  ;;  %1070 = vmatpush1.bf16.msra.mxu0 (!%p3523_p5), %v4156_v3  ;;  %4016 = vmatpush1.bf16.msra.mxu1 (!%p3523_p5), %v4156_v3  ;;  %v4165_v14 = vld [vmem:[#allocation7 + $0x50] sm:$0xff] (!%p3523_p5)   ;;  %v4166_v15 = vld [vmem:[#allocation7 + $0x58] sm:$0xff] (!%p3523_p5)  }
  0x66   : > { %304 = vst [vmem:[#allocation3 + $0x70] sm:$0xff] %v4532_v0  ;;  %305 = vst [vmem:[#allocation3 + $0x78] sm:$0xff] %v4532_v0  ;;  %1071 = vmatprep.subr.bf16.mxu0 (!%p3523_p5), %v4533_v2  ;;  %4001 = vmatprep.subr.bf16.mxu1 (!%p3523_p5), %v4533_v2  ;;  %v4167_v16 = vld [vmem:[#allocation7 + $0x60] sm:$0xff] (!%p3523_p5)   ;;  %v4168_v17 = vld [vmem:[#allocation7 + $0x68] sm:$0xff] (!%p3523_p5)  }
  0x67   : > { %306 = vst [vmem:[#allocation3 + $0x80] sm:$0xff] %v4532_v0  ;;  %307 = vst [vmem:[#allocation3 + $0x88] sm:$0xff] %v4532_v0  ;;  %v4169_v18 = vld [vmem:[#allocation7 + $0x70] sm:$0xff] (!%p3523_p5)   ;;  %v4170_v19 = vld [vmem:[#allocation7 + $0x78] sm:$0xff] (!%p3523_p5)  }
  0x68   : > { %308 = vst [vmem:[#allocation3 + $0x90] sm:$0xff] %v4532_v0  ;;  %309 = vst [vmem:[#allocation3 + $0x98] sm:$0xff] %v4532_v0  ;;  %v4171_v20 = vld [vmem:[#allocation4] ss:$12 sps:$4 sm:$0xff] (!%p3523_p5)   ;;  %v4174_v22 = vld [vmem:[#allocation4 + $0x1b0] ss:$12 sps:$4 sm:$0xff] (!%p3523_p5)  }
  0x69   : > { %310 = vst [vmem:[#allocation3 + $0xa0] sm:$0xff] %v4532_v0  ;;  %311 = vst [vmem:[#allocation3 + $0xa8] sm:$0xff] %v4532_v0  ;;  %1072 = vmatpush1.bf16.msra.mxu0 (!%p3523_p5), %v4157_v4  ;;  %4017 = vmatpush1.bf16.msra.mxu1 (!%p3523_p5), %v4157_v4  ;;  %v4177_v21 = vld [vmem:[#allocation7 + $0x80] sm:$0xff] (!%p3523_p5)   ;;  %v4178_v23 = vld [vmem:[#allocation7 + $0x88] sm:$0xff] (!%p3523_p5)  }
  0x6a   : > { %312 = vst [vmem:[#allocation3 + $0xb0] sm:$0xff] %v4532_v0  ;;  %313 = vst [vmem:[#allocation3 + $0xb8] sm:$0xff] %v4532_v0  ;;  %1073 = vmatprep.subr.bf16.mxu0 (!%p3523_p5), %v4533_v2  ;;  %4002 = vmatprep.subr.bf16.mxu1 (!%p3523_p5), %v4533_v2  ;;  %v4179_v24 = vld [vmem:[#allocation4 + $0x1c] ss:$12 sps:$4 sm:$0xff] (!%p3523_p5)   ;;  %v4181_v25 = vld [vmem:[#allocation4 + $0x1cc] ss:$12 sps:$4 sm:$0xff] (!%p3523_p5)  }
  0x6b   : > { %314 = vst [vmem:[#allocation3 + $0xc0] sm:$0xff] %v4532_v0  ;;  %315 = vst [vmem:[#allocation3 + $0xc8] sm:$0xff] %v4532_v0  ;;  %v4185_v26 = vld [vmem:[#allocation7 + $0x90] sm:$0xff] (!%p3523_p5)   ;;  %v4183_v27 = vld [vmem:[#allocation4 + $0x18] ss:$12 sps:$4 sm:$0xff] (!%p3523_p5)  }
  0x6c   : > { %316 = vst [vmem:[#allocation3 + $0xd0] sm:$0xff] %v4532_v0  ;;  %317 = vst [vmem:[#allocation3 + $0xd8] sm:$0xff] %v4532_v0  ;;  %v4184_v28 = vld [vmem:[#allocation4 + $0x1c8] ss:$12 sps:$4 sm:$0xff] (!%p3523_p5)   ;;  %v4188_v30 = vld [vmem:[#allocation4 + $0x1e4] ss:$12 sps:$4 sm:$0xff] (!%p3523_p5)  }
  0x6d   : > { %318 = vst [vmem:[#allocation3 + $0xe0] sm:$0xff] %v4532_v0  ;;  %319 = vst [vmem:[#allocation3 + $0xe8] sm:$0xff] %v4532_v0  ;;  %1074 = vmatpush1.bf16.msra.mxu0 (!%p3523_p5), %v4158_v5  ;;  %4018 = vmatpush1.bf16.msra.mxu1 (!%p3523_p5), %v4158_v5  ;;  %v4186_v29 = vld [vmem:[#allocation4 + $0x34] ss:$12 sps:$4 sm:$0xff] (!%p3523_p5)   ;;  %v4192_v31 = vld [vmem:[#allocation7 + $0x98] sm:$0xff] (!%p3523_p5)  }
  0x6e   : > { %320 = vst [vmem:[#allocation3 + $0xf0] sm:$0xff] %v4532_v0  ;;  %321 = vst [vmem:[#allocation3 + $0xf8] sm:$0xff] %v4532_v0  ;;  %1075 = vmatprep.subr.bf16.mxu0 (!%p3523_p5), %v4533_v2  ;;  %4003 = vmatprep.subr.bf16.mxu1 (!%p3523_p5), %v4533_v2  ;;  %v4199_v32 = vld [vmem:[#allocation7 + $0xa0] sm:$0xff] (!%p3523_p5)   ;;  %v4190_v33 = vld [vmem:[#allocation4 + $0x30] ss:$12 sps:$4 sm:$0xff] (!%p3523_p5)  }
  0x6f   : > { %322 = vst [vmem:[#allocation3 + $0x100] sm:$0xff] %v4532_v0  ;;  %323 = vst [vmem:[#allocation3 + $0x108] sm:$0xff] %v4532_v0  ;;  %v4191_v34 = vld [vmem:[#allocation4 + $0x1e0] ss:$12 sps:$4 sm:$0xff] (!%p3523_p5)   ;;  %v4195_v36 = vld [vmem:[#allocation4 + $0x1fc] ss:$12 sps:$4 sm:$0xff] (!%p3523_p5)  }
  0x70   : > { %324 = vst [vmem:[#allocation3 + $0x110] sm:$0xff] %v4532_v0  ;;  %325 = vst [vmem:[#allocation3 + $0x118] sm:$0xff] %v4532_v0  ;;  %342 = sbr.rel (%p3523_p5) target bundleno = 516 (0x204), region = 60  ;;  %v4193_v35 = vld [vmem:[#allocation4 + $0x4c] ss:$12 sps:$4 sm:$0xff] (!%p3523_p5)   ;;  %v4207_v38 = vld [vmem:[#allocation7 + $0xb0] sm:$0xff] (!%p3523_p5)  }
  0x71   : > { %326 = vst [vmem:[#allocation3 + $0x120] sm:$0xff] %v4532_v0  ;;  %327 = vst [vmem:[#allocation3 + $0x128] sm:$0xff] %v4532_v0  ;;  %1076 = vmatpush1.bf16.msra.mxu0 (!%p3523_p5), %v4159_v6  ;;  %4019 = vmatpush1.bf16.msra.mxu1 (!%p3523_p5), %v4159_v6  ;;  %v4200_v37 = vld [vmem:[#allocation7 + $0xa8] sm:$0xff] (!%p3523_p5)   ;;  %v4198_v40 = vld [vmem:[#allocation4 + $0x1f8] ss:$12 sps:$4 sm:$0xff] (!%p3523_p5)  }
  0x72   : > { %328 = vst [vmem:[#allocation3 + $0x130] sm:$0xff] %v4532_v0  ;;  %329 = vst [vmem:[#allocation3 + $0x138] sm:$0xff] %v4532_v0  ;;  %1077 = vmatprep.subr.bf16.mxu0 (!%p3523_p5), %v4533_v2  ;;  %4004 = vmatprep.subr.bf16.mxu1 (!%p3523_p5), %v4533_v2  ;;  %v4197_v39 = vld [vmem:[#allocation4 + $0x48] ss:$12 sps:$4 sm:$0xff] (!%p3523_p5)   ;;  %v4201_v41 = vld [vmem:[#allocation4 + $0x64] ss:$12 sps:$4 sm:$0xff] (!%p3523_p5)  }
  0x73   : > { %330 = vst [vmem:[#allocation3 + $0x140] sm:$0xff] %v4532_v0  ;;  %331 = vst [vmem:[#allocation3 + $0x148] sm:$0xff] %v4532_v0  ;;  %v4203_v42 = vld [vmem:[#allocation4 + $0x214] ss:$12 sps:$4 sm:$0xff] (!%p3523_p5)   ;;  %v4214_v43 = vld [vmem:[#allocation7 + $0xb8] sm:$0xff] (!%p3523_p5)  }
  0x74   : > { %332 = vst [vmem:[#allocation3 + $0x150] sm:$0xff] %v4532_v0  ;;  %333 = vst [vmem:[#allocation3 + $0x158] sm:$0xff] %v4532_v0  ;;  %v4205_v44 = vld [vmem:[#allocation4 + $0x60] ss:$12 sps:$4 sm:$0xff] (!%p3523_p5)   ;;  %v4206_v45 = vld [vmem:[#allocation4 + $0x210] ss:$12 sps:$4 sm:$0xff] (!%p3523_p5)  }
  0x75   : > { %334 = vst [vmem:[#allocation3 + $0x160] sm:$0xff] %v4532_v0  ;;  %335 = vst [vmem:[#allocation3 + $0x168] sm:$0xff] %v4532_v0  ;;  %1078 = vmatpush1.bf16.msra.mxu0 (!%p3523_p5), %v4160_v8  ;;  %4020 = vmatpush1.bf16.msra.mxu1 (!%p3523_p5), %v4160_v8  ;;  %v4208_v46 = vld [vmem:[#allocation4 + $0x7c] ss:$12 sps:$4 sm:$0xff] (!%p3523_p5)   ;;  %v4210_v47 = vld [vmem:[#allocation4 + $0x22c] ss:$12 sps:$4 sm:$0xff] (!%p3523_p5)  }
  0x76   : > { %336 = vst [vmem:[#allocation3 + $0x170] sm:$0xff] %v4532_v0  ;;  %337 = vst [vmem:[#allocation3 + $0x178] sm:$0xff] %v4532_v0  ;;  %1079 = vmatprep.subr.bf16.mxu0 (!%p3523_p5), %v4533_v2  ;;  %4005 = vmatprep.subr.bf16.mxu1 (!%p3523_p5), %v4533_v2  ;;  %v4212_v48 = vld [vmem:[#allocation4 + $0x78] ss:$12 sps:$4 sm:$0xff] (!%p3523_p5)   ;;  %v4213_v49 = vld [vmem:[#allocation4 + $0x228] ss:$12 sps:$4 sm:$0xff] (!%p3523_p5)  }
  0x77   : > { %v4215_v50 = vld [vmem:[#allocation4 + $0x94] ss:$12 sps:$4 sm:$0xff]   ;;  %v4218_v52 = vld [vmem:[#allocation4 + $0x90] ss:$12 sps:$4 sm:$0xff]   ;;  %v4220_v54 = vld [vmem:[#allocation4 + $0xac] ss:$12 sps:$4 sm:$0xff]  }
  0x78   : > { %v4217_v51 = vld [vmem:[#allocation4 + $0x8] ss:$12 sps:$4 sm:$0xff]   ;;  %v4219_v53 = vld [vmem:[#allocation4 + $0x20] ss:$12 sps:$4 sm:$0xff]   ;;  %v4222_v55 = vld [vmem:[#allocation4 + $0x38] ss:$12 sps:$4 sm:$0xff]  }
  0x79   : > { %1080 = vmatpush1.bf16.msra.mxu0 %v4161_v10  ;;  %4021 = vmatpush1.bf16.msra.mxu1 %v4161_v10  ;;  %v4223_v56 = vld [vmem:[#allocation4 + $0xa8] ss:$12 sps:$4 sm:$0xff]   ;;  %v4224_v57 = vld [vmem:[#allocation4 + $0x50] ss:$12 sps:$4 sm:$0xff]   ;;  %v4228_v60 = vld [vmem:[#allocation4 + $0xc0] ss:$12 sps:$4 sm:$0xff]  }
  0x7a   : > { %1081 = vmatprep.subr.bf16.mxu0 %v4533_v2  ;;  %4006 = vmatprep.subr.bf16.mxu1 %v4533_v2  ;;  %v4225_v58 = vld [vmem:[#allocation4 + $0xc4] ss:$12 sps:$4 sm:$0xff]   ;;  %v4227_v59 = vld [vmem:[#allocation4 + $0x68] ss:$12 sps:$4 sm:$0xff]   ;;  %v4229_v61 = vld [vmem:[#allocation4 + $0x80] ss:$12 sps:$4 sm:$0xff]  }
  0x7b   : > { %v4230_v62 = vld [vmem:[#allocation4 + $0xdc] ss:$12 sps:$4 sm:$0xff]   ;;  %v4232_v63 = vld [vmem:[#allocation4 + $0x98] ss:$12 sps:$4 sm:$0xff]   ;;  %v4239_v5 = vld [vmem:[#allocation4 + $0xe0] ss:$12 sps:$4 sm:$0xff]  }
  0x7c   : > { %v4233_v0 = vld [vmem:[#allocation4 + $0xd8] ss:$12 sps:$4 sm:$0xff]   ;;  %v4234_v1 = vld [vmem:[#allocation4 + $0xb0] ss:$12 sps:$4 sm:$0xff]   ;;  %v4237_v3 = vld [vmem:[#allocation4 + $0xc8] ss:$12 sps:$4 sm:$0xff]  }
  0x7d   : > { %1082 = vmatpush1.bf16.msra.mxu0 %v4162_v11  ;;  %4022 = vmatpush1.bf16.msra.mxu1 %v4162_v11  ;;  %v4238_v4 = vld [vmem:[#allocation4 + $0xf0] ss:$12 sps:$4 sm:$0xff]   ;;  %v4240_v6 = vld [vmem:[#allocation4 + $0x10c] ss:$12 sps:$4 sm:$0xff]   ;;  %v4243_v8 = vld [vmem:[#allocation4 + $0x108] ss:$12 sps:$4 sm:$0xff]  }
  0x7e   : > { %1083 = vmatprep.subr.bf16.mxu0 %v4533_v2  ;;  %4007 = vmatprep.subr.bf16.mxu1 %v4533_v2  ;;  %v4242_v7 = vld [vmem:[#allocation4 + $0xf8] ss:$12 sps:$4 sm:$0xff]   ;;  %v4244_v9 = vld [vmem:[#allocation4 + $0x110] ss:$12 sps:$4 sm:$0xff]   ;;  %v4247_v11 = vld [vmem:[#allocation4 + $0x128] ss:$12 sps:$4 sm:$0xff]  }
  0x7f   : > { %v4245_v10 = vld [vmem:[#allocation4 + $0x124] ss:$12 sps:$4 sm:$0xff]  }
  0x81   : > { %1084 = vmatpush1.bf16.msra.mxu0 %v4163_v12  ;;  %4023 = vmatpush1.bf16.msra.mxu1 %v4163_v12  ;;  %v4248_v12 = vld [vmem:[#allocation4 + $0x120] ss:$12 sps:$4 sm:$0xff]  }
  0x82   : > { %1085 = vmatprep.subr.bf16.mxu0 %v4533_v2  ;;  %4008 = vmatprep.subr.bf16.mxu1 %v4533_v2 }
  0x85   : > { %1086 = vmatpush1.bf16.msra.mxu0 %v4164_v13  ;;  %4024 = vmatpush1.bf16.msra.mxu1 %v4164_v13  ;;  %v4249_v13 = vld [vmem:[#allocation4 + $0x140] ss:$12 sps:$4 sm:$0xff]  }
  0x86   : > { %1087 = vmatprep.subr.bf16.mxu0 %v4533_v2  ;;  %4009 = vmatprep.subr.bf16.mxu1 %v4533_v2 }
  0x89   : > { %1088 = vmatpush1.bf16.msra.mxu0 %v4165_v14  ;;  %4025 = vmatpush1.bf16.msra.mxu1 %v4165_v14  ;;  %v4250_v14 = vld [vmem:[#allocation4 + $0x13c] ss:$12 sps:$4 sm:$0xff]  }
  0x8a   : > { %1089 = vmatprep.subr.bf16.mxu0 %v4533_v2  ;;  %4010 = vmatprep.subr.bf16.mxu1 %v4533_v2 }
  0x8d   : > { %1090 = vmatpush1.bf16.msra.mxu0 %v4166_v15  ;;  %4026 = vmatpush1.bf16.msra.mxu1 %v4166_v15  ;;  %v4252_v15 = vld [vmem:[#allocation4 + $0x158] ss:$12 sps:$4 sm:$0xff]  }
  0x8e   : > { %1091 = vmatprep.subr.bf16.mxu0 %v4533_v2  ;;  %4011 = vmatprep.subr.bf16.mxu1 %v4533_v2 }
  0x91   : > { %1092 = vmatpush1.bf16.msra.mxu0 %v4167_v16  ;;  %4027 = vmatpush1.bf16.msra.mxu1 %v4167_v16  ;;  %v4253_v16 = vld [vmem:[#allocation4 + $0x138] ss:$12 sps:$4 sm:$0xff]  }
  0x92   : > { %1093 = vmatprep.subr.bf16.mxu0 %v4533_v2  ;;  %4012 = vmatprep.subr.bf16.mxu1 %v4533_v2 }
  0x95   : > { %1094 = vmatpush1.bf16.msra.mxu0 %v4168_v17  ;;  %4028 = vmatpush1.bf16.msra.mxu1 %v4168_v17  ;;  %v4254_v17 = vld [vmem:[#allocation4 + $0x170] ss:$12 sps:$4 sm:$0xff]  }
  0x96   : > { %1095 = vmatprep.subr.bf16.mxu0 %v4533_v2  ;;  %4013 = vmatprep.subr.bf16.mxu1 %v4533_v2 }
  0x99   : > { %1096 = vmatpush1.bf16.msra.mxu0 %v4169_v18  ;;  %4029 = vmatpush1.bf16.msra.mxu1 %v4169_v18  ;;  %v4255_v18 = vld [vmem:[#allocation4 + $0x154] ss:$12 sps:$4 sm:$0xff]  }
  0x9a   : > { %1097 = vmatprep.subr.bf16.mxu0 %v4533_v2  ;;  %4014 = vmatprep.subr.bf16.mxu1 %v4533_v2  ;;  %v4235_v2 = vld [vmem:[#allocation4 + $0xf4] ss:$12 sps:$4 sm:$0xff]  }
  0x9d   : > { %1098 = vmatpush1.bf16.msra.mxu0 %v4170_v19  ;;  %4030 = vmatpush1.bf16.msra.mxu1 %v4170_v19  ;;  %v4257_v19 = vld [vmem:[#allocation4 + $0x188] ss:$12 sps:$4 sm:$0xff]  }
  0x9e   : > { %3807 = vmatprep.subr.bf16.mxu1 %v4177_v21 }
  0xa0   : > { %1100 = vmatmul.mubr.bf16.vlgmr.msra.gmra.mrb[0].mxu0 %v4171_v20  ;;  %1244 = vmatmul.mubr.bf16.vlgmr.msra.gmra.mrb[0].mxu1 %v4174_v22  ;;  %v4258_v20 = vld [vmem:[#allocation4 + $0x150] ss:$12 sps:$4 sm:$0xff]   ;;  %v4260_v22 = vld [vmem:[#allocation4 + $0x16c] ss:$12 sps:$4 sm:$0xff]  }
  0xa1   : > { %3808 = vmatpush3.bf16.msra.mxu1 %v4177_v21  ;;  %1107 = vmatprep.mubr.bf16.mxu0 %v4179_v24  ;;  %v4259_v21 = vld [vmem:[#allocation4 + $0x1a0] ss:$12 sps:$4 sm:$0xff]   ;;  %v4263_v24 = vld [vmem:[#allocation4 + $0x168] ss:$12 sps:$4 sm:$0xff]  }
  0xa2   : > { %3809 = vmatprep.subr.bf16.mxu1 %v4178_v23  ;;  %1251 = vmatprep.mubr.bf16.mxu1 %v4181_v25  ;;  %v4264_v25 = vld [vmem:[#allocation4 + $0x1d0] ss:$12 sps:$4 sm:$0xff]  }
  0xa5   : > { %3810 = vmatpush3.bf16.msra.mxu1 %v4178_v23  ;;  %v4262_v23 = vld [vmem:[#allocation4 + $0x1b8] ss:$12 sps:$4 sm:$0xff]  }
  0xa6   : > { %3811 = vmatprep.subr.bf16.mxu1 %v4185_v26 }
  0xa8   : > { %1108 = vmatmul.mubr.bf16.gmra.mrb[4].mxu0 %v4183_v27  ;;  %1252 = vmatmul.mubr.bf16.gmra.mrb[4].mxu1 %v4184_v28  ;;  %v4267_v27 = vld [vmem:[#allocation4 + $0x1e8] ss:$12 sps:$4 sm:$0xff]   ;;  %v4268_v28 = vld [vmem:[#allocation4 + $0x180] ss:$12 sps:$4 sm:$0xff]  }
  0xa9   : > { %3812 = vmatpush3.bf16.msra.mxu1 %v4185_v26  ;;  %1115 = vmatprep.mubr.bf16.mxu0 %v4186_v29  ;;  %v4265_v26 = vld [vmem:[#allocation4 + $0x184] ss:$12 sps:$4 sm:$0xff]   ;;  %v4269_v29 = vld [vmem:[#allocation4 + $0x200] ss:$12 sps:$4 sm:$0xff]  }
  0xaa   : > { %1259 = vmatprep.mubr.bf16.mxu1 %v4188_v30  ;;  %3813 = vmatprep.subr.bf16.mxu1 %v4192_v31  ;;  %v4270_v30 = vld [vmem:[#allocation4 + $0x19c] ss:$12 sps:$4 sm:$0xff]  }
  0xad   : > { %3814 = vmatpush3.bf16.msra.mxu1 %v4192_v31  ;;  %v4272_v31 = vld [vmem:[#allocation4 + $0x218] ss:$12 sps:$4 sm:$0xff]  }
  0xae   : > { %3815 = vmatprep.subr.bf16.mxu1 %v4199_v32 }
  0xb0   : > { %1116 = vmatmul.mubr.bf16.gmra.mrb[8].mxu0 %v4190_v33  ;;  %1260 = vmatmul.mubr.bf16.gmra.mrb[8].mxu1 %v4191_v34  ;;  %v4274_v33 = vld [vmem:[#allocation4 + $0x230] ss:$12 sps:$4 sm:$0xff]  }
  0xb1   : > { %1123 = vmatprep.mubr.bf16.mxu0 %v4193_v35  ;;  %1267 = vmatprep.mubr.bf16.mxu1 %v4195_v36 }
  0xb2   : > { %3816 = vmatpush3.bf16.msra.mxu1 %v4199_v32  ;;  %v4273_v32 = vld [vmem:[#allocation4 + $0x198] ss:$12 sps:$4 sm:$0xff]  }
  0xb3   : > { %3817 = vmatprep.subr.bf16.mxu1 %v4200_v37 }
  0xb6   : > { %3818 = vmatpush3.bf16.msra.mxu1 %v4200_v37 }
  0xb7   : > { %3819 = vmatprep.subr.bf16.mxu1 %v4207_v38 }
  0xb8   : > { %1124 = vmatmul.mubr.bf16.gmra.mrb[12].mxu0 %v4197_v39  ;;  %1268 = vmatmul.mubr.bf16.gmra.mrb[12].mxu1 %v4198_v40 }
  0xb9   : > { %1131 = vmatprep.mubr.bf16.mxu0 %v4201_v41  ;;  %1275 = vmatprep.mubr.bf16.mxu1 %v4203_v42 }
  0xba   : > { %3820 = vmatpush3.bf16.msra.mxu1 %v4207_v38 }
  0xbb   : > { %3821 = vmatprep.subr.bf16.mxu1 %v4214_v43 }
  0xbe   : > { %3822 = vmatpush3.bf16.msra.mxu1 %v4214_v43 }
  0xc0   : > { %1132 = vmatmul.mubr.bf16.gmra.mrb[16].mxu0 %v4205_v44  ;;  %1276 = vmatmul.mubr.bf16.gmra.mrb[16].mxu1 %v4206_v45 }
  0xc1   : > { %1139 = vmatprep.mubr.bf16.mxu0 %v4208_v46  ;;  %1283 = vmatprep.mubr.bf16.mxu1 %v4210_v47 }
  0xc8   : > { %1140 = vmatmul.mubr.bf16.gmra.mrb[20].mxu0 %v4212_v48  ;;  %1284 = vmatmul.mubr.bf16.gmra.mrb[20].mxu1 %v4213_v49 }
  0xc9   : > { %1147 = vmatprep.mubr.bf16.mxu0 %v4215_v50  ;;  %3823 = vmatprep.mubr.bf16.mxu1 %v4217_v51 }
  0xd0   : > { %1148 = vmatmul.mubr.bf16.gmra.mrb[24].mxu0 %v4218_v52  ;;  %3824 = vmatmul.mubr.bf16.vlgmr.msra.gmra.mrb[24].mxu1 %v4219_v53 }
  0xd1   : > { %1155 = vmatprep.mubr.bf16.mxu0 %v4220_v54  ;;  %3827 = vmatprep.mubr.bf16.mxu1 %v4222_v55 }
  0xd8   : > { %1156 = vmatmul.mubr.bf16.gmra.mrb[28].mxu0 %v4223_v56  ;;  %3828 = vmatmul.mubr.bf16.gmra.mrb[28].mxu1 %v4224_v57 }
  0xd9   : > { %1163 = vmatprep.mubr.bf16.mxu0 %v4225_v58  ;;  %3831 = vmatprep.mubr.bf16.mxu1 %v4227_v59 }
  0xe0   : > { %1164 = vmatmul.mubr.bf16.gmra.mrb[32].mxu0 %v4228_v60  ;;  %3832 = vmatmul.mubr.bf16.gmra.mrb[32].mxu1 %v4229_v61 }
  0xe1   : > { %1171 = vmatprep.mubr.bf16.mxu0 %v4230_v62  ;;  %3835 = vmatprep.mubr.bf16.mxu1 %v4232_v63 }
  0xe8   : > { %1172 = vmatmul.mubr.bf16.gmra.mrb[36].mxu0 %v4233_v0  ;;  %3836 = vmatmul.mubr.bf16.gmra.mrb[36].mxu1 %v4234_v1 }
  0xe9   : > { %1179 = vmatprep.mubr.bf16.mxu0 %v4235_v2  ;;  %3839 = vmatprep.mubr.bf16.mxu1 %v4237_v3 }
  0xf0   : > { %1180 = vmatmul.mubr.bf16.gmra.mrb[40].mxu0 %v4238_v4  ;;  %3840 = vmatmul.mubr.bf16.gmra.mrb[40].mxu1 %v4239_v5 }
  0xf1   : > { %1187 = vmatprep.mubr.bf16.mxu0 %v4240_v6  ;;  %3843 = vmatprep.mubr.bf16.mxu1 %v4242_v7 }
  0xf8   : > { %1188 = vmatmul.mubr.bf16.gmra.mrb[44].mxu0 %v4243_v8  ;;  %3844 = vmatmul.mubr.bf16.gmra.mrb[44].mxu1 %v4244_v9 }
  0xf9   : > { %1195 = vmatprep.mubr.bf16.mxu0 %v4245_v10  ;;  %3847 = vmatprep.mubr.bf16.mxu1 %v4247_v11 }
 0x100   : > { %1196 = vmatmul.mubr.bf16.gmra.mrb[48].mxu0 %v4248_v12  ;;  %3848 = vmatmul.mubr.bf16.gmra.mrb[48].mxu1 %v4249_v13 }
 0x101   : > { %1203 = vmatprep.mubr.bf16.mxu0 %v4250_v14  ;;  %3851 = vmatprep.mubr.bf16.mxu1 %v4252_v15 }
 0x108   : > { %1204 = vmatmul.mubr.bf16.gmra.mrb[52].mxu0 %v4253_v16  ;;  %3852 = vmatmul.mubr.bf16.gmra.mrb[52].mxu1 %v4254_v17 }
 0x109   : > { %1211 = vmatprep.mubr.bf16.mxu0 %v4255_v18  ;;  %3855 = vmatprep.mubr.bf16.mxu1 %v4257_v19  ;;  %v345_v19 = vld [vmem:[#allocation3 + $0x10] sm:$0xff] }
 0x110   : > { %1212 = vmatmul.mubr.bf16.gmra.mrb[56].mxu0 %v4258_v20  ;;  %3856 = vmatmul.mubr.bf16.gmra.mrb[56].mxu1 %v4259_v21 }
 0x111   : > { %1219 = vmatprep.mubr.bf16.mxu0 %v4260_v22  ;;  %3859 = vmatprep.mubr.bf16.mxu1 %v4262_v23  ;;  %v343_v23 = vld [vmem:[#allocation3] sm:$0xff] }
 0x118   : > { %1220 = vmatmul.mubr.bf16.gmra.mrb[60].mxu0 %v4263_v24  ;;  %3860 = vmatmul.mubr.bf16.gmra.mrb[60].mxu1 %v4264_v25 }
 0x119   : > { %1227 = vmatprep.mubr.bf16.mxu0 %v4265_v26  ;;  %3863 = vmatprep.mubr.bf16.mxu1 %v4267_v27  ;;  %v346_v27 = vld [vmem:[#allocation3 + $0x18] sm:$0xff] }
 0x120   : > { %1228 = vmatmul.mubr.bf16.gmra.mrb[64].mxu0 %v4268_v28  ;;  %3864 = vmatmul.mubr.bf16.gmra.mrb[64].mxu1 %v4269_v29 }
 0x121   : > { %1235 = vmatprep.mubr.bf16.mxu0 %v4270_v30  ;;  %3867 = vmatprep.mubr.bf16.mxu1 %v4272_v31 }
 0x128   : > { %1236 = vmatmul.mubr.bf16.gmra.mrb[68].mxu0 %v4273_v32  ;;  %3868 = vmatmul.mubr.bf16.gmra.mrb[68].mxu1 %v4274_v33  ;;  %v344_v32 = vld [vmem:[#allocation3 + $0x8] sm:$0xff] }
 0x173   : > { %v1101_v34 = vpop.f32.mrb[0].mxu0  ;;  %v4724_v35 = vpop.f32.mrb[0].mxu1 }
 0x174   : > { %v1103_v36 = vpop.f32.mrb[1].mxu0  ;;  %v1247_v37 = vpop.f32.mrb[1].mxu1 }
 0x175   : > { %v1104_v38 = vpop.f32.mrb[2].mxu0  ;;  %v4726_v39 = vpop.f32.mrb[2].mxu1 }
 0x176   : > { %v1106_v40 = vpop.f32.mrb[3].mxu0  ;;  %v1250_v41 = vpop.f32.mrb[3].mxu1 }
 0x17b   : > { %v1109_v42 = vpop.f32.mrb[4].mxu0  ;;  %v4728_v43 = vpop.f32.mrb[4].mxu1 }
 0x17c   : > { %v1111_v44 = vpop.f32.mrb[5].mxu0  ;;  %v1255_v45 = vpop.f32.mrb[5].mxu1 }
 0x17d   : > { %v1112_v46 = vpop.f32.mrb[6].mxu0  ;;  %v4730_v47 = vpop.f32.mrb[6].mxu1  ;;  %v349_v44 = vld [vmem:[#allocation3 + $0x30] sm:$0xff] }
 0x17e   : > { %v1114_v48 = vpop.f32.mrb[7].mxu0  ;;  %v1258_v49 = vpop.f32.mrb[7].mxu1 }
 0x17f   : > { %v347_v49 = vld [vmem:[#allocation3 + $0x20] sm:$0xff] }
 0x183   : > { %v4732_v50 = vpop.f32.mrb[8].mxu0  ;;  %v4734_v51 = vpop.f32.mrb[8].mxu1 }
 0x184   : > { %v1119_v52 = vpop.f32.mrb[9].mxu0  ;;  %v1263_v53 = vpop.f32.mrb[9].mxu1 }
 0x185   : > { %v4736_v54 = vpop.f32.mrb[10].mxu0  ;;  %v4738_v55 = vpop.f32.mrb[10].mxu1 }
 0x186   : > { %v1122_v56 = vpop.f32.mrb[11].mxu0  ;;  %v1266_v57 = vpop.f32.mrb[11].mxu1 }
 0x187   : > { %v350_v56 = vld [vmem:[#allocation3 + $0x38] sm:$0xff] }
 0x18b   : > { %v1125_v58 = vpop.f32.mrb[12].mxu0  ;;  %v4740_v59 = vpop.f32.mrb[12].mxu1 }
 0x18c   : > { %v1127_v60 = vpop.f32.mrb[13].mxu0  ;;  %v1271_v61 = vpop.f32.mrb[13].mxu1 }
 0x18d   : > { %v1128_v62 = vpop.f32.mrb[14].mxu0  ;;  %v4742_v63 = vpop.f32.mrb[14].mxu1 }
 0x18e   : > { %v1130_v0 = vpop.f32.mrb[15].mxu0  ;;  %v1274_v1 = vpop.f32.mrb[15].mxu1 }
 0x18f   : > { %v348_v0 = vld [vmem:[#allocation3 + $0x28] sm:$0xff] }
 0x193   : > { %v4744_v2 = vpop.f32.mrb[16].mxu0  ;;  %v4746_v3 = vpop.f32.mrb[16].mxu1 }
 0x194   : > { %v1135_v4 = vpop.f32.mrb[17].mxu0  ;;  %v1279_v5 = vpop.f32.mrb[17].mxu1 }
 0x195   : > { %v4748_v6 = vpop.f32.mrb[18].mxu0  ;;  %v4750_v7 = vpop.f32.mrb[18].mxu1 }
 0x196   : > { %v1138_v8 = vpop.f32.mrb[19].mxu0  ;;  %v1282_v9 = vpop.f32.mrb[19].mxu1 }
 0x19b   : > { %v1141_v10 = vpop.f32.mrb[20].mxu0  ;;  %v4752_v11 = vpop.f32.mrb[20].mxu1 }
 0x19c   : > { %v1143_v12 = vpop.f32.mrb[21].mxu0  ;;  %v1287_v13 = vpop.f32.mrb[21].mxu1 }
 0x19d   : > { %v4754_v14 = vpop.f32.mrb[22].mxu0  ;;  %v4756_v15 = vpop.f32.mrb[22].mxu1  ;;  %v353_v12 = vld [vmem:[#allocation3 + $0x50] sm:$0xff] }
 0x19e   : > { %v1146_v16 = vpop.f32.mrb[23].mxu0  ;;  %v1290_v17 = vpop.f32.mrb[23].mxu1 }
 0x19f   : > { %v351_v17 = vld [vmem:[#allocation3 + $0x40] sm:$0xff] }
 0x1a3   : > { %v4758_v18 = vpop.f32.mrb[24].mxu0  ;;  %v3825_v20 = vpop.f32.mrb[24].mxu1 }
 0x1a4   : > { %v1335_v21 = vadd.f32 %v3825_v20, %v1109_v42  ;;  %v1151_v22 = vpop.f32.mrb[25].mxu0  ;;  %v1326_v24 = vpop.f32.mrb[25].mxu1 }
 0x1a5   : > { %v1327_v25 = vadd.f32 %v1326_v24, %v1101_v34  ;;  %v4760_v26 = vpop.f32.mrb[26].mxu0  ;;  %v3826_v28 = vpop.f32.mrb[26].mxu1 }
 0x1a6   : > { %v1519_v29 = vadd.f32 %v1335_v21, %v345_v19  ;;  %v1338_v30 = vadd.f32 %v3826_v28, %v1112_v46  ;;  %v1154_v31 = vpop.f32.mrb[27].mxu0  ;;  %v1329_v33 = vpop.f32.mrb[27].mxu1  ;;  %v354_v21 = vld [vmem:[#allocation3 + $0x58] sm:$0xff] }
 0x1a7   : > { %v1517_v36 = vadd.f32 %v1327_v25, %v343_v23  ;;  %v1330_v37 = vadd.f32 %v1329_v33, %v1104_v38  ;;  %v352_v25 = vld [vmem:[#allocation3 + $0x48] sm:$0xff] }
 0x1a8   : > { %1567 = vst [vmem:[#allocation3 + $0x10] sm:$0xff] %v1519_v29  ;;  %v1520_v40 = vadd.f32 %v1338_v30, %v346_v27 }
 0x1a9   : > { %1565 = vst [vmem:[#allocation3] sm:$0xff] %v1517_v36  ;;  %v1518_v41 = vadd.f32 %v1330_v37, %v344_v32  ;;  %v355_v37 = vld [vmem:[#allocation3 + $0x60] sm:$0xff] }
 0x1aa   : > { %1568 = vst [vmem:[#allocation3 + $0x18] sm:$0xff] %v1520_v40 }
 0x1ab   : > { %1566 = vst [vmem:[#allocation3 + $0x8] sm:$0xff] %v1518_v41  ;;  %v1157_v42 = vpop.f32.mrb[28].mxu0  ;;  %v3829_v34 = vpop.f32.mrb[28].mxu1 }
 0x1ac   : > { %v1351_v45 = vadd.f32 %v3829_v34, %v1125_v58  ;;  %v1159_v48 = vpop.f32.mrb[29].mxu0  ;;  %v1342_v52 = vpop.f32.mrb[29].mxu1 }
 0x1ad   : > { %v1343_v46 = vadd.f32 %v1342_v52, %v4732_v50  ;;  %v1160_v53 = vpop.f32.mrb[30].mxu0  ;;  %v3830_v57 = vpop.f32.mrb[30].mxu1 }
 0x1ae   : > { %v1523_v60 = vadd.f32 %v1351_v45, %v349_v44  ;;  %v1354_v38 = vadd.f32 %v3830_v57, %v1128_v62  ;;  %v1162_v61 = vpop.f32.mrb[31].mxu0  ;;  %v1345_v1 = vpop.f32.mrb[31].mxu1  ;;  %v358_v44 = vld [vmem:[#allocation3 + $0x78] sm:$0xff] }
 0x1af   : > { %v1521_v4 = vadd.f32 %v1343_v46, %v347_v49  ;;  %v1346_v5 = vadd.f32 %v1345_v1, %v4736_v54  ;;  %v356_v49 = vld [vmem:[#allocation3 + $0x68] sm:$0xff]  ;;  %v359_v1 = vld [vmem:[#allocation3 + $0x80] sm:$0xff] }
 0x1b0   : > { %1571 = vst [vmem:[#allocation3 + $0x30] sm:$0xff] %v1523_v60  ;;  %v1524_v8 = vadd.f32 %v1354_v38, %v350_v56  ;;  %v361_v38 = vld [vmem:[#allocation3 + $0x90] sm:$0xff] }
 0x1b1   : > { %1569 = vst [vmem:[#allocation3 + $0x20] sm:$0xff] %v1521_v4  ;;  %v1522_v58 = vadd.f32 %v1346_v5, %v348_v0 }
 0x1b2   : > { %1572 = vst [vmem:[#allocation3 + $0x38] sm:$0xff] %v1524_v8  ;;  %v362_v8 = vld [vmem:[#allocation3 + $0x98] sm:$0xff] }
 0x1b3   : > { %1570 = vst [vmem:[#allocation3 + $0x28] sm:$0xff] %v1522_v58  ;;  %v1165_v9 = vpop.f32.mrb[32].mxu0  ;;  %v3833_v50 = vpop.f32.mrb[32].mxu1 }
 0x1b4   : > { %v1367_v13 = vadd.f32 %v3833_v50, %v1141_v10  ;;  %v1167_v16 = vpop.f32.mrb[33].mxu0  ;;  %v1358_v19 = vpop.f32.mrb[33].mxu1 }
 0x1b5   : > { %v1359_v62 = vadd.f32 %v1358_v19, %v4744_v2  ;;  %v1168_v20 = vpop.f32.mrb[34].mxu0  ;;  %v3834_v22 = vpop.f32.mrb[34].mxu1  ;;  %v357_v2 = vld [vmem:[#allocation3 + $0x70] sm:$0xff] }
 0x1b6   : > { %v1527_v23 = vadd.f32 %v1367_v13, %v353_v12  ;;  %v1370_v54 = vadd.f32 %v3834_v22, %v4754_v14  ;;  %v1170_v24 = vpop.f32.mrb[35].mxu0  ;;  %v1361_v27 = vpop.f32.mrb[35].mxu1  ;;  %v360_v13 = vld [vmem:[#allocation3 + $0x88] sm:$0xff] }
 0x1b7   : > { %v1525_v28 = vadd.f32 %v1359_v62, %v351_v17  ;;  %v1362_v29 = vadd.f32 %v1361_v27, %v4748_v6 }
 0x1b8   : > { %1575 = vst [vmem:[#allocation3 + $0x50] sm:$0xff] %v1527_v23  ;;  %v1528_v30 = vadd.f32 %v1370_v54, %v354_v21  ;;  %v365_v23 = vld [vmem:[#allocation3 + $0xb0] sm:$0xff] }
 0x1b9   : > { %1573 = vst [vmem:[#allocation3 + $0x40] sm:$0xff] %v1525_v28  ;;  %v1526_v10 = vadd.f32 %v1362_v29, %v352_v25  ;;  %v363_v25 = vld [vmem:[#allocation3 + $0xa0] sm:$0xff] }
 0x1ba   : > { %1576 = vst [vmem:[#allocation3 + $0x58] sm:$0xff] %v1528_v30  ;;  %v366_v30 = vld [vmem:[#allocation3 + $0xb8] sm:$0xff] }
 0x1bb   : > { %1574 = vst [vmem:[#allocation3 + $0x48] sm:$0xff] %v1526_v10  ;;  %v1173_v31 = vpop.f32.mrb[36].mxu0  ;;  %v3837_v32 = vpop.f32.mrb[36].mxu1 }
 0x1bc   : > { %v1383_v33 = vadd.f32 %v3837_v32, %v1157_v42  ;;  %v1175_v36 = vpop.f32.mrb[37].mxu0  ;;  %v1374_v40 = vpop.f32.mrb[37].mxu1  ;;  %v364_v32 = vld [vmem:[#allocation3 + $0xa8] sm:$0xff] }
 0x1bd   : > { %v1375_v14 = vadd.f32 %v1374_v40, %v4758_v18  ;;  %v1176_v41 = vpop.f32.mrb[38].mxu0  ;;  %v3838_v34 = vpop.f32.mrb[38].mxu1 }
 0x1be   : > { %v1531_v45 = vadd.f32 %v1383_v33, %v357_v2  ;;  %v1386_v6 = vadd.f32 %v3838_v34, %v1160_v53  ;;  %v1178_v48 = vpop.f32.mrb[39].mxu0  ;;  %v1377_v52 = vpop.f32.mrb[39].mxu1 }
 0x1bf   : > { %v1529_v46 = vadd.f32 %v1375_v14, %v355_v37  ;;  %v1378_v56 = vadd.f32 %v1377_v52, %v4760_v26 }
 0x1c0   : > { %1579 = vst [vmem:[#allocation3 + $0x70] sm:$0xff] %v1531_v45  ;;  %v1532_v57 = vadd.f32 %v1386_v6, %v358_v44  ;;  %v367_v45 = vld [vmem:[#allocation3 + $0xc0] sm:$0xff] }
 0x1c1   : > { %1577 = vst [vmem:[#allocation3 + $0x60] sm:$0xff] %v1529_v46  ;;  %v1530_v42 = vadd.f32 %v1378_v56, %v356_v49  ;;  %v368_v56 = vld [vmem:[#allocation3 + $0xc8] sm:$0xff] }
 0x1c2   : > { %1580 = vst [vmem:[#allocation3 + $0x78] sm:$0xff] %v1532_v57 }
 0x1c3   : > { %1578 = vst [vmem:[#allocation3 + $0x68] sm:$0xff] %v1530_v42  ;;  %v1181_v60 = vpop.f32.mrb[40].mxu0  ;;  %v3841_v18 = vpop.f32.mrb[40].mxu1 }
 0x1c4   : > { %v1399_v61 = vadd.f32 %v3841_v18, %v1173_v31  ;;  %v1183_v0 = vpop.f32.mrb[41].mxu0  ;;  %v1390_v4 = vpop.f32.mrb[41].mxu1  ;;  %v369_v18 = vld [vmem:[#allocation3 + $0xd0] sm:$0xff] }
 0x1c5   : > { %v1391_v53 = vadd.f32 %v1390_v4, %v1165_v9  ;;  %v1184_v5 = vpop.f32.mrb[42].mxu0  ;;  %v3842_v58 = vpop.f32.mrb[42].mxu1 }
 0x1c6   : > { %v1535_v12 = vadd.f32 %v1399_v61, %v361_v38  ;;  %v1402_v50 = vadd.f32 %v3842_v58, %v1176_v41  ;;  %v1186_v26 = vpop.f32.mrb[43].mxu0  ;;  %v1393_v16 = vpop.f32.mrb[43].mxu1 }
 0x1c7   : > { %v1533_v17 = vadd.f32 %v1391_v53, %v359_v1  ;;  %v1394_v19 = vadd.f32 %v1393_v16, %v1168_v20 }
 0x1c8   : > { %1583 = vst [vmem:[#allocation3 + $0x90] sm:$0xff] %v1535_v12  ;;  %v1536_v62 = vadd.f32 %v1402_v50, %v362_v8 }
 0x1c9   : > { %1581 = vst [vmem:[#allocation3 + $0x80] sm:$0xff] %v1533_v17  ;;  %v1534_v21 = vadd.f32 %v1394_v19, %v360_v13  ;;  %v371_v17 = vld [vmem:[#allocation3 + $0xe0] sm:$0xff] }
 0x1ca   : > { %1584 = vst [vmem:[#allocation3 + $0x98] sm:$0xff] %v1536_v62 }
 0x1cb   : > { %1582 = vst [vmem:[#allocation3 + $0x88] sm:$0xff] %v1534_v21  ;;  %v1189_v22 = vpop.f32.mrb[44].mxu0  ;;  %v3845_v54 = vpop.f32.mrb[44].mxu1 }
 0x1cc   : > { %v1415_v9 = vadd.f32 %v3845_v54, %v1189_v22  ;;  %v1191_v24 = vpop.f32.mrb[45].mxu0  ;;  %v1406_v27 = vpop.f32.mrb[45].mxu1  ;;  %v372_v54 = vld [vmem:[#allocation3 + $0xe8] sm:$0xff] }
 0x1cd   : > { %v1407_v28 = vadd.f32 %v1406_v27, %v1181_v60  ;;  %v1192_v29 = vpop.f32.mrb[46].mxu0  ;;  %v3846_v10 = vpop.f32.mrb[46].mxu1 }
 0x1ce   : > { %v1539_v31 = vadd.f32 %v1415_v9, %v365_v23  ;;  %v1418_v2 = vadd.f32 %v3846_v10, %v1192_v29  ;;  %v1194_v20 = vpop.f32.mrb[47].mxu0  ;;  %v1409_v33 = vpop.f32.mrb[47].mxu1  ;;  %v373_v10 = vld [vmem:[#allocation3 + $0xf0] sm:$0xff] }
 0x1cf   : > { %v1537_v36 = vadd.f32 %v1407_v28, %v363_v25  ;;  %v1410_v37 = vadd.f32 %v1409_v33, %v1184_v5  ;;  %v370_v5 = vld [vmem:[#allocation3 + $0xd8] sm:$0xff] }
 0x1d0   : > { %1587 = vst [vmem:[#allocation3 + $0xb0] sm:$0xff] %v1539_v31  ;;  %v1540_v40 = vadd.f32 %v1418_v2, %v366_v30  ;;  %v381_v2 = vld [vmem:[#allocation3 + $0x130] sm:$0xff] }
 0x1d1   : > { %1585 = vst [vmem:[#allocation3 + $0xa0] sm:$0xff] %v1537_v36  ;;  %v1538_v14 = vadd.f32 %v1410_v37, %v364_v32  ;;  %v379_v37 = vld [vmem:[#allocation3 + $0x120] sm:$0xff] }
 0x1d2   : > { %1588 = vst [vmem:[#allocation3 + $0xb8] sm:$0xff] %v1540_v40 }
 0x1d3   : > { %1586 = vst [vmem:[#allocation3 + $0xa8] sm:$0xff] %v1538_v14  ;;  %v1197_v41 = vpop.f32.mrb[48].mxu0  ;;  %v3849_v44 = vpop.f32.mrb[48].mxu1 }
 0x1d4   : > { %v1199_v34 = vpop.f32.mrb[49].mxu0  ;;  %v1422_v6 = vpop.f32.mrb[49].mxu1 }
 0x1d5   : > { %v1423_v48 = vadd.f32 %v1422_v6, %v1197_v41  ;;  %v1200_v49 = vpop.f32.mrb[50].mxu0  ;;  %v3850_v52 = vpop.f32.mrb[50].mxu1  ;;  %v374_v41 = vld [vmem:[#allocation3 + $0xf8] sm:$0xff] }
 0x1d6   : > { %v1202_v46 = vpop.f32.mrb[51].mxu0  ;;  %v1425_v57 = vpop.f32.mrb[51].mxu1  ;;  %v382_v34 = vld [vmem:[#allocation3 + $0x138] sm:$0xff] }
 0x1d7   : > { %v1541_v42 = vadd.f32 %v1423_v48, %v367_v45  ;;  %v1426_v60 = vadd.f32 %v1425_v57, %v1200_v49 }
 0x1d9   : > { %1589 = vst [vmem:[#allocation3 + $0xc0] sm:$0xff] %v1541_v42  ;;  %v1542_v38 = vadd.f32 %v1426_v60, %v368_v56  ;;  %v380_v56 = vld [vmem:[#allocation3 + $0x128] sm:$0xff] }
 0x1db   : > { %1590 = vst [vmem:[#allocation3 + $0xc8] sm:$0xff] %v1542_v38  ;;  %v1205_v61 = vpop.f32.mrb[52].mxu0  ;;  %v3853_v0 = vpop.f32.mrb[52].mxu1 }
 0x1dc   : > { %v1431_v1 = vadd.f32 %v3849_v44, %v1205_v61  ;;  %v1207_v4 = vpop.f32.mrb[53].mxu0  ;;  %v1438_v53 = vpop.f32.mrb[53].mxu1 }
 0x1dd   : > { %v1208_v8 = vpop.f32.mrb[54].mxu0  ;;  %v3854_v58 = vpop.f32.mrb[54].mxu1 }
 0x1de   : > { %v1543_v12 = vadd.f32 %v1431_v1, %v369_v18  ;;  %v1434_v50 = vadd.f32 %v3850_v52, %v1208_v8  ;;  %v1210_v26 = vpop.f32.mrb[55].mxu0  ;;  %v1441_v13 = vpop.f32.mrb[55].mxu1  ;;  %v375_v18 = vld [vmem:[#allocation3 + $0x100] sm:$0xff] }
 0x1e0   : > { %1591 = vst [vmem:[#allocation3 + $0xd0] sm:$0xff] %v1543_v12  ;;  %v1544_v16 = vadd.f32 %v1434_v50, %v370_v5  ;;  %v383_v5 = vld [vmem:[#allocation3 + $0x140] sm:$0xff]  ;;  %v386_v50 = vld [vmem:[#allocation3 + $0x158] sm:$0xff] }
 0x1e2   : > { %1592 = vst [vmem:[#allocation3 + $0xd8] sm:$0xff] %v1544_v16 }
 0x1e3   : > { %v1213_v19 = vpop.f32.mrb[56].mxu0  ;;  %v4769_v62 = vpop.f32.mrb[56].mxu1 }
 0x1e4   : > { %v1439_v21 = vadd.f32 %v1438_v53, %v1213_v19  ;;  %v1215_v22 = vpop.f32.mrb[57].mxu0  ;;  %v1454_v23 = vpop.f32.mrb[57].mxu1 }
 0x1e5   : > { %v1216_v9 = vpop.f32.mrb[58].mxu0  ;;  %v4771_v24 = vpop.f32.mrb[58].mxu1  ;;  %v384_v22 = vld [vmem:[#allocation3 + $0x148] sm:$0xff] }
 0x1e6   : > { %v1545_v25 = vadd.f32 %v1439_v21, %v371_v17  ;;  %v1442_v27 = vadd.f32 %v1441_v13, %v1216_v9  ;;  %v1218_v28 = vpop.f32.mrb[59].mxu0  ;;  %v1457_v29 = vpop.f32.mrb[59].mxu1 }
 0x1e8   : > { %1593 = vst [vmem:[#allocation3 + $0xe0] sm:$0xff] %v1545_v25  ;;  %v1546_v30 = vadd.f32 %v1442_v27, %v372_v54  ;;  %v377_v27 = vld [vmem:[#allocation3 + $0x110] sm:$0xff] }
 0x1ea   : > { %1594 = vst [vmem:[#allocation3 + $0xe8] sm:$0xff] %v1546_v30 }
 0x1eb   : > { %v1221_v31 = vpop.f32.mrb[60].mxu0  ;;  %v3861_v20 = vpop.f32.mrb[60].mxu1 }
 0x1ec   : > { %v1447_v32 = vadd.f32 %v3853_v0, %v1221_v31  ;;  %v1479_v33 = vadd.f32 %v3861_v20, %v4728_v43  ;;  %v1223_v36 = vpop.f32.mrb[61].mxu0  ;;  %v1470_v40 = vpop.f32.mrb[61].mxu1  ;;  %v385_v0 = vld [vmem:[#allocation3 + $0x150] sm:$0xff] }
 0x1ed   : > { %v1471_v14 = vadd.f32 %v1470_v40, %v4724_v35  ;;  %v1224_v44 = vpop.f32.mrb[62].mxu0  ;;  %v3862_v45 = vpop.f32.mrb[62].mxu1  ;;  %v390_v36 = vld [vmem:[#allocation3 + $0x178] sm:$0xff] }
 0x1ee   : > { %v1547_v6 = vadd.f32 %v1447_v32, %v373_v10  ;;  %v1555_v48 = vadd.f32 %v1479_v33, %v381_v2  ;;  %v1450_v49 = vadd.f32 %v3854_v58, %v1224_v44  ;;  %v1482_v52 = vadd.f32 %v3862_v45, %v4730_v47  ;;  %v1226_v46 = vpop.f32.mrb[63].mxu0  ;;  %v1473_v57 = vpop.f32.mrb[63].mxu1  ;;  %v376_v58 = vld [vmem:[#allocation3 + $0x108] sm:$0xff]  ;;  %v387_v2 = vld [vmem:[#allocation3 + $0x160] sm:$0xff]  ;;  %v378_v32 = vld [vmem:[#allocation3 + $0x118] sm:$0xff] }
 0x1ef   : > { %v1553_v42 = vadd.f32 %v1471_v14, %v379_v37  ;;  %v1474_v43 = vadd.f32 %v1473_v57, %v4726_v39  ;;  %v388_v45 = vld [vmem:[#allocation3 + $0x168] sm:$0xff] }
 0x1f0   : > { %1595 = vst [vmem:[#allocation3 + $0xf0] sm:$0xff] %v1547_v6  ;;  %1603 = vst [vmem:[#allocation3 + $0x130] sm:$0xff] %v1555_v48  ;;  %v1548_v60 = vadd.f32 %v1450_v49, %v374_v41  ;;  %v1556_v38 = vadd.f32 %v1482_v52, %v382_v34 }
 0x1f1   : > { %1601 = vst [vmem:[#allocation3 + $0x120] sm:$0xff] %v1553_v42  ;;  %v1554_v35 = vadd.f32 %v1474_v43, %v380_v56 }
 0x1f2   : > { %1596 = vst [vmem:[#allocation3 + $0xf8] sm:$0xff] %v1548_v60  ;;  %1604 = vst [vmem:[#allocation3 + $0x138] sm:$0xff] %v1556_v38 }
 0x1f3   : > { %1602 = vst [vmem:[#allocation3 + $0x128] sm:$0xff] %v1554_v35  ;;  %v1229_v61 = vpop.f32.mrb[64].mxu0  ;;  %v3865_v1 = vpop.f32.mrb[64].mxu1 }
 0x1f4   : > { %v1455_v47 = vadd.f32 %v1454_v23, %v1229_v61  ;;  %v1495_v4 = vadd.f32 %v3865_v1, %v4740_v59  ;;  %v1231_v53 = vpop.f32.mrb[65].mxu0  ;;  %v1486_v8 = vpop.f32.mrb[65].mxu1 }
 0x1f5   : > { %v1487_v39 = vadd.f32 %v1486_v8, %v4734_v51  ;;  %v1232_v12 = vpop.f32.mrb[66].mxu0  ;;  %v3866_v26 = vpop.f32.mrb[66].mxu1 }
 0x1f6   : > { %v1549_v13 = vadd.f32 %v1455_v47, %v375_v18  ;;  %v1559_v16 = vadd.f32 %v1495_v4, %v385_v0  ;;  %v1458_v17 = vadd.f32 %v1457_v29, %v1232_v12  ;;  %v1498_v19 = vadd.f32 %v3866_v26, %v4742_v63  ;;  %v1234_v21 = vpop.f32.mrb[67].mxu0  ;;  %v1489_v54 = vpop.f32.mrb[67].mxu1  ;;  %v389_v29 = vld [vmem:[#allocation3 + $0x170] sm:$0xff] }
 0x1f7   : > { %v1557_v23 = vadd.f32 %v1487_v39, %v383_v5  ;;  %v1490_v59 = vadd.f32 %v1489_v54, %v4738_v55 }
 0x1f8   : > { %1597 = vst [vmem:[#allocation3 + $0x100] sm:$0xff] %v1549_v13  ;;  %1607 = vst [vmem:[#allocation3 + $0x150] sm:$0xff] %v1559_v16  ;;  %v1550_v9 = vadd.f32 %v1458_v17, %v376_v58  ;;  %v1560_v25 = vadd.f32 %v1498_v19, %v386_v50 }
 0x1f9   : > { %1605 = vst [vmem:[#allocation3 + $0x140] sm:$0xff] %v1557_v23  ;;  %v1558_v51 = vadd.f32 %v1490_v59, %v384_v22 }
 0x1fa   : > { %1598 = vst [vmem:[#allocation3 + $0x108] sm:$0xff] %v1550_v9  ;;  %1608 = vst [vmem:[#allocation3 + $0x158] sm:$0xff] %v1560_v25 }
 0x1fb   : > { %1606 = vst [vmem:[#allocation3 + $0x148] sm:$0xff] %v1558_v51  ;;  %v1237_v28 = vpop.f32.mrb[68].mxu0  ;;  %v3869_v30 = vpop.f32.mrb[68].mxu1 }
 0x1fc   : > { %v1463_v63 = vadd.f32 %v4769_v62, %v1237_v28  ;;  %v1511_v10 = vadd.f32 %v3869_v30, %v4752_v11  ;;  %v1239_v31 = vpop.f32.mrb[69].mxu0  ;;  %v1502_v55 = vpop.f32.mrb[69].mxu1 }
 0x1fd   : > { %v1503_v20 = vadd.f32 %v1502_v55, %v4746_v3  ;;  %v1240_v33 = vpop.f32.mrb[70].mxu0  ;;  %v3870_v37 = vpop.f32.mrb[70].mxu1 }
 0x1fe   : > { %v1551_v40 = vadd.f32 %v1463_v63, %v377_v27  ;;  %v1563_v14 = vadd.f32 %v1511_v10, %v389_v29  ;;  %v1466_v41 = vadd.f32 %v4771_v24, %v1240_v33  ;;  %v1514_v44 = vadd.f32 %v3870_v37, %v4756_v15  ;;  %v1242_v34 = vpop.f32.mrb[71].mxu0  ;;  %v1505_v62 = vpop.f32.mrb[71].mxu1 }
 0x1ff   : > { %v1561_v6 = vadd.f32 %v1503_v20, %v387_v2  ;;  %v1506_v11 = vadd.f32 %v1505_v62, %v4750_v7 }
 0x200   : > { %1599 = vst [vmem:[#allocation3 + $0x110] sm:$0xff] %v1551_v40  ;;  %1611 = vst [vmem:[#allocation3 + $0x170] sm:$0xff] %v1563_v14  ;;  %v1552_v48 = vadd.f32 %v1466_v41, %v378_v32  ;;  %v1564_v3 = vadd.f32 %v1514_v44, %v390_v36 }
 0x201   : > { %1609 = vst [vmem:[#allocation3 + $0x160] sm:$0xff] %v1561_v6  ;;  %v1562_v49 = vadd.f32 %v1506_v11, %v388_v45 }
 0x202   : > { %1600 = vst [vmem:[#allocation3 + $0x118] sm:$0xff] %v1552_v48  ;;  %1612 = vst [vmem:[#allocation3 + $0x178] sm:$0xff] %v1564_v3 }
 0x203   : > { %1610 = vst [vmem:[#allocation3 + $0x168] sm:$0xff] %v1562_v49 }
 0x204 PF: > { %p1613_p6 = scmp.eq.s32.totalorder %s4515_s18, 1  ;;  %p3620_p9 = scmp.ne.s32.totalorder %s4515_s18, 1 }
 0x205   : > { %v1765_v15 = vld [vmem:[#allocation2] sm:$0xff] (!%p3620_p9)  ;;  %v4534_v24 = vmov (!%p3620_p9), 0   ;;  %v1766_v7 = vld [vmem:[#allocation2 + $0x8] sm:$0xff] (!%p3620_p9)  ;;  %v1767_v46 = vld [vmem:[#allocation2 + $0x10] sm:$0xff] (!%p3620_p9) }
 0x206   : > { %1616 = sbr.rel (%p3620_p9) target bundleno = 938 (0x3aa), region = 64  ;;  %2173 = vmatprep.subr.bf16.mxu0 (!%p3620_p9), %v4534_v24  ;;  %4031 = vmatprep.subr.bf16.mxu1 (!%p3620_p9), %v4534_v24  ;;  %v4277_v52 = vld [vmem:[#allocation4 + $0x4] ss:$12 sps:$4 sm:$0xff] (!%p3620_p9)   ;;  %v4280_v56 = vld [vmem:[#allocation4 + $0x1b4] ss:$12 sps:$4 sm:$0xff] (!%p3620_p9)   ;;  %v1768_v57 = vld [vmem:[#allocation2 + $0x18] sm:$0xff] (!%p3620_p9) }
 0x207   : > { %2174 = vmatpush1.bf16.msra.mxu0 (!%p3620_p9), %v1765_v15  ;;  %4047 = vmatpush1.bf16.msra.mxu1 (!%p3620_p9), %v1765_v15  ;;  %v1769_v42 = vld [vmem:[#allocation2 + $0x20] sm:$0xff] (!%p3620_p9)  ;;  %v1770_v43 = vld [vmem:[#allocation2 + $0x28] sm:$0xff] (!%p3620_p9)  ;;  %v1771_v60 = vld [vmem:[#allocation2 + $0x30] sm:$0xff] (!%p3620_p9) }
 0x208   : > { %2175 = vmatprep.subr.bf16.mxu0 (!%p3620_p9), %v4534_v24  ;;  %4032 = vmatprep.subr.bf16.mxu1 (!%p3620_p9), %v4534_v24  ;;  %v1772_v38 = vld [vmem:[#allocation2 + $0x38] sm:$0xff] (!%p3620_p9)  ;;  %v1773_v35 = vld [vmem:[#allocation2 + $0x40] sm:$0xff] (!%p3620_p9)  ;;  %v1774_v18 = vld [vmem:[#allocation2 + $0x48] sm:$0xff] (!%p3620_p9) }
 0x209   : > { %2205 = vmatprep.mubr.bf16.mxu0 (!%p3620_p9), %v4277_v52  ;;  %2349 = vmatprep.mubr.bf16.mxu1 (!%p3620_p9), %v4280_v56  ;;  %v1775_v61 = vld [vmem:[#allocation2 + $0x50] sm:$0xff] (!%p3620_p9)  ;;  %v1776_v0 = vld [vmem:[#allocation2 + $0x58] sm:$0xff] (!%p3620_p9)  ;;  %v1777_v1 = vld [vmem:[#allocation2 + $0x60] sm:$0xff] (!%p3620_p9) }
 0x20a   : > { %v1778_v47 = vld [vmem:[#allocation2 + $0x68] sm:$0xff] (!%p3620_p9)  ;;  %v1779_v4 = vld [vmem:[#allocation2 + $0x70] sm:$0xff] (!%p3620_p9)  ;;  %v1780_v53 = vld [vmem:[#allocation2 + $0x78] sm:$0xff] (!%p3620_p9) }
 0x20b   : > { %2176 = vmatpush1.bf16.msra.mxu0 (!%p3620_p9), %v1766_v7  ;;  %4048 = vmatpush1.bf16.msra.mxu1 (!%p3620_p9), %v1766_v7  ;;  %v4275_v5 = vld [vmem:[#allocation4] ss:$12 sps:$4 sm:$0xff] (!%p3620_p9)   ;;  %v4278_v8 = vld [vmem:[#allocation4 + $0x1b0] ss:$12 sps:$4 sm:$0xff] (!%p3620_p9)   ;;  %v4285_v13 = vld [vmem:[#allocation4 + $0x18] ss:$12 sps:$4 sm:$0xff] (!%p3620_p9)  }
 0x20c   : > { %2177 = vmatprep.subr.bf16.mxu0 (!%p3620_p9), %v4534_v24  ;;  %4033 = vmatprep.subr.bf16.mxu1 (!%p3620_p9), %v4534_v24  ;;  %v1781_v39 = vld [vmem:[#allocation2 + $0x80] sm:$0xff] (!%p3620_p9)  ;;  %v4281_v58 = vld [vmem:[#allocation4 + $0x1c] ss:$12 sps:$4 sm:$0xff] (!%p3620_p9)   ;;  %v4283_v12 = vld [vmem:[#allocation4 + $0x1cc] ss:$12 sps:$4 sm:$0xff] (!%p3620_p9)  }
 0x20d   : > { %v1782_v50 = vld [vmem:[#allocation2 + $0x88] sm:$0xff]  ;;  %v1783_v26 = vld [vmem:[#allocation2 + $0x90] sm:$0xff]  ;;  %v1784_v21 = vld [vmem:[#allocation2 + $0x98] sm:$0xff] }
 0x20e   : > { %v4286_v16 = vld [vmem:[#allocation4 + $0x1c8] ss:$12 sps:$4 sm:$0xff]   ;;  %v4289_v19 = vld [vmem:[#allocation4 + $0x1e4] ss:$12 sps:$4 sm:$0xff]   ;;  %v4292_v23 = vld [vmem:[#allocation4 + $0x1e0] ss:$12 sps:$4 sm:$0xff]  }
 0x20f   : > { %2178 = vmatpush1.bf16.msra.mxu0 %v1767_v46  ;;  %4049 = vmatpush1.bf16.msra.mxu1 %v1767_v46  ;;  %v4287_v17 = vld [vmem:[#allocation4 + $0x34] ss:$12 sps:$4 sm:$0xff]   ;;  %v4291_v54 = vld [vmem:[#allocation4 + $0x30] ss:$12 sps:$4 sm:$0xff]   ;;  %v4293_v59 = vld [vmem:[#allocation4 + $0x4c] ss:$12 sps:$4 sm:$0xff]  }
 0x210   : > { %2179 = vmatprep.subr.bf16.mxu0 %v4534_v24  ;;  %4034 = vmatprep.subr.bf16.mxu1 %v4534_v24  ;;  %v1785_v22 = vld [vmem:[#allocation2 + $0xa0] sm:$0xff]  ;;  %v4295_v9 = vld [vmem:[#allocation4 + $0x1fc] ss:$12 sps:$4 sm:$0xff]   ;;  %v1787_v28 = vld [vmem:[#allocation2 + $0xb0] sm:$0xff] }
 0x211   : > { %v1786_v25 = vld [vmem:[#allocation2 + $0xa8] sm:$0xff]  ;;  %v4298_v27 = vld [vmem:[#allocation4 + $0x1f8] ss:$12 sps:$4 sm:$0xff]   ;;  %v4301_v30 = vld [vmem:[#allocation4 + $0x214] ss:$12 sps:$4 sm:$0xff]  }
 0x212   : > { %v4297_v51 = vld [vmem:[#allocation4 + $0x48] ss:$12 sps:$4 sm:$0xff]   ;;  %v4299_v29 = vld [vmem:[#allocation4 + $0x64] ss:$12 sps:$4 sm:$0xff]   ;;  %v1788_v63 = vld [vmem:[#allocation2 + $0xb8] sm:$0xff] }
 0x213   : > { %2180 = vmatpush1.bf16.msra.mxu0 %v1768_v57  ;;  %4050 = vmatpush1.bf16.msra.mxu1 %v1768_v57  ;;  %v4303_v10 = vld [vmem:[#allocation4 + $0x60] ss:$12 sps:$4 sm:$0xff]   ;;  %v4304_v31 = vld [vmem:[#allocation4 + $0x210] ss:$12 sps:$4 sm:$0xff]   ;;  %v4309_v20 = vld [vmem:[#allocation4 + $0x78] ss:$12 sps:$4 sm:$0xff]  }
 0x214   : > { %2181 = vmatprep.subr.bf16.mxu0 %v4534_v24  ;;  %4035 = vmatprep.subr.bf16.mxu1 %v4534_v24  ;;  %v4305_v2 = vld [vmem:[#allocation4 + $0x7c] ss:$12 sps:$4 sm:$0xff]   ;;  %v4307_v55 = vld [vmem:[#allocation4 + $0x22c] ss:$12 sps:$4 sm:$0xff]   ;;  %v4311_v33 = vld [vmem:[#allocation4 + $0x94] ss:$12 sps:$4 sm:$0xff]  }
 0x215   : > { %v4310_v32 = vld [vmem:[#allocation4 + $0x228] ss:$12 sps:$4 sm:$0xff]   ;;  %v4314_v37 = vld [vmem:[#allocation4 + $0x90] ss:$12 sps:$4 sm:$0xff]   ;;  %v4315_v40 = vld [vmem:[#allocation4 + $0x20] ss:$12 sps:$4 sm:$0xff]  }
 0x216   : > { %v4313_v36 = vld [vmem:[#allocation4 + $0x8] ss:$12 sps:$4 sm:$0xff]   ;;  %v4316_v14 = vld [vmem:[#allocation4 + $0xac] ss:$12 sps:$4 sm:$0xff]   ;;  %v4320_v34 = vld [vmem:[#allocation4 + $0x50] ss:$12 sps:$4 sm:$0xff]  }
 0x217   : > { %2182 = vmatpush1.bf16.msra.mxu0 %v1769_v42  ;;  %4051 = vmatpush1.bf16.msra.mxu1 %v1769_v42  ;;  %v4318_v41 = vld [vmem:[#allocation4 + $0x38] ss:$12 sps:$4 sm:$0xff]   ;;  %v4319_v44 = vld [vmem:[#allocation4 + $0xa8] ss:$12 sps:$4 sm:$0xff]   ;;  %v4324_v6 = vld [vmem:[#allocation4 + $0xc0] ss:$12 sps:$4 sm:$0xff]  }
 0x218   : > { %2183 = vmatprep.subr.bf16.mxu0 %v4534_v24  ;;  %4036 = vmatprep.subr.bf16.mxu1 %v4534_v24  ;;  %v4321_v45 = vld [vmem:[#allocation4 + $0xc4] ss:$12 sps:$4 sm:$0xff]   ;;  %v4323_v62 = vld [vmem:[#allocation4 + $0x68] ss:$12 sps:$4 sm:$0xff]   ;;  %v4325_v11 = vld [vmem:[#allocation4 + $0x80] ss:$12 sps:$4 sm:$0xff]  }
 0x219   : > { %v4326_v48 = vld [vmem:[#allocation4 + $0xdc] ss:$12 sps:$4 sm:$0xff]   ;;  %v4328_v3 = vld [vmem:[#allocation4 + $0x98] ss:$12 sps:$4 sm:$0xff]   ;;  %v4335_v46 = vld [vmem:[#allocation4 + $0xe0] ss:$12 sps:$4 sm:$0xff]  }
 0x21a   : > { %v4329_v49 = vld [vmem:[#allocation4 + $0xd8] ss:$12 sps:$4 sm:$0xff]   ;;  %v4330_v15 = vld [vmem:[#allocation4 + $0xb0] ss:$12 sps:$4 sm:$0xff]   ;;  %v4333_v7 = vld [vmem:[#allocation4 + $0xc8] ss:$12 sps:$4 sm:$0xff]  }
 0x21b   : > { %2184 = vmatpush1.bf16.msra.mxu0 %v1770_v43  ;;  %4052 = vmatpush1.bf16.msra.mxu1 %v1770_v43  ;;  %v4334_v52 = vld [vmem:[#allocation4 + $0xf0] ss:$12 sps:$4 sm:$0xff]   ;;  %v4336_v56 = vld [vmem:[#allocation4 + $0x10c] ss:$12 sps:$4 sm:$0xff]   ;;  %v4339_v42 = vld [vmem:[#allocation4 + $0x108] ss:$12 sps:$4 sm:$0xff]  }
 0x21c   : > { %2185 = vmatprep.subr.bf16.mxu0 %v4534_v24  ;;  %4037 = vmatprep.subr.bf16.mxu1 %v4534_v24  ;;  %v4338_v57 = vld [vmem:[#allocation4 + $0xf8] ss:$12 sps:$4 sm:$0xff]   ;;  %v4340_v43 = vld [vmem:[#allocation4 + $0x110] ss:$12 sps:$4 sm:$0xff]  }
 0x21f   : > { %2186 = vmatpush1.bf16.msra.mxu0 %v1771_v60  ;;  %4053 = vmatpush1.bf16.msra.mxu1 %v1771_v60  ;;  %v4341_v60 = vld [vmem:[#allocation4 + $0x124] ss:$12 sps:$4 sm:$0xff]  }
 0x220   : > { %2187 = vmatprep.subr.bf16.mxu0 %v4534_v24  ;;  %4038 = vmatprep.subr.bf16.mxu1 %v4534_v24 }
 0x223   : > { %2188 = vmatpush1.bf16.msra.mxu0 %v1772_v38  ;;  %4054 = vmatpush1.bf16.msra.mxu1 %v1772_v38  ;;  %v4343_v38 = vld [vmem:[#allocation4 + $0x128] ss:$12 sps:$4 sm:$0xff]  }
 0x224   : > { %2189 = vmatprep.subr.bf16.mxu0 %v4534_v24  ;;  %4039 = vmatprep.subr.bf16.mxu1 %v4534_v24 }
 0x227   : > { %2190 = vmatpush1.bf16.msra.mxu0 %v1773_v35  ;;  %4055 = vmatpush1.bf16.msra.mxu1 %v1773_v35  ;;  %v4344_v35 = vld [vmem:[#allocation4 + $0x120] ss:$12 sps:$4 sm:$0xff]  }
 0x228   : > { %2191 = vmatprep.subr.bf16.mxu0 %v4534_v24  ;;  %4040 = vmatprep.subr.bf16.mxu1 %v4534_v24 }
 0x22b   : > { %2192 = vmatpush1.bf16.msra.mxu0 %v1774_v18  ;;  %4056 = vmatpush1.bf16.msra.mxu1 %v1774_v18  ;;  %v4345_v18 = vld [vmem:[#allocation4 + $0x140] ss:$12 sps:$4 sm:$0xff]  }
 0x22c   : > { %2193 = vmatprep.subr.bf16.mxu0 %v4534_v24  ;;  %4041 = vmatprep.subr.bf16.mxu1 %v4534_v24 }
 0x22f   : > { %2194 = vmatpush1.bf16.msra.mxu0 %v1775_v61  ;;  %4057 = vmatpush1.bf16.msra.mxu1 %v1775_v61  ;;  %v4346_v61 = vld [vmem:[#allocation4 + $0x13c] ss:$12 sps:$4 sm:$0xff]  }
 0x230   : > { %2195 = vmatprep.subr.bf16.mxu0 %v4534_v24  ;;  %4042 = vmatprep.subr.bf16.mxu1 %v4534_v24 }
 0x233   : > { %2196 = vmatpush1.bf16.msra.mxu0 %v1776_v0  ;;  %4058 = vmatpush1.bf16.msra.mxu1 %v1776_v0  ;;  %v4348_v0 = vld [vmem:[#allocation4 + $0x158] ss:$12 sps:$4 sm:$0xff]  }
 0x234   : > { %2197 = vmatprep.subr.bf16.mxu0 %v4534_v24  ;;  %4043 = vmatprep.subr.bf16.mxu1 %v4534_v24 }
 0x237   : > { %2198 = vmatpush1.bf16.msra.mxu0 %v1777_v1  ;;  %4059 = vmatpush1.bf16.msra.mxu1 %v1777_v1  ;;  %v4349_v1 = vld [vmem:[#allocation4 + $0x138] ss:$12 sps:$4 sm:$0xff]  }
 0x238   : > { %2199 = vmatprep.subr.bf16.mxu0 %v4534_v24  ;;  %4044 = vmatprep.subr.bf16.mxu1 %v4534_v24 }
 0x23b   : > { %2200 = vmatpush1.bf16.msra.mxu0 %v1778_v47  ;;  %4060 = vmatpush1.bf16.msra.mxu1 %v1778_v47  ;;  %v4350_v47 = vld [vmem:[#allocation4 + $0x170] ss:$12 sps:$4 sm:$0xff]  }
 0x23c   : > { %2201 = vmatprep.subr.bf16.mxu0 %v4534_v24  ;;  %4045 = vmatprep.subr.bf16.mxu1 %v4534_v24 }
 0x23f   : > { %2202 = vmatpush1.bf16.msra.mxu0 %v1779_v4  ;;  %4061 = vmatpush1.bf16.msra.mxu1 %v1779_v4  ;;  %v4351_v4 = vld [vmem:[#allocation4 + $0x154] ss:$12 sps:$4 sm:$0xff]  }
 0x240   : > { %2203 = vmatprep.subr.bf16.mxu0 %v4534_v24  ;;  %4046 = vmatprep.subr.bf16.mxu1 %v4534_v24  ;;  %v4331_v24 = vld [vmem:[#allocation4 + $0xf4] ss:$12 sps:$4 sm:$0xff]  }
 0x243   : > { %2204 = vmatpush1.bf16.msra.mxu0 %v1780_v53  ;;  %4062 = vmatpush1.bf16.msra.mxu1 %v1780_v53  ;;  %v4353_v53 = vld [vmem:[#allocation4 + $0x188] ss:$12 sps:$4 sm:$0xff]  }
 0x244   : > { %3871 = vmatprep.subr.bf16.mxu1 %v1781_v39 }
 0x246   : > { %2206 = vmatmul.mubr.bf16.vlgmr.msra.gmra.mrb[0].mxu0 %v4275_v5  ;;  %2350 = vmatmul.mubr.bf16.vlgmr.msra.gmra.mrb[0].mxu1 %v4278_v8  ;;  %v4354_v5 = vld [vmem:[#allocation4 + $0x150] ss:$12 sps:$4 sm:$0xff]   ;;  %v4355_v8 = vld [vmem:[#allocation4 + $0x1a0] ss:$12 sps:$4 sm:$0xff]  }
 0x247   : > { %3872 = vmatpush3.bf16.msra.mxu1 %v1781_v39  ;;  %2213 = vmatprep.mubr.bf16.mxu0 %v4281_v58  ;;  %v4356_v39 = vld [vmem:[#allocation4 + $0x16c] ss:$12 sps:$4 sm:$0xff]  }
 0x248   : > { %3873 = vmatprep.subr.bf16.mxu1 %v1782_v50  ;;  %2357 = vmatprep.mubr.bf16.mxu1 %v4283_v12  ;;  %v4358_v58 = vld [vmem:[#allocation4 + $0x1b8] ss:$12 sps:$4 sm:$0xff]   ;;  %v4359_v12 = vld [vmem:[#allocation4 + $0x168] ss:$12 sps:$4 sm:$0xff]  }
 0x24b   : > { %3874 = vmatpush3.bf16.msra.mxu1 %v1782_v50  ;;  %v4360_v50 = vld [vmem:[#allocation4 + $0x1d0] ss:$12 sps:$4 sm:$0xff]  }
 0x24c   : > { %3875 = vmatprep.subr.bf16.mxu1 %v1783_v26 }
 0x24e   : > { %2214 = vmatmul.mubr.bf16.gmra.mrb[4].mxu0 %v4285_v13  ;;  %2358 = vmatmul.mubr.bf16.gmra.mrb[4].mxu1 %v4286_v16  ;;  %v4363_v13 = vld [vmem:[#allocation4 + $0x1e8] ss:$12 sps:$4 sm:$0xff]   ;;  %v4364_v16 = vld [vmem:[#allocation4 + $0x180] ss:$12 sps:$4 sm:$0xff]  }
 0x24f   : > { %3876 = vmatpush3.bf16.msra.mxu1 %v1783_v26  ;;  %2221 = vmatprep.mubr.bf16.mxu0 %v4287_v17  ;;  %v4361_v26 = vld [vmem:[#allocation4 + $0x184] ss:$12 sps:$4 sm:$0xff]   ;;  %v4365_v17 = vld [vmem:[#allocation4 + $0x200] ss:$12 sps:$4 sm:$0xff]  }
 0x250   : > { %2365 = vmatprep.mubr.bf16.mxu1 %v4289_v19  ;;  %3877 = vmatprep.subr.bf16.mxu1 %v1784_v21  ;;  %v4366_v19 = vld [vmem:[#allocation4 + $0x19c] ss:$12 sps:$4 sm:$0xff]  }
 0x253   : > { %3878 = vmatpush3.bf16.msra.mxu1 %v1784_v21  ;;  %v4368_v21 = vld [vmem:[#allocation4 + $0x218] ss:$12 sps:$4 sm:$0xff]  }
 0x254   : > { %3879 = vmatprep.subr.bf16.mxu1 %v1785_v22 }
 0x256   : > { %2222 = vmatmul.mubr.bf16.gmra.mrb[8].mxu0 %v4291_v54  ;;  %2366 = vmatmul.mubr.bf16.gmra.mrb[8].mxu1 %v4292_v23  ;;  %v4370_v54 = vld [vmem:[#allocation4 + $0x230] ss:$12 sps:$4 sm:$0xff]  }
 0x257   : > { %2229 = vmatprep.mubr.bf16.mxu0 %v4293_v59  ;;  %2373 = vmatprep.mubr.bf16.mxu1 %v4295_v9 }
 0x258   : > { %3880 = vmatpush3.bf16.msra.mxu1 %v1785_v22  ;;  %v4369_v22 = vld [vmem:[#allocation4 + $0x198] ss:$12 sps:$4 sm:$0xff]  }
 0x259   : > { %3881 = vmatprep.subr.bf16.mxu1 %v1786_v25 }
 0x25c   : > { %3882 = vmatpush3.bf16.msra.mxu1 %v1786_v25 }
 0x25d   : > { %3883 = vmatprep.subr.bf16.mxu1 %v1787_v28 }
 0x25e   : > { %2230 = vmatmul.mubr.bf16.gmra.mrb[12].mxu0 %v4297_v51  ;;  %2374 = vmatmul.mubr.bf16.gmra.mrb[12].mxu1 %v4298_v27 }
 0x25f   : > { %2237 = vmatprep.mubr.bf16.mxu0 %v4299_v29  ;;  %2381 = vmatprep.mubr.bf16.mxu1 %v4301_v30 }
 0x260   : > { %3884 = vmatpush3.bf16.msra.mxu1 %v1787_v28 }
 0x261   : > { %3885 = vmatprep.subr.bf16.mxu1 %v1788_v63 }
 0x264   : > { %3886 = vmatpush3.bf16.msra.mxu1 %v1788_v63 }
 0x266   : > { %2238 = vmatmul.mubr.bf16.gmra.mrb[16].mxu0 %v4303_v10  ;;  %2382 = vmatmul.mubr.bf16.gmra.mrb[16].mxu1 %v4304_v31 }
 0x267   : > { %2245 = vmatprep.mubr.bf16.mxu0 %v4305_v2  ;;  %2389 = vmatprep.mubr.bf16.mxu1 %v4307_v55 }
 0x26e   : > { %2246 = vmatmul.mubr.bf16.gmra.mrb[20].mxu0 %v4309_v20  ;;  %2390 = vmatmul.mubr.bf16.gmra.mrb[20].mxu1 %v4310_v32 }
 0x26f   : > { %2253 = vmatprep.mubr.bf16.mxu0 %v4311_v33  ;;  %3887 = vmatprep.mubr.bf16.mxu1 %v4313_v36 }
 0x276   : > { %2254 = vmatmul.mubr.bf16.gmra.mrb[24].mxu0 %v4314_v37  ;;  %3888 = vmatmul.mubr.bf16.vlgmr.msra.gmra.mrb[24].mxu1 %v4315_v40 }
 0x277   : > { %2261 = vmatprep.mubr.bf16.mxu0 %v4316_v14  ;;  %3891 = vmatprep.mubr.bf16.mxu1 %v4318_v41 }
 0x27e   : > { %2262 = vmatmul.mubr.bf16.gmra.mrb[28].mxu0 %v4319_v44  ;;  %3892 = vmatmul.mubr.bf16.gmra.mrb[28].mxu1 %v4320_v34 }
 0x27f   : > { %2269 = vmatprep.mubr.bf16.mxu0 %v4321_v45  ;;  %3895 = vmatprep.mubr.bf16.mxu1 %v4323_v62 }
 0x286   : > { %2270 = vmatmul.mubr.bf16.gmra.mrb[32].mxu0 %v4324_v6  ;;  %3896 = vmatmul.mubr.bf16.gmra.mrb[32].mxu1 %v4325_v11 }
 0x287   : > { %2277 = vmatprep.mubr.bf16.mxu0 %v4326_v48  ;;  %3899 = vmatprep.mubr.bf16.mxu1 %v4328_v3 }
 0x28e   : > { %2278 = vmatmul.mubr.bf16.gmra.mrb[36].mxu0 %v4329_v49  ;;  %3900 = vmatmul.mubr.bf16.gmra.mrb[36].mxu1 %v4330_v15 }
 0x28f   : > { %2285 = vmatprep.mubr.bf16.mxu0 %v4331_v24  ;;  %3903 = vmatprep.mubr.bf16.mxu1 %v4333_v7 }
 0x296   : > { %2286 = vmatmul.mubr.bf16.gmra.mrb[40].mxu0 %v4334_v52  ;;  %3904 = vmatmul.mubr.bf16.gmra.mrb[40].mxu1 %v4335_v46 }
 0x297   : > { %2293 = vmatprep.mubr.bf16.mxu0 %v4336_v56  ;;  %3907 = vmatprep.mubr.bf16.mxu1 %v4338_v57 }
 0x29e   : > { %2294 = vmatmul.mubr.bf16.gmra.mrb[44].mxu0 %v4339_v42  ;;  %3908 = vmatmul.mubr.bf16.gmra.mrb[44].mxu1 %v4340_v43 }
 0x29f   : > { %2301 = vmatprep.mubr.bf16.mxu0 %v4341_v60  ;;  %3911 = vmatprep.mubr.bf16.mxu1 %v4343_v38 }
 0x2a6   : > { %2302 = vmatmul.mubr.bf16.gmra.mrb[48].mxu0 %v4344_v35  ;;  %3912 = vmatmul.mubr.bf16.gmra.mrb[48].mxu1 %v4345_v18 }
 0x2a7   : > { %2309 = vmatprep.mubr.bf16.mxu0 %v4346_v61  ;;  %3915 = vmatprep.mubr.bf16.mxu1 %v4348_v0 }
 0x2ae   : > { %2310 = vmatmul.mubr.bf16.gmra.mrb[52].mxu0 %v4349_v1  ;;  %3916 = vmatmul.mubr.bf16.gmra.mrb[52].mxu1 %v4350_v47 }
 0x2af   : > { %2317 = vmatprep.mubr.bf16.mxu0 %v4351_v4  ;;  %3919 = vmatprep.mubr.bf16.mxu1 %v4353_v53  ;;  %v1619_v53 = vld [vmem:[#allocation3 + $0x10] sm:$0xff] }
 0x2b6   : > { %2318 = vmatmul.mubr.bf16.gmra.mrb[56].mxu0 %v4354_v5  ;;  %3920 = vmatmul.mubr.bf16.gmra.mrb[56].mxu1 %v4355_v8 }
 0x2b7   : > { %2325 = vmatprep.mubr.bf16.mxu0 %v4356_v39  ;;  %3923 = vmatprep.mubr.bf16.mxu1 %v4358_v58  ;;  %v1617_v58 = vld [vmem:[#allocation3] sm:$0xff] }
 0x2be   : > { %2326 = vmatmul.mubr.bf16.gmra.mrb[60].mxu0 %v4359_v12  ;;  %3924 = vmatmul.mubr.bf16.gmra.mrb[60].mxu1 %v4360_v50 }
 0x2bf   : > { %2333 = vmatprep.mubr.bf16.mxu0 %v4361_v26  ;;  %3927 = vmatprep.mubr.bf16.mxu1 %v4363_v13  ;;  %v1620_v13 = vld [vmem:[#allocation3 + $0x18] sm:$0xff] }
 0x2c6   : > { %2334 = vmatmul.mubr.bf16.gmra.mrb[64].mxu0 %v4364_v16  ;;  %3928 = vmatmul.mubr.bf16.gmra.mrb[64].mxu1 %v4365_v17 }
 0x2c7   : > { %2341 = vmatprep.mubr.bf16.mxu0 %v4366_v19  ;;  %3931 = vmatprep.mubr.bf16.mxu1 %v4368_v21 }
 0x2ce   : > { %2342 = vmatmul.mubr.bf16.gmra.mrb[68].mxu0 %v4369_v22  ;;  %3932 = vmatmul.mubr.bf16.gmra.mrb[68].mxu1 %v4370_v54  ;;  %v1618_v22 = vld [vmem:[#allocation3 + $0x8] sm:$0xff] }
 0x319   : > { %v2207_v23 = vpop.f32.mrb[0].mxu0  ;;  %v4821_v59 = vpop.f32.mrb[0].mxu1 }
 0x31a   : > { %v2209_v9 = vpop.f32.mrb[1].mxu0  ;;  %v2353_v25 = vpop.f32.mrb[1].mxu1 }
 0x31b   : > { %v2210_v51 = vpop.f32.mrb[2].mxu0  ;;  %v4823_v27 = vpop.f32.mrb[2].mxu1 }
 0x31c   : > { %v2212_v28 = vpop.f32.mrb[3].mxu0  ;;  %v2356_v29 = vpop.f32.mrb[3].mxu1 }
 0x321   : > { %v2215_v30 = vpop.f32.mrb[4].mxu0  ;;  %v4825_v63 = vpop.f32.mrb[4].mxu1 }
 0x322   : > { %v2217_v10 = vpop.f32.mrb[5].mxu0  ;;  %v2361_v31 = vpop.f32.mrb[5].mxu1 }
 0x323   : > { %v2218_v2 = vpop.f32.mrb[6].mxu0  ;;  %v4827_v55 = vpop.f32.mrb[6].mxu1  ;;  %v1623_v10 = vld [vmem:[#allocation3 + $0x30] sm:$0xff] }
 0x324   : > { %v2220_v20 = vpop.f32.mrb[7].mxu0  ;;  %v2364_v32 = vpop.f32.mrb[7].mxu1 }
 0x325   : > { %v1621_v32 = vld [vmem:[#allocation3 + $0x20] sm:$0xff] }
 0x329   : > { %v4829_v33 = vpop.f32.mrb[8].mxu0  ;;  %v4831_v36 = vpop.f32.mrb[8].mxu1 }
 0x32a   : > { %v2225_v37 = vpop.f32.mrb[9].mxu0  ;;  %v2369_v40 = vpop.f32.mrb[9].mxu1 }
 0x32b   : > { %v4833_v14 = vpop.f32.mrb[10].mxu0  ;;  %v4835_v41 = vpop.f32.mrb[10].mxu1 }
 0x32c   : > { %v2228_v44 = vpop.f32.mrb[11].mxu0  ;;  %v2372_v34 = vpop.f32.mrb[11].mxu1 }
 0x32d   : > { %v1624_v44 = vld [vmem:[#allocation3 + $0x38] sm:$0xff] }
 0x331   : > { %v2231_v45 = vpop.f32.mrb[12].mxu0  ;;  %v4837_v62 = vpop.f32.mrb[12].mxu1 }
 0x332   : > { %v2233_v6 = vpop.f32.mrb[13].mxu0  ;;  %v2377_v11 = vpop.f32.mrb[13].mxu1 }
 0x333   : > { %v2234_v48 = vpop.f32.mrb[14].mxu0  ;;  %v4839_v3 = vpop.f32.mrb[14].mxu1 }
 0x334   : > { %v2236_v49 = vpop.f32.mrb[15].mxu0  ;;  %v2380_v15 = vpop.f32.mrb[15].mxu1 }
 0x335   : > { %v1622_v49 = vld [vmem:[#allocation3 + $0x28] sm:$0xff] }
 0x339   : > { %v4841_v24 = vpop.f32.mrb[16].mxu0  ;;  %v4843_v7 = vpop.f32.mrb[16].mxu1 }
 0x33a   : > { %v2241_v52 = vpop.f32.mrb[17].mxu0  ;;  %v2385_v46 = vpop.f32.mrb[17].mxu1 }
 0x33b   : > { %v4845_v56 = vpop.f32.mrb[18].mxu0  ;;  %v4847_v57 = vpop.f32.mrb[18].mxu1 }
 0x33c   : > { %v2244_v42 = vpop.f32.mrb[19].mxu0  ;;  %v2388_v43 = vpop.f32.mrb[19].mxu1 }
 0x341   : > { %v2247_v60 = vpop.f32.mrb[20].mxu0  ;;  %v4849_v38 = vpop.f32.mrb[20].mxu1 }
 0x342   : > { %v2249_v35 = vpop.f32.mrb[21].mxu0  ;;  %v2393_v18 = vpop.f32.mrb[21].mxu1 }
 0x343   : > { %v4851_v61 = vpop.f32.mrb[22].mxu0  ;;  %v4853_v0 = vpop.f32.mrb[22].mxu1  ;;  %v1627_v35 = vld [vmem:[#allocation3 + $0x50] sm:$0xff] }
 0x344   : > { %v2252_v1 = vpop.f32.mrb[23].mxu0  ;;  %v2396_v47 = vpop.f32.mrb[23].mxu1 }
 0x345   : > { %v1625_v47 = vld [vmem:[#allocation3 + $0x40] sm:$0xff] }
 0x349   : > { %v4855_v4 = vpop.f32.mrb[24].mxu0  ;;  %v3889_v5 = vpop.f32.mrb[24].mxu1 }
 0x34a   : > { %v2441_v8 = vadd.f32 %v3889_v5, %v2215_v30  ;;  %v2257_v39 = vpop.f32.mrb[25].mxu0  ;;  %v2432_v12 = vpop.f32.mrb[25].mxu1 }
 0x34b   : > { %v2433_v50 = vadd.f32 %v2432_v12, %v2207_v23  ;;  %v4857_v26 = vpop.f32.mrb[26].mxu0  ;;  %v3890_v16 = vpop.f32.mrb[26].mxu1 }
 0x34c   : > { %v2625_v17 = vadd.f32 %v2441_v8, %v1619_v53  ;;  %v2444_v19 = vadd.f32 %v3890_v16, %v2218_v2  ;;  %v2260_v21 = vpop.f32.mrb[27].mxu0  ;;  %v2435_v54 = vpop.f32.mrb[27].mxu1  ;;  %v1628_v8 = vld [vmem:[#allocation3 + $0x58] sm:$0xff] }
 0x34d   : > { %v2623_v9 = vadd.f32 %v2433_v50, %v1617_v58  ;;  %v2436_v25 = vadd.f32 %v2435_v54, %v2210_v51  ;;  %v1626_v50 = vld [vmem:[#allocation3 + $0x48] sm:$0xff] }
 0x34e   : > { %2673 = vst [vmem:[#allocation3 + $0x10] sm:$0xff] %v2625_v17  ;;  %v2626_v28 = vadd.f32 %v2444_v19, %v1620_v13 }
 0x34f   : > { %2671 = vst [vmem:[#allocation3] sm:$0xff] %v2623_v9  ;;  %v2624_v29 = vadd.f32 %v2436_v25, %v1618_v22  ;;  %v1629_v25 = vld [vmem:[#allocation3 + $0x60] sm:$0xff] }
 0x350   : > { %2674 = vst [vmem:[#allocation3 + $0x18] sm:$0xff] %v2626_v28 }
 0x351   : > { %2672 = vst [vmem:[#allocation3 + $0x8] sm:$0xff] %v2624_v29  ;;  %v2263_v30 = vpop.f32.mrb[28].mxu0  ;;  %v3893_v23 = vpop.f32.mrb[28].mxu1 }
 0x352   : > { %v2457_v31 = vadd.f32 %v3893_v23, %v2231_v45  ;;  %v2265_v20 = vpop.f32.mrb[29].mxu0  ;;  %v2448_v37 = vpop.f32.mrb[29].mxu1 }
 0x353   : > { %v2449_v2 = vadd.f32 %v2448_v37, %v4829_v33  ;;  %v2266_v40 = vpop.f32.mrb[30].mxu0  ;;  %v3894_v34 = vpop.f32.mrb[30].mxu1 }
 0x354   : > { %v2629_v6 = vadd.f32 %v2457_v31, %v1623_v10  ;;  %v2460_v51 = vadd.f32 %v3894_v34, %v2234_v48  ;;  %v2268_v11 = vpop.f32.mrb[31].mxu0  ;;  %v2451_v15 = vpop.f32.mrb[31].mxu1  ;;  %v1632_v10 = vld [vmem:[#allocation3 + $0x78] sm:$0xff] }
 0x355   : > { %v2627_v52 = vadd.f32 %v2449_v2, %v1621_v32  ;;  %v2452_v46 = vadd.f32 %v2451_v15, %v4833_v14  ;;  %v1630_v32 = vld [vmem:[#allocation3 + $0x68] sm:$0xff]  ;;  %v1633_v15 = vld [vmem:[#allocation3 + $0x80] sm:$0xff] }
 0x356   : > { %2677 = vst [vmem:[#allocation3 + $0x30] sm:$0xff] %v2629_v6  ;;  %v2630_v42 = vadd.f32 %v2460_v51, %v1624_v44  ;;  %v1635_v51 = vld [vmem:[#allocation3 + $0x90] sm:$0xff] }
 0x357   : > { %2675 = vst [vmem:[#allocation3 + $0x20] sm:$0xff] %v2627_v52  ;;  %v2628_v45 = vadd.f32 %v2452_v46, %v1622_v49 }
 0x358   : > { %2678 = vst [vmem:[#allocation3 + $0x38] sm:$0xff] %v2630_v42  ;;  %v1636_v42 = vld [vmem:[#allocation3 + $0x98] sm:$0xff] }
 0x359   : > { %2676 = vst [vmem:[#allocation3 + $0x28] sm:$0xff] %v2628_v45  ;;  %v2271_v43 = vpop.f32.mrb[32].mxu0  ;;  %v3897_v33 = vpop.f32.mrb[32].mxu1 }
 0x35a   : > { %v2473_v18 = vadd.f32 %v3897_v33, %v2247_v60  ;;  %v2273_v1 = vpop.f32.mrb[33].mxu0  ;;  %v2464_v53 = vpop.f32.mrb[33].mxu1 }
 0x35b   : > { %v2465_v48 = vadd.f32 %v2464_v53, %v4841_v24  ;;  %v2274_v5 = vpop.f32.mrb[34].mxu0  ;;  %v3898_v39 = vpop.f32.mrb[34].mxu1  ;;  %v1631_v24 = vld [vmem:[#allocation3 + $0x70] sm:$0xff] }
 0x35c   : > { %v2633_v58 = vadd.f32 %v2473_v18, %v1627_v35  ;;  %v2476_v14 = vadd.f32 %v3898_v39, %v4851_v61  ;;  %v2276_v12 = vpop.f32.mrb[35].mxu0  ;;  %v2467_v13 = vpop.f32.mrb[35].mxu1  ;;  %v1634_v18 = vld [vmem:[#allocation3 + $0x88] sm:$0xff] }
 0x35d   : > { %v2631_v16 = vadd.f32 %v2465_v48, %v1625_v47  ;;  %v2468_v17 = vadd.f32 %v2467_v13, %v4845_v56 }
 0x35e   : > { %2681 = vst [vmem:[#allocation3 + $0x50] sm:$0xff] %v2633_v58  ;;  %v2634_v19 = vadd.f32 %v2476_v14, %v1628_v8  ;;  %v1639_v58 = vld [vmem:[#allocation3 + $0xb0] sm:$0xff] }
 0x35f   : > { %2679 = vst [vmem:[#allocation3 + $0x40] sm:$0xff] %v2631_v16  ;;  %v2632_v60 = vadd.f32 %v2468_v17, %v1626_v50  ;;  %v1637_v50 = vld [vmem:[#allocation3 + $0xa0] sm:$0xff] }
 0x360   : > { %2682 = vst [vmem:[#allocation3 + $0x58] sm:$0xff] %v2634_v19  ;;  %v1640_v19 = vld [vmem:[#allocation3 + $0xb8] sm:$0xff] }
 0x361   : > { %2680 = vst [vmem:[#allocation3 + $0x48] sm:$0xff] %v2632_v60  ;;  %v2279_v21 = vpop.f32.mrb[36].mxu0  ;;  %v3901_v22 = vpop.f32.mrb[36].mxu1 }
 0x362   : > { %v2489_v54 = vadd.f32 %v3901_v22, %v2263_v30  ;;  %v2281_v9 = vpop.f32.mrb[37].mxu0  ;;  %v2480_v28 = vpop.f32.mrb[37].mxu1  ;;  %v1638_v22 = vld [vmem:[#allocation3 + $0xa8] sm:$0xff] }
 0x363   : > { %v2481_v61 = vadd.f32 %v2480_v28, %v4855_v4  ;;  %v2282_v29 = vpop.f32.mrb[38].mxu0  ;;  %v3902_v23 = vpop.f32.mrb[38].mxu1 }
 0x364   : > { %v2637_v31 = vadd.f32 %v2489_v54, %v1631_v24  ;;  %v2492_v56 = vadd.f32 %v3902_v23, %v2266_v40  ;;  %v2284_v20 = vpop.f32.mrb[39].mxu0  ;;  %v2483_v37 = vpop.f32.mrb[39].mxu1 }
 0x365   : > { %v2635_v2 = vadd.f32 %v2481_v61, %v1629_v25  ;;  %v2484_v44 = vadd.f32 %v2483_v37, %v4857_v26 }
 0x366   : > { %2685 = vst [vmem:[#allocation3 + $0x70] sm:$0xff] %v2637_v31  ;;  %v2638_v34 = vadd.f32 %v2492_v56, %v1632_v10  ;;  %v1641_v31 = vld [vmem:[#allocation3 + $0xc0] sm:$0xff] }
 0x367   : > { %2683 = vst [vmem:[#allocation3 + $0x60] sm:$0xff] %v2635_v2  ;;  %v2636_v30 = vadd.f32 %v2484_v44, %v1630_v32  ;;  %v1642_v44 = vld [vmem:[#allocation3 + $0xc8] sm:$0xff] }
 0x368   : > { %2686 = vst [vmem:[#allocation3 + $0x78] sm:$0xff] %v2638_v34 }
 0x369   : > { %2684 = vst [vmem:[#allocation3 + $0x68] sm:$0xff] %v2636_v30  ;;  %v2287_v6 = vpop.f32.mrb[40].mxu0  ;;  %v3905_v4 = vpop.f32.mrb[40].mxu1 }
 0x36a   : > { %v2505_v11 = vadd.f32 %v3905_v4, %v2279_v21  ;;  %v2289_v49 = vpop.f32.mrb[41].mxu0  ;;  %v2496_v52 = vpop.f32.mrb[41].mxu1  ;;  %v1643_v4 = vld [vmem:[#allocation3 + $0xd0] sm:$0xff] }
 0x36b   : > { %v2497_v40 = vadd.f32 %v2496_v52, %v2271_v43  ;;  %v2290_v46 = vpop.f32.mrb[42].mxu0  ;;  %v3906_v45 = vpop.f32.mrb[42].mxu1 }
 0x36c   : > { %v2641_v35 = vadd.f32 %v2505_v11, %v1635_v51  ;;  %v2508_v33 = vadd.f32 %v3906_v45, %v2282_v29  ;;  %v2292_v26 = vpop.f32.mrb[43].mxu0  ;;  %v2499_v1 = vpop.f32.mrb[43].mxu1 }
 0x36d   : > { %v2639_v47 = vadd.f32 %v2497_v40, %v1633_v15  ;;  %v2500_v53 = vadd.f32 %v2499_v1, %v2274_v5 }
 0x36e   : > { %2689 = vst [vmem:[#allocation3 + $0x90] sm:$0xff] %v2641_v35  ;;  %v2642_v48 = vadd.f32 %v2508_v33, %v1636_v42 }
 0x36f   : > { %2687 = vst [vmem:[#allocation3 + $0x80] sm:$0xff] %v2639_v47  ;;  %v2640_v8 = vadd.f32 %v2500_v53, %v1634_v18  ;;  %v1645_v47 = vld [vmem:[#allocation3 + $0xe0] sm:$0xff] }
 0x370   : > { %2690 = vst [vmem:[#allocation3 + $0x98] sm:$0xff] %v2642_v48 }
 0x371   : > { %2688 = vst [vmem:[#allocation3 + $0x88] sm:$0xff] %v2640_v8  ;;  %v2295_v39 = vpop.f32.mrb[44].mxu0  ;;  %v3909_v14 = vpop.f32.mrb[44].mxu1 }
 0x372   : > { %v2521_v43 = vadd.f32 %v3909_v14, %v2295_v39  ;;  %v2297_v12 = vpop.f32.mrb[45].mxu0  ;;  %v2512_v13 = vpop.f32.mrb[45].mxu1  ;;  %v1646_v14 = vld [vmem:[#allocation3 + $0xe8] sm:$0xff] }
 0x373   : > { %v2513_v16 = vadd.f32 %v2512_v13, %v2287_v6  ;;  %v2298_v17 = vpop.f32.mrb[46].mxu0  ;;  %v3910_v60 = vpop.f32.mrb[46].mxu1 }
 0x374   : > { %v2645_v21 = vadd.f32 %v2521_v43, %v1639_v58  ;;  %v2524_v24 = vadd.f32 %v3910_v60, %v2298_v17  ;;  %v2300_v5 = vpop.f32.mrb[47].mxu0  ;;  %v2515_v54 = vpop.f32.mrb[47].mxu1  ;;  %v1647_v60 = vld [vmem:[#allocation3 + $0xf0] sm:$0xff] }
 0x375   : > { %v2643_v9 = vadd.f32 %v2513_v16, %v1637_v50  ;;  %v2516_v25 = vadd.f32 %v2515_v54, %v2290_v46  ;;  %v1644_v46 = vld [vmem:[#allocation3 + $0xd8] sm:$0xff] }
 0x376   : > { %2693 = vst [vmem:[#allocation3 + $0xb0] sm:$0xff] %v2645_v21  ;;  %v2646_v28 = vadd.f32 %v2524_v24, %v1640_v19  ;;  %v1655_v24 = vld [vmem:[#allocation3 + $0x130] sm:$0xff] }
 0x377   : > { %2691 = vst [vmem:[#allocation3 + $0xa0] sm:$0xff] %v2643_v9  ;;  %v2644_v61 = vadd.f32 %v2516_v25, %v1638_v22  ;;  %v1653_v25 = vld [vmem:[#allocation3 + $0x120] sm:$0xff] }
 0x378   : > { %2694 = vst [vmem:[#allocation3 + $0xb8] sm:$0xff] %v2646_v28 }
 0x379   : > { %2692 = vst [vmem:[#allocation3 + $0xa8] sm:$0xff] %v2644_v61  ;;  %v2303_v29 = vpop.f32.mrb[48].mxu0  ;;  %v3913_v10 = vpop.f32.mrb[48].mxu1 }
 0x37a   : > { %v2305_v23 = vpop.f32.mrb[49].mxu0  ;;  %v2528_v56 = vpop.f32.mrb[49].mxu1 }
 0x37b   : > { %v2529_v20 = vadd.f32 %v2528_v56, %v2303_v29  ;;  %v2306_v32 = vpop.f32.mrb[50].mxu0  ;;  %v3914_v37 = vpop.f32.mrb[50].mxu1  ;;  %v1648_v29 = vld [vmem:[#allocation3 + $0xf8] sm:$0xff] }
 0x37c   : > { %v2308_v2 = vpop.f32.mrb[51].mxu0  ;;  %v2531_v34 = vpop.f32.mrb[51].mxu1  ;;  %v1656_v23 = vld [vmem:[#allocation3 + $0x138] sm:$0xff] }
 0x37d   : > { %v2647_v30 = vadd.f32 %v2529_v20, %v1641_v31  ;;  %v2532_v6 = vadd.f32 %v2531_v34, %v2306_v32 }
 0x37f   : > { %2695 = vst [vmem:[#allocation3 + $0xc0] sm:$0xff] %v2647_v30  ;;  %v2648_v51 = vadd.f32 %v2532_v6, %v1642_v44  ;;  %v1654_v44 = vld [vmem:[#allocation3 + $0x128] sm:$0xff] }
 0x381   : > { %2696 = vst [vmem:[#allocation3 + $0xc8] sm:$0xff] %v2648_v51  ;;  %v2311_v11 = vpop.f32.mrb[52].mxu0  ;;  %v3917_v49 = vpop.f32.mrb[52].mxu1 }
 0x382   : > { %v2537_v15 = vadd.f32 %v3913_v10, %v2311_v11  ;;  %v2313_v52 = vpop.f32.mrb[53].mxu0  ;;  %v2544_v40 = vpop.f32.mrb[53].mxu1 }
 0x383   : > { %v2314_v42 = vpop.f32.mrb[54].mxu0  ;;  %v3918_v45 = vpop.f32.mrb[54].mxu1 }
 0x384   : > { %v2649_v35 = vadd.f32 %v2537_v15, %v1643_v4  ;;  %v2540_v33 = vadd.f32 %v3914_v37, %v2314_v42  ;;  %v2316_v26 = vpop.f32.mrb[55].mxu0  ;;  %v2547_v18 = vpop.f32.mrb[55].mxu1  ;;  %v1649_v4 = vld [vmem:[#allocation3 + $0x100] sm:$0xff] }
 0x386   : > { %2697 = vst [vmem:[#allocation3 + $0xd0] sm:$0xff] %v2649_v35  ;;  %v2650_v1 = vadd.f32 %v2540_v33, %v1644_v46  ;;  %v1657_v46 = vld [vmem:[#allocation3 + $0x140] sm:$0xff]  ;;  %v1660_v33 = vld [vmem:[#allocation3 + $0x158] sm:$0xff] }
 0x388   : > { %2698 = vst [vmem:[#allocation3 + $0xd8] sm:$0xff] %v2650_v1 }
 0x389   : > { %v2319_v53 = vpop.f32.mrb[56].mxu0  ;;  %v4866_v48 = vpop.f32.mrb[56].mxu1 }
 0x38a   : > { %v2545_v8 = vadd.f32 %v2544_v40, %v2319_v53  ;;  %v2321_v39 = vpop.f32.mrb[57].mxu0  ;;  %v2560_v58 = vpop.f32.mrb[57].mxu1 }
 0x38b   : > { %v2322_v43 = vpop.f32.mrb[58].mxu0  ;;  %v4868_v12 = vpop.f32.mrb[58].mxu1  ;;  %v1658_v39 = vld [vmem:[#allocation3 + $0x148] sm:$0xff] }
 0x38c   : > { %v2651_v50 = vadd.f32 %v2545_v8, %v1645_v47  ;;  %v2548_v13 = vadd.f32 %v2547_v18, %v2322_v43  ;;  %v2324_v16 = vpop.f32.mrb[59].mxu0  ;;  %v2563_v17 = vpop.f32.mrb[59].mxu1 }
 0x38e   : > { %2699 = vst [vmem:[#allocation3 + $0xe0] sm:$0xff] %v2651_v50  ;;  %v2652_v19 = vadd.f32 %v2548_v13, %v1646_v14  ;;  %v1651_v13 = vld [vmem:[#allocation3 + $0x110] sm:$0xff] }
 0x390   : > { %2700 = vst [vmem:[#allocation3 + $0xe8] sm:$0xff] %v2652_v19 }
 0x391   : > { %v2327_v21 = vpop.f32.mrb[60].mxu0  ;;  %v3925_v5 = vpop.f32.mrb[60].mxu1 }
 0x392   : > { %v2553_v22 = vadd.f32 %v3917_v49, %v2327_v21  ;;  %v2585_v54 = vadd.f32 %v3925_v5, %v4825_v63  ;;  %v2329_v9 = vpop.f32.mrb[61].mxu0  ;;  %v2576_v28 = vpop.f32.mrb[61].mxu1  ;;  %v1659_v49 = vld [vmem:[#allocation3 + $0x150] sm:$0xff] }
 0x393   : > { %v2577_v61 = vadd.f32 %v2576_v28, %v4821_v59  ;;  %v2330_v10 = vpop.f32.mrb[62].mxu0  ;;  %v3926_v31 = vpop.f32.mrb[62].mxu1  ;;  %v1664_v9 = vld [vmem:[#allocation3 + $0x178] sm:$0xff] }
 0x394   : > { %v2653_v56 = vadd.f32 %v2553_v22, %v1647_v60  ;;  %v2661_v20 = vadd.f32 %v2585_v54, %v1655_v24  ;;  %v2556_v32 = vadd.f32 %v3918_v45, %v2330_v10  ;;  %v2588_v37 = vadd.f32 %v3926_v31, %v4827_v55  ;;  %v2332_v2 = vpop.f32.mrb[63].mxu0  ;;  %v2579_v34 = vpop.f32.mrb[63].mxu1  ;;  %v1650_v45 = vld [vmem:[#allocation3 + $0x108] sm:$0xff]  ;;  %v1661_v24 = vld [vmem:[#allocation3 + $0x160] sm:$0xff]  ;;  %v1652_v22 = vld [vmem:[#allocation3 + $0x118] sm:$0xff] }
 0x395   : > { %v2659_v30 = vadd.f32 %v2577_v61, %v1653_v25  ;;  %v2580_v63 = vadd.f32 %v2579_v34, %v4823_v27  ;;  %v1662_v31 = vld [vmem:[#allocation3 + $0x168] sm:$0xff] }
 0x396   : > { %2701 = vst [vmem:[#allocation3 + $0xf0] sm:$0xff] %v2653_v56  ;;  %2709 = vst [vmem:[#allocation3 + $0x130] sm:$0xff] %v2661_v20  ;;  %v2654_v6 = vadd.f32 %v2556_v32, %v1648_v29  ;;  %v2662_v51 = vadd.f32 %v2588_v37, %v1656_v23 }
 0x397   : > { %2707 = vst [vmem:[#allocation3 + $0x120] sm:$0xff] %v2659_v30  ;;  %v2660_v59 = vadd.f32 %v2580_v63, %v1654_v44 }
 0x398   : > { %2702 = vst [vmem:[#allocation3 + $0xf8] sm:$0xff] %v2654_v6  ;;  %2710 = vst [vmem:[#allocation3 + $0x138] sm:$0xff] %v2662_v51 }
 0x399   : > { %2708 = vst [vmem:[#allocation3 + $0x128] sm:$0xff] %v2660_v59  ;;  %v2335_v11 = vpop.f32.mrb[64].mxu0  ;;  %v3929_v15 = vpop.f32.mrb[64].mxu1 }
 0x39a   : > { %v2561_v55 = vadd.f32 %v2560_v58, %v2335_v11  ;;  %v2601_v52 = vadd.f32 %v3929_v15, %v4837_v62  ;;  %v2337_v40 = vpop.f32.mrb[65].mxu0  ;;  %v2592_v42 = vpop.f32.mrb[65].mxu1 }
 0x39b   : > { %v2593_v27 = vadd.f32 %v2592_v42, %v4831_v36  ;;  %v2338_v35 = vpop.f32.mrb[66].mxu0  ;;  %v3930_v26 = vpop.f32.mrb[66].mxu1 }
 0x39c   : > { %v2655_v18 = vadd.f32 %v2561_v55, %v1649_v4  ;;  %v2665_v1 = vadd.f32 %v2601_v52, %v1659_v49  ;;  %v2564_v47 = vadd.f32 %v2563_v17, %v2338_v35  ;;  %v2604_v53 = vadd.f32 %v3930_v26, %v4839_v3  ;;  %v2340_v8 = vpop.f32.mrb[67].mxu0  ;;  %v2595_v14 = vpop.f32.mrb[67].mxu1  ;;  %v1663_v17 = vld [vmem:[#allocation3 + $0x170] sm:$0xff] }
 0x39d   : > { %v2663_v58 = vadd.f32 %v2593_v27, %v1657_v46  ;;  %v2596_v62 = vadd.f32 %v2595_v14, %v4835_v41 }
 0x39e   : > { %2703 = vst [vmem:[#allocation3 + $0x100] sm:$0xff] %v2655_v18  ;;  %2713 = vst [vmem:[#allocation3 + $0x150] sm:$0xff] %v2665_v1  ;;  %v2656_v43 = vadd.f32 %v2564_v47, %v1650_v45  ;;  %v2666_v50 = vadd.f32 %v2604_v53, %v1660_v33 }
 0x39f   : > { %2711 = vst [vmem:[#allocation3 + $0x140] sm:$0xff] %v2663_v58  ;;  %v2664_v36 = vadd.f32 %v2596_v62, %v1658_v39 }
 0x3a0   : > { %2704 = vst [vmem:[#allocation3 + $0x108] sm:$0xff] %v2656_v43  ;;  %2714 = vst [vmem:[#allocation3 + $0x158] sm:$0xff] %v2666_v50 }
 0x3a1   : > { %2712 = vst [vmem:[#allocation3 + $0x148] sm:$0xff] %v2664_v36  ;;  %v2343_v16 = vpop.f32.mrb[68].mxu0  ;;  %v3933_v19 = vpop.f32.mrb[68].mxu1 }
 0x3a2   : > { %v2569_v3 = vadd.f32 %v4866_v48, %v2343_v16  ;;  %v2617_v60 = vadd.f32 %v3933_v19, %v4849_v38  ;;  %v2345_v21 = vpop.f32.mrb[69].mxu0  ;;  %v2608_v41 = vpop.f32.mrb[69].mxu1 }
 0x3a3   : > { %v2609_v5 = vadd.f32 %v2608_v41, %v4843_v7  ;;  %v2346_v54 = vpop.f32.mrb[70].mxu0  ;;  %v3934_v25 = vpop.f32.mrb[70].mxu1 }
 0x3a4   : > { %v2657_v28 = vadd.f32 %v2569_v3, %v1651_v13  ;;  %v2669_v61 = vadd.f32 %v2617_v60, %v1663_v17  ;;  %v2572_v29 = vadd.f32 %v4868_v12, %v2346_v54  ;;  %v2620_v10 = vadd.f32 %v3934_v25, %v4853_v0  ;;  %v2348_v23 = vpop.f32.mrb[71].mxu0  ;;  %v2611_v48 = vpop.f32.mrb[71].mxu1 }
 0x3a5   : > { %v2667_v56 = vadd.f32 %v2609_v5, %v1661_v24  ;;  %v2612_v38 = vadd.f32 %v2611_v48, %v4847_v57 }
 0x3a6   : > { %2705 = vst [vmem:[#allocation3 + $0x110] sm:$0xff] %v2657_v28  ;;  %2717 = vst [vmem:[#allocation3 + $0x170] sm:$0xff] %v2669_v61  ;;  %v2658_v20 = vadd.f32 %v2572_v29, %v1652_v22  ;;  %v2670_v7 = vadd.f32 %v2620_v10, %v1664_v9 }
 0x3a7   : > { %2715 = vst [vmem:[#allocation3 + $0x160] sm:$0xff] %v2667_v56  ;;  %v2668_v32 = vadd.f32 %v2612_v38, %v1662_v31 }
 0x3a8   : > { %2706 = vst [vmem:[#allocation3 + $0x118] sm:$0xff] %v2658_v20  ;;  %2718 = vst [vmem:[#allocation3 + $0x178] sm:$0xff] %v2670_v7 }
 0x3a9   : > { %2716 = vst [vmem:[#allocation3 + $0x168] sm:$0xff] %v2668_v32 }
 0x3aa PF: > { %2722 = sbr.rel (!%p339_p3) target bundleno = 1229 (0x4cd), region = 68  ;;  %v4371_v0 = vld [vmem:[#allocation9] sm:$0xff] (%p339_p3)   ;;  %v4372_v12 = vld [vmem:[#allocation9 + $0x8] sm:$0xff] (%p339_p3)   ;;  %v4373_v57 = vld [vmem:[#allocation9 + $0x10] sm:$0xff] (%p339_p3)  }
 0x3ab   : > { %3935 = vmatprep.subr.bf16.mxu0 (%p339_p3), %v4371_v0  ;;  %4063 = vmatprep.subr.bf16.mxu1 (%p339_p3), %v4371_v0  ;;  %v4374_v37 = vld [vmem:[#allocation9 + $0x18] sm:$0xff] (%p339_p3)   ;;  %v2723_v2 = vld [vmem:[#allocation3] sm:$0xff] (%p339_p3)  ;;  %v2724_v44 = vld [vmem:[#allocation3 + $0x8] sm:$0xff] (%p339_p3) }
 0x3ac   : > { %3936 = vmatpush3.bf16.msra.mxu0 (%p339_p3), %v4371_v0  ;;  %4071 = vmatpush3.bf16.msra.mxu1 (%p339_p3), %v4371_v0  ;;  %v4889_v34 = vld [vmem:[%s5032_s2] ss:$0 sm:$0xff] (%p339_p3)  ;;  %v2748_v51 = vld [vmem:[#allocation3 + $0xc8] sm:$0xff] (%p339_p3)  ;;  %v2725_v27 = vld [vmem:[#allocation3 + $0x10] sm:$0xff] (%p339_p3) }
 0x3ad   : > { %3937 = vmatprep.subr.bf16.mxu0 (%p339_p3), %v4372_v12  ;;  %4064 = vmatprep.subr.bf16.mxu1 (%p339_p3), %v4372_v12  ;;  %v2778_v30 = vadd.f32 (%p339_p3), %v4889_v34, %v2723_v2  ;;  %v2779_v63 = vadd.f32 (%p339_p3), %v4889_v34, %v2724_v44  ;;  %v2747_v6 = vld [vmem:[#allocation3 + $0xc0] sm:$0xff] (%p339_p3)  ;;  %v2803_v4 = vadd.f32 (%p339_p3), %v4889_v34, %v2748_v51  ;;  %v4376_v42 = vld [vmem:[#allocation9 + $0x28] sm:$0xff] (%p339_p3)   ;;  %v2726_v45 = vld [vmem:[#allocation3 + $0x18] sm:$0xff] (%p339_p3) }
 0x3ae   : > { %v2802_v59 = vadd.f32 (%p339_p3), %v4889_v34, %v2747_v6  ;;  %v4375_v15 = vld [vmem:[#allocation9 + $0x20] sm:$0xff] (%p339_p3)   ;;  %v2749_v35 = vld [vmem:[#allocation3 + $0xd0] sm:$0xff] (%p339_p3)  ;;  %v2750_v33 = vld [vmem:[#allocation3 + $0xd8] sm:$0xff] (%p339_p3)  ;;  %v2780_v47 = vadd.f32 (%p339_p3), %v4889_v34, %v2725_v27  ;;  %v2781_v53 = vadd.f32 (%p339_p3), %v4889_v34, %v2726_v45 }
 0x3af   : > { %v2826_v11 = vmax.f32 (%p339_p3), %v2778_v30, 0.0  ;;  %v2827_v49 = vmax.f32 (%p339_p3), %v2779_v63, 0.0  ;;  %v2851_v52 = vmax.f32 (%p339_p3), %v2803_v4, 0.0  ;;  %v2727_v26 = vld [vmem:[#allocation3 + $0x20] sm:$0xff] (%p339_p3)  ;;  %v2728_v18 = vld [vmem:[#allocation3 + $0x28] sm:$0xff] (%p339_p3)  ;;  %v4377_v1 = vld [vmem:[#allocation9 + $0x30] sm:$0xff] (%p339_p3)   ;;  %v2804_v14 = vadd.f32 (%p339_p3), %v4889_v34, %v2749_v35 }
 0x3b0   : > { %3938 = vmatpush3.bf16.msra.mxu0 (%p339_p3), %v4372_v12  ;;  %4072 = vmatpush3.bf16.msra.mxu1 (%p339_p3), %v4372_v12  ;;  %v2850_v55 = vmax.f32 (%p339_p3), %v2802_v59, 0.0  ;;  %v2751_v8 = vld [vmem:[#allocation3 + $0xe0] sm:$0xff] (%p339_p3)  ;;  %v2752_v39 = vld [vmem:[#allocation3 + $0xe8] sm:$0xff] (%p339_p3)  ;;  %v2805_v58 = vadd.f32 (%p339_p3), %v4889_v34, %v2750_v33  ;;  %v2782_v62 = vadd.f32 (%p339_p3), %v4889_v34, %v2727_v26  ;;  %v2783_v43 = vadd.f32 (%p339_p3), %v4889_v34, %v2728_v18  ;;  %v4378_v13 = vld [vmem:[#allocation9 + $0x38] sm:$0xff] (%p339_p3)  }
 0x3b1   : > { %3939 = vmatprep.subr.bf16.mxu0 %v4373_v57  ;;  %4065 = vmatprep.subr.bf16.mxu1 %v4373_v57  ;;  %v2874_v40 = vpack.c.bf16 %v2827_v49, %v2826_v11  ;;  %v2806_v50 = vadd.f32 %v4889_v34, %v2751_v8  ;;  %v2807_v36 = vadd.f32 %v4889_v34, %v2752_v39  ;;  %v2828_v16 = vmax.f32 %v2780_v47, 0.0  ;;  %v2729_v24 = vld [vmem:[#allocation3 + $0x30] sm:$0xff]  ;;  %v2730_v41 = vld [vmem:[#allocation3 + $0x38] sm:$0xff]  ;;  %v2731_v25 = vld [vmem:[#allocation3 + $0x40] sm:$0xff] }
 0x3b2   : > { %v2886_v46 = vpack.c.bf16 %v2851_v52, %v2850_v55  ;;  %v2829_v17 = vmax.f32 %v2781_v53, 0.0  ;;  %v2852_v19 = vmax.f32 %v2804_v14, 0.0  ;;  %v2853_v3 = vmax.f32 %v2805_v58, 0.0  ;;  %v2753_v5 = vld [vmem:[#allocation3 + $0xf0] sm:$0xff]  ;;  %v2754_v9 = vld [vmem:[#allocation3 + $0xf8] sm:$0xff]  ;;  %v2732_v28 = vld [vmem:[#allocation3 + $0x48] sm:$0xff] }
 0x3b3   : > { %3951 = vmatprep.mubr.bf16.mxu0 %v2874_v40  ;;  %v2830_v60 = vmax.f32 %v2782_v62, 0.0  ;;  %v2831_v21 = vmax.f32 %v2783_v43, 0.0  ;;  %v2854_v22 = vmax.f32 %v2806_v50, 0.0  ;;  %v2855_v54 = vmax.f32 %v2807_v36, 0.0  ;;  %v2755_v29 = vld [vmem:[#allocation3 + $0x100] sm:$0xff]  ;;  %v2756_v10 = vld [vmem:[#allocation3 + $0x108] sm:$0xff] }
 0x3b4   : > { %3940 = vmatpush3.bf16.msra.mxu0 %v4373_v57  ;;  %4073 = vmatpush3.bf16.msra.mxu1 %v4373_v57  ;;  %v2875_v61 = vpack.c.bf16 %v2829_v17, %v2828_v16  ;;  %v2887_v23 = vpack.c.bf16 %v2853_v3, %v2852_v19  ;;  %v2784_v31 = vadd.f32 %v4889_v34, %v2729_v24  ;;  %v2733_v44 = vld [vmem:[#allocation3 + $0x50] sm:$0xff]  ;;  %v2734_v30 = vld [vmem:[#allocation3 + $0x58] sm:$0xff]  ;;  %v2735_v55 = vld [vmem:[#allocation3 + $0x60] sm:$0xff] }
 0x3b5   : > { %3941 = vmatprep.subr.bf16.mxu0 %v4374_v37  ;;  %4066 = vmatprep.subr.bf16.mxu1 %v4374_v37  ;;  %v2785_v48 = vadd.f32 %v4889_v34, %v2730_v41  ;;  %v2808_v56 = vadd.f32 %v4889_v34, %v2753_v5  ;;  %v2876_v38 = vpack.c.bf16 %v2831_v21, %v2830_v60  ;;  %v2757_v4 = vld [vmem:[#allocation3 + $0x110] sm:$0xff]  ;;  %v2758_v11 = vld [vmem:[#allocation3 + $0x118] sm:$0xff]  ;;  %v2736_v52 = vld [vmem:[#allocation3 + $0x68] sm:$0xff] }
 0x3b6   : > { %3975 = vmatprep.mubr.bf16.mxu1 %v2886_v46  ;;  %v2809_v20 = vadd.f32 %v4889_v34, %v2754_v9  ;;  %v2786_v7 = vadd.f32 %v4889_v34, %v2731_v25  ;;  %v2787_v32 = vadd.f32 %v4889_v34, %v2732_v28  ;;  %v2888_v0 = vpack.c.bf16 %v2855_v54, %v2854_v22  ;;  %v2759_v40 = vld [vmem:[#allocation3 + $0x120] sm:$0xff]  ;;  %v2760_v46 = vld [vmem:[#allocation3 + $0x128] sm:$0xff]  ;;  %v2737_v50 = vld [vmem:[#allocation3 + $0x70] sm:$0xff] }
 0x3b7   : > { %v2810_v12 = vadd.f32 %v4889_v34, %v2755_v29  ;;  %v2811_v57 = vadd.f32 %v4889_v34, %v2756_v10  ;;  %v2833_v2 = vmax.f32 %v2785_v48, 0.0  ;;  %v2856_v63 = vmax.f32 %v2808_v56, 0.0  ;;  %v2738_v36 = vld [vmem:[#allocation3 + $0x78] sm:$0xff]  ;;  %v2739_v21 = vld [vmem:[#allocation3 + $0x80] sm:$0xff]  ;;  %v2740_v24 = vld [vmem:[#allocation3 + $0x88] sm:$0xff] }
 0x3b8   : > { %3942 = vmatpush3.bf16.msra.mxu0 %v4374_v37  ;;  %4074 = vmatpush3.bf16.msra.mxu1 %v4374_v37  ;;  %v2832_v37 = vmax.f32 %v2784_v31, 0.0  ;;  %v2857_v6 = vmax.f32 %v2809_v20, 0.0  ;;  %v2834_v51 = vmax.f32 %v2786_v7, 0.0  ;;  %v2835_v59 = vmax.f32 %v2787_v32, 0.0  ;;  %v2762_v16 = vld [vmem:[#allocation3 + $0x138] sm:$0xff]  ;;  %v2763_v41 = vld [vmem:[#allocation3 + $0x140] sm:$0xff] }
 0x3b9   : > { %3943 = vmatprep.subr.bf16.mxu0 %v4375_v15  ;;  %4067 = vmatprep.subr.bf16.mxu1 %v4375_v15  ;;  %v2858_v49 = vmax.f32 %v2810_v12, 0.0  ;;  %v2789_v27 = vadd.f32 %v4889_v34, %v2734_v30  ;;  %v2812_v45 = vadd.f32 %v4889_v34, %v2757_v4  ;;  %v2813_v35 = vadd.f32 %v4889_v34, %v2758_v11  ;;  %v2764_v5 = vld [vmem:[#allocation3 + $0x148] sm:$0xff]  ;;  %v2741_v7 = vld [vmem:[#allocation3 + $0x90] sm:$0xff]  ;;  %v2742_v32 = vld [vmem:[#allocation3 + $0x98] sm:$0xff] }
 0x3ba   : > { %v2877_v33 = vpack.c.bf16 %v2833_v2, %v2832_v37  ;;  %v2889_v26 = vpack.c.bf16 %v2857_v6, %v2856_v63  ;;  %v2878_v18 = vpack.c.bf16 %v2835_v59, %v2834_v51  ;;  %v2791_v53 = vadd.f32 %v4889_v34, %v2736_v52  ;;  %v2765_v2 = vld [vmem:[#allocation3 + $0x150] sm:$0xff]  ;;  %v2743_v6 = vld [vmem:[#allocation3 + $0xa0] sm:$0xff]  ;;  %v2744_v51 = vld [vmem:[#allocation3 + $0xa8] sm:$0xff] }
 0x3bb   : > { %v2814_v8 = vadd.f32 %v4889_v34, %v2759_v40  ;;  %v2815_v39 = vadd.f32 %v4889_v34, %v2760_v46  ;;  %v2837_v58 = vmax.f32 %v2789_v27, 0.0  ;;  %v2860_v62 = vmax.f32 %v2812_v45, 0.0  ;;  %v2767_v59 = vld [vmem:[#allocation3 + $0x160] sm:$0xff]  ;;  %v2768_v4 = vld [vmem:[#allocation3 + $0x168] sm:$0xff] }
 0x3bc   : > { %3944 = vmatpush3.bf16.msra.mxu0 %v4375_v15  ;;  %4075 = vmatpush3.bf16.msra.mxu1 %v4375_v15  ;;  %v2859_v15 = vmax.f32 %v2811_v57, 0.0  ;;  %v2861_v43 = vmax.f32 %v2813_v35, 0.0  ;;  %v2839_v19 = vmax.f32 %v2791_v53, 0.0  ;;  %v2792_v9 = vadd.f32 %v4889_v34, %v2737_v50  ;;  %v2745_v53 = vld [vmem:[#allocation3 + $0xb0] sm:$0xff]  ;;  %v2770_v50 = vld [vmem:[#allocation3 + $0x178] sm:$0xff] }
 0x3bd   : > { %3945 = vmatprep.subr.bf16.mxu0 %v4376_v42  ;;  %4068 = vmatprep.subr.bf16.mxu1 %v4376_v42  ;;  %v2862_v3 = vmax.f32 %v2814_v8, 0.0  ;;  %v2863_v60 = vmax.f32 %v2815_v39, 0.0  ;;  %v2793_v25 = vadd.f32 %v4889_v34, %v2738_v36  ;;  %v2794_v29 = vadd.f32 %v4889_v34, %v2739_v21  ;;  %v2746_v8 = vld [vmem:[#allocation3 + $0xb8] sm:$0xff] }
 0x3be   : > { %v2890_v47 = vpack.c.bf16 %v2859_v15, %v2858_v49  ;;  %v2891_v54 = vpack.c.bf16 %v2861_v43, %v2860_v62  ;;  %v2795_v10 = vadd.f32 %v4889_v34, %v2740_v24  ;;  %v2818_v48 = vadd.f32 %v4889_v34, %v2763_v41  ;;  %v2769_v43 = vld [vmem:[#allocation3 + $0x170] sm:$0xff] }
 0x3bf   : > { %v2892_v31 = vpack.c.bf16 %v2863_v60, %v2862_v3  ;;  %v2819_v56 = vadd.f32 %v4889_v34, %v2764_v5  ;;  %v2841_v20 = vmax.f32 %v2793_v25, 0.0  ;;  %v2842_v57 = vmax.f32 %v2794_v29, 0.0 }
 0x3c0   : > { %3946 = vmatpush3.bf16.msra.mxu0 %v4376_v42  ;;  %4076 = vmatpush3.bf16.msra.mxu1 %v4376_v42  ;;  %v2788_v42 = vadd.f32 %v4889_v34, %v2733_v44  ;;  %v2843_v37 = vmax.f32 %v2795_v10, 0.0  ;;  %v2766_v44 = vld [vmem:[#allocation3 + $0x158] sm:$0xff]  ;;  %v2866_v30 = vmax.f32 %v2818_v48, 0.0  ;;  %v2796_v11 = vadd.f32 %v4889_v34, %v2741_v7 }
 0x3c1   : > { %3947 = vmatprep.subr.bf16.mxu0 %v4377_v1  ;;  %4069 = vmatprep.subr.bf16.mxu1 %v4377_v1  ;;  %v2867_v63 = vmax.f32 %v2819_v56, 0.0  ;;  %v2797_v49 = vadd.f32 %v4889_v34, %v2742_v32  ;;  %v2820_v15 = vadd.f32 %v4889_v34, %v2765_v2  ;;  %v2799_v45 = vadd.f32 %v4889_v34, %v2744_v51 }
 0x3c2   : > { %v2836_v14 = vmax.f32 %v2788_v42, 0.0  ;;  %v2882_v46 = vpack.c.bf16 %v2843_v37, %v2842_v57  ;;  %v2798_v42 = vadd.f32 %v4889_v34, %v2743_v6  ;;  %v2822_v35 = vadd.f32 %v4889_v34, %v2767_v59 }
 0x3c3   : > { %v2894_v27 = vpack.c.bf16 %v2867_v63, %v2866_v30  ;;  %v2825_v3 = vadd.f32 %v4889_v34, %v2770_v50 }
 0x3c4   : > { %3948 = vmatpush3.bf16.msra.mxu0 %v4377_v1  ;;  %4077 = vmatpush3.bf16.msra.mxu1 %v4377_v1  ;;  %v2790_v1 = vadd.f32 %v4889_v34, %v2735_v55  ;;  %v2879_v22 = vpack.c.bf16 %v2837_v58, %v2836_v14  ;;  %v2821_v55 = vadd.f32 %v4889_v34, %v2766_v44  ;;  %v2846_v39 = vmax.f32 %v2798_v42, 0.0 }
 0x3c5   : > { %3949 = vmatprep.subr.bf16.mxu0 %v4378_v13  ;;  %4070 = vmatprep.subr.bf16.mxu1 %v4378_v13  ;;  %v2847_v14 = vmax.f32 %v2799_v45, 0.0  ;;  %v2870_v58 = vmax.f32 %v2822_v35, 0.0 }
 0x3c6   : > { %v2838_v17 = vmax.f32 %v2790_v1, 0.0  ;;  %v2868_v1 = vmax.f32 %v2820_v15, 0.0 }
 0x3c7   : > { %v2884_v60 = vpack.c.bf16 %v2847_v14, %v2846_v39 }
 0x3c8   : > { %3950 = vmatpush3.bf16.msra.mxu0 %v4378_v13  ;;  %4078 = vmatpush3.bf16.msra.mxu1 %v4378_v13  ;;  %v2761_v13 = vld [vmem:[#allocation3 + $0x130] sm:$0xff] }
 0x3c9   : > { %v2816_v28 = vadd.f32 %v4889_v34, %v2761_v13 }
 0x3cb   : > { %3952 = vmatmul.mubr.bf16.vlgmr.msra.gmra.mrb[0].mxu0 %v2875_v61  ;;  %3976 = vmatmul.mubr.bf16.vlgmr.msra.gmra.mrb[0].mxu1 %v2887_v23  ;;  %v2817_v61 = vadd.f32 %v4889_v34, %v2762_v16  ;;  %v2880_v23 = vpack.c.bf16 %v2839_v19, %v2838_v17  ;;  %v2800_v16 = vadd.f32 %v4889_v34, %v2745_v53 }
 0x3cc   : > { %3955 = vmatprep.mubr.bf16.mxu0 %v2876_v38  ;;  %3979 = vmatprep.mubr.bf16.mxu1 %v2888_v0  ;;  %v2840_v38 = vmax.f32 %v2792_v9, 0.0  ;;  %v2864_v0 = vmax.f32 %v2816_v28, 0.0  ;;  %v2801_v17 = vadd.f32 %v4889_v34, %v2746_v8  ;;  %v2824_v19 = vadd.f32 %v4889_v34, %v2769_v43 }
 0x3cd   : > { %v2865_v12 = vmax.f32 %v2817_v61, 0.0  ;;  %v2848_v24 = vmax.f32 %v2800_v16, 0.0 }
 0x3ce   : > { %v2881_v52 = vpack.c.bf16 %v2841_v20, %v2840_v38  ;;  %v2849_v41 = vmax.f32 %v2801_v17, 0.0  ;;  %v2872_v5 = vmax.f32 %v2824_v19, 0.0 }
 0x3cf   : > { %v2893_v40 = vpack.c.bf16 %v2865_v12, %v2864_v0 }
 0x3d3   : > { %3956 = vmatmul.mubr.bf16.gmra.mrb[4].mxu0 %v2877_v33  ;;  %3980 = vmatmul.mubr.bf16.gmra.mrb[4].mxu1 %v2889_v26  ;;  %v2823_v33 = vadd.f32 %v4889_v34, %v2768_v4  ;;  %v2844_v26 = vmax.f32 %v2796_v11, 0.0 }
 0x3d4   : > { %3959 = vmatprep.mubr.bf16.mxu0 %v2878_v18  ;;  %3983 = vmatprep.mubr.bf16.mxu1 %v2890_v47  ;;  %v2845_v18 = vmax.f32 %v2797_v49, 0.0  ;;  %v2869_v47 = vmax.f32 %v2821_v55, 0.0 }
 0x3d5   : > { %v2871_v62 = vmax.f32 %v2823_v33, 0.0 }
 0x3d6   : > { %v2883_v36 = vpack.c.bf16 %v2845_v18, %v2844_v26  ;;  %v2895_v13 = vpack.c.bf16 %v2869_v47, %v2868_v1 }
 0x3d7   : > { %v2896_v21 = vpack.c.bf16 %v2871_v62, %v2870_v58 }
 0x3db   : > { %3960 = vmatmul.mubr.bf16.gmra.mrb[8].mxu0 %v2879_v22  ;;  %3984 = vmatmul.mubr.bf16.gmra.mrb[8].mxu1 %v2891_v54  ;;  %v2873_v22 = vmax.f32 %v2825_v3, 0.0  ;;  %v2885_v54 = vpack.c.bf16 %v2849_v41, %v2848_v24 }
 0x3dc   : > { %3963 = vmatprep.mubr.bf16.mxu0 %v2880_v23  ;;  %3987 = vmatprep.mubr.bf16.mxu1 %v2892_v31 }
 0x3dd   : > { %v2897_v9 = vpack.c.bf16 %v2873_v22, %v2872_v5 }
 0x3e3   : > { %3964 = vmatmul.mubr.bf16.gmra.mrb[12].mxu0 %v2881_v52  ;;  %3988 = vmatmul.mubr.bf16.gmra.mrb[12].mxu1 %v2893_v40 }
 0x3e4   : > { %3967 = vmatprep.mubr.bf16.mxu0 %v2882_v46  ;;  %3991 = vmatprep.mubr.bf16.mxu1 %v2894_v27 }
 0x3eb   : > { %3968 = vmatmul.mubr.bf16.gmra.mrb[16].mxu0 %v2883_v36  ;;  %3992 = vmatmul.mubr.bf16.gmra.mrb[16].mxu1 %v2895_v13 }
 0x3ec   : > { %3971 = vmatprep.mubr.bf16.mxu0 %v2884_v60  ;;  %3995 = vmatprep.mubr.bf16.mxu1 %v2896_v21 }
 0x3f3   : > { %3972 = vmatmul.mubr.bf16.gmra.mrb[20].mxu0 %v2885_v54  ;;  %3996 = vmatmul.mubr.bf16.gmra.mrb[20].mxu1 %v2897_v9 }
 0x49e   : > { %v3953_v25 = vpop.f32.mrb[0].mxu0  ;;  %v3977_v28 = vpop.f32.mrb[0].mxu1 }
 0x49f   : > { %v2996_v61 = vpop.f32.mrb[1].mxu0  ;;  %v3092_v29 = vpop.f32.mrb[1].mxu1 }
 0x4a0   : > { %v3954_v10 = vpop.f32.mrb[2].mxu0  ;;  %v3978_v34 = vpop.f32.mrb[2].mxu1 }
 0x4a1   : > { %v3189_v23 = vpack.c.bf16 %v3954_v10, %v3953_v25  ;;  %v3201_v31 = vpack.c.bf16 %v3978_v34, %v3977_v28  ;;  %v2999_v48 = vpop.f32.mrb[3].mxu0  ;;  %v3095_v56 = vpop.f32.mrb[3].mxu1 }
 0x4a2   : > { %v3188_v38 = vpack.c.bf16 %v2999_v48, %v2996_v61  ;;  %v3200_v20 = vpack.c.bf16 %v3095_v56, %v3092_v29 }
 0x4a3   : > { %3217 = vst [vmem:[#allocation2 + $0x8] sm:$0xff] %v3189_v23  ;;  %3229 = vst [vmem:[#allocation2 + $0x68] sm:$0xff] %v3201_v31 }
 0x4a4   : > { %3216 = vst [vmem:[#allocation2] sm:$0xff] %v3188_v38  ;;  %3228 = vst [vmem:[#allocation2 + $0x60] sm:$0xff] %v3200_v20 }
 0x4a6   : > { %v3957_v7 = vpop.f32.mrb[4].mxu0  ;;  %v3981_v32 = vpop.f32.mrb[4].mxu1 }
 0x4a7   : > { %v3012_v0 = vpop.f32.mrb[5].mxu0  ;;  %v3108_v12 = vpop.f32.mrb[5].mxu1 }
 0x4a8   : > { %v3958_v57 = vpop.f32.mrb[6].mxu0  ;;  %v3982_v37 = vpop.f32.mrb[6].mxu1 }
 0x4a9   : > { %v3191_v2 = vpack.c.bf16 %v3958_v57, %v3957_v7  ;;  %v3203_v44 = vpack.c.bf16 %v3982_v37, %v3981_v32  ;;  %v3015_v30 = vpop.f32.mrb[7].mxu0  ;;  %v3111_v63 = vpop.f32.mrb[7].mxu1 }
 0x4aa   : > { %v3190_v6 = vpack.c.bf16 %v3015_v30, %v3012_v0  ;;  %v3202_v51 = vpack.c.bf16 %v3111_v63, %v3108_v12 }
 0x4ab   : > { %3219 = vst [vmem:[#allocation2 + $0x18] sm:$0xff] %v3191_v2  ;;  %3231 = vst [vmem:[#allocation2 + $0x78] sm:$0xff] %v3203_v44 }
 0x4ac   : > { %3218 = vst [vmem:[#allocation2 + $0x10] sm:$0xff] %v3190_v6  ;;  %3230 = vst [vmem:[#allocation2 + $0x70] sm:$0xff] %v3202_v51 }
 0x4ae   : > { %v3961_v59 = vpop.f32.mrb[8].mxu0  ;;  %v3985_v4 = vpop.f32.mrb[8].mxu1 }
 0x4af   : > { %v3028_v11 = vpop.f32.mrb[9].mxu0  ;;  %v3124_v49 = vpop.f32.mrb[9].mxu1 }
 0x4b0   : > { %v3962_v15 = vpop.f32.mrb[10].mxu0  ;;  %v3986_v55 = vpop.f32.mrb[10].mxu1 }
 0x4b1   : > { %v3193_v52 = vpack.c.bf16 %v3962_v15, %v3961_v59  ;;  %v3205_v40 = vpack.c.bf16 %v3986_v55, %v3985_v4  ;;  %v3031_v46 = vpop.f32.mrb[11].mxu0  ;;  %v3127_v42 = vpop.f32.mrb[11].mxu1 }
 0x4b2   : > { %v3192_v27 = vpack.c.bf16 %v3031_v46, %v3028_v11  ;;  %v3204_v45 = vpack.c.bf16 %v3127_v42, %v3124_v49 }
 0x4b3   : > { %3221 = vst [vmem:[#allocation2 + $0x28] sm:$0xff] %v3193_v52  ;;  %3233 = vst [vmem:[#allocation2 + $0x88] sm:$0xff] %v3205_v40 }
 0x4b4   : > { %3220 = vst [vmem:[#allocation2 + $0x20] sm:$0xff] %v3192_v27  ;;  %3232 = vst [vmem:[#allocation2 + $0x80] sm:$0xff] %v3204_v45 }
 0x4b6   : > { %v3965_v35 = vpop.f32.mrb[12].mxu0  ;;  %v3989_v33 = vpop.f32.mrb[12].mxu1 }
 0x4b7   : > { %v3044_v26 = vpop.f32.mrb[13].mxu0  ;;  %v3140_v18 = vpop.f32.mrb[13].mxu1 }
 0x4b8   : > { %v3966_v1 = vpop.f32.mrb[14].mxu0  ;;  %v3990_v47 = vpop.f32.mrb[14].mxu1 }
 0x4b9   : > { %v3195_v53 = vpack.c.bf16 %v3966_v1, %v3965_v35  ;;  %v3207_v8 = vpack.c.bf16 %v3990_v47, %v3989_v33  ;;  %v3047_v39 = vpop.f32.mrb[15].mxu0  ;;  %v3143_v14 = vpop.f32.mrb[15].mxu1 }
 0x4ba   : > { %v3194_v58 = vpack.c.bf16 %v3047_v39, %v3044_v26  ;;  %v3206_v62 = vpack.c.bf16 %v3143_v14, %v3140_v18 }
 0x4bb   : > { %3223 = vst [vmem:[#allocation2 + $0x38] sm:$0xff] %v3195_v53  ;;  %3235 = vst [vmem:[#allocation2 + $0x98] sm:$0xff] %v3207_v8 }
 0x4bc   : > { %3222 = vst [vmem:[#allocation2 + $0x30] sm:$0xff] %v3194_v58  ;;  %3234 = vst [vmem:[#allocation2 + $0x90] sm:$0xff] %v3206_v62 }
 0x4be   : > { %v3969_v43 = vpop.f32.mrb[16].mxu0  ;;  %v3993_v50 = vpop.f32.mrb[16].mxu1 }
 0x4bf   : > { %v3060_v36 = vpop.f32.mrb[17].mxu0  ;;  %v3156_v13 = vpop.f32.mrb[17].mxu1 }
 0x4c0   : > { %v3970_v16 = vpop.f32.mrb[18].mxu0  ;;  %v3994_v17 = vpop.f32.mrb[18].mxu1 }
 0x4c1   : > { %v3197_v19 = vpack.c.bf16 %v3970_v16, %v3969_v43  ;;  %v3209_v3 = vpack.c.bf16 %v3994_v17, %v3993_v50  ;;  %v3063_v60 = vpop.f32.mrb[19].mxu0  ;;  %v3159_v21 = vpop.f32.mrb[19].mxu1 }
 0x4c2   : > { %v3196_v24 = vpack.c.bf16 %v3063_v60, %v3060_v36  ;;  %v3208_v41 = vpack.c.bf16 %v3159_v21, %v3156_v13 }
 0x4c3   : > { %3225 = vst [vmem:[#allocation2 + $0x48] sm:$0xff] %v3197_v19  ;;  %3237 = vst [vmem:[#allocation2 + $0xa8] sm:$0xff] %v3209_v3 }
 0x4c4   : > { %3224 = vst [vmem:[#allocation2 + $0x40] sm:$0xff] %v3196_v24  ;;  %3236 = vst [vmem:[#allocation2 + $0xa0] sm:$0xff] %v3208_v41 }
 0x4c6   : > { %v3973_v5 = vpop.f32.mrb[20].mxu0  ;;  %v3997_v22 = vpop.f32.mrb[20].mxu1 }
 0x4c7   : > { %v3076_v54 = vpop.f32.mrb[21].mxu0  ;;  %v3172_v9 = vpop.f32.mrb[21].mxu1 }
 0x4c8   : > { %v3974_v25 = vpop.f32.mrb[22].mxu0  ;;  %v3998_v28 = vpop.f32.mrb[22].mxu1 }
 0x4c9   : > { %v3199_v61 = vpack.c.bf16 %v3974_v25, %v3973_v5  ;;  %v3211_v29 = vpack.c.bf16 %v3998_v28, %v3997_v22  ;;  %v3079_v10 = vpop.f32.mrb[23].mxu0  ;;  %v3175_v34 = vpop.f32.mrb[23].mxu1 }
 0x4ca   : > { %v3198_v23 = vpack.c.bf16 %v3079_v10, %v3076_v54  ;;  %v3210_v31 = vpack.c.bf16 %v3175_v34, %v3172_v9 }
 0x4cb   : > { %3227 = vst [vmem:[#allocation2 + $0x58] sm:$0xff] %v3199_v61  ;;  %3239 = vst [vmem:[#allocation2 + $0xb8] sm:$0xff] %v3211_v29 }
 0x4cc   : > { %3226 = vst [vmem:[#allocation2 + $0x50] sm:$0xff] %v3198_v23  ;;  %3238 = vst [vmem:[#allocation2 + $0xb0] sm:$0xff] %v3210_v31 }
 0x4cd PF: > { %3243 = sbr.rel (!%p1613_p6) target bundleno = 1257 (0x4e9), region = 72  ;;  %v3244_v48 = vld [vmem:[#allocation3] sm:$0xff] (%p1613_p6)  ;;  %v3245_v38 = vld [vmem:[#allocation3 + $0x8] sm:$0xff] (%p1613_p6)  ;;  %v3246_v32 = vld [vmem:[#allocation3 + $0x10] sm:$0xff] (%p1613_p6) }
 0x4ce   : > { %v4944_v56 = vld [vmem:[%s5034_s4] ss:$0 sm:$0xff] (%p1613_p6)  ;;  %v3247_v0 = vld [vmem:[#allocation3 + $0x18] sm:$0xff] (%p1613_p6)  ;;  %v3249_v44 = vld [vmem:[#allocation3 + $0x28] sm:$0xff] (%p1613_p6) }
 0x4cf   : > { %v3299_v20 = vadd.f32 (%p1613_p6), %v4944_v56, %v3244_v48  ;;  %v3300_v7 = vadd.f32 (%p1613_p6), %v4944_v56, %v3245_v38  ;;  %v3248_v12 = vld [vmem:[#allocation3 + $0x20] sm:$0xff] (%p1613_p6)  ;;  %v3301_v57 = vadd.f32 (%p1613_p6), %v4944_v56, %v3246_v32  ;;  %v3302_v37 = vadd.f32 (%p1613_p6), %v4944_v56, %v3247_v0  ;;  %v3250_v30 = vld [vmem:[#allocation3 + $0x30] sm:$0xff] (%p1613_p6)  ;;  %v3251_v63 = vld [vmem:[#allocation3 + $0x38] sm:$0xff] (%p1613_p6) }
 0x4d0   : > { %v3303_v2 = vadd.f32 (%p1613_p6), %v4944_v56, %v3248_v12  ;;  %v3304_v6 = vadd.f32 (%p1613_p6), %v4944_v56, %v3249_v44  ;;  %v3305_v51 = vadd.f32 (%p1613_p6), %v4944_v56, %v3250_v30  ;;  %v3306_v59 = vadd.f32 (%p1613_p6), %v4944_v56, %v3251_v63  ;;  %v3252_v4 = vld [vmem:[#allocation3 + $0x40] sm:$0xff] (%p1613_p6)  ;;  %v3253_v11 = vld [vmem:[#allocation3 + $0x48] sm:$0xff] (%p1613_p6)  ;;  %v3254_v49 = vld [vmem:[#allocation3 + $0x50] sm:$0xff] (%p1613_p6) }
 0x4d1   : > { %3347 = vst [vmem:[#allocation10] sm:$0xff] (%p1613_p6), %v3299_v20  ;;  %3348 = vst [vmem:[#allocation10 + $0x8] sm:$0xff] (%p1613_p6), %v3300_v7  ;;  %v3307_v15 = vadd.f32 (%p1613_p6), %v4944_v56, %v3252_v4  ;;  %v3308_v55 = vadd.f32 (%p1613_p6), %v4944_v56, %v3253_v11  ;;  %v3309_v52 = vadd.f32 (%p1613_p6), %v4944_v56, %v3254_v49  ;;  %v3255_v40 = vld [vmem:[#allocation3 + $0x58] sm:$0xff] (%p1613_p6)  ;;  %v3256_v46 = vld [vmem:[#allocation3 + $0x60] sm:$0xff] (%p1613_p6) }
 0x4d2   : > { %3349 = vst [vmem:[#allocation10 + $0x10] sm:$0xff] (%p1613_p6), %v3301_v57  ;;  %3350 = vst [vmem:[#allocation10 + $0x18] sm:$0xff] (%p1613_p6), %v3302_v37  ;;  %v3257_v42 = vld [vmem:[#allocation3 + $0x68] sm:$0xff] (%p1613_p6)  ;;  %v3310_v27 = vadd.f32 (%p1613_p6), %v4944_v56, %v3255_v40  ;;  %v3311_v45 = vadd.f32 (%p1613_p6), %v4944_v56, %v3256_v46  ;;  %v3258_v33 = vld [vmem:[#allocation3 + $0x70] sm:$0xff] (%p1613_p6) }
 0x4d3   : > { %3351 = vst [vmem:[#allocation10 + $0x20] sm:$0xff] (%p1613_p6), %v3303_v2  ;;  %3352 = vst [vmem:[#allocation10 + $0x28] sm:$0xff] (%p1613_p6), %v3304_v6  ;;  %v3312_v35 = vadd.f32 (%p1613_p6), %v4944_v56, %v3257_v42  ;;  %v3259_v26 = vld [vmem:[#allocation3 + $0x78] sm:$0xff] (%p1613_p6)  ;;  %v3260_v18 = vld [vmem:[#allocation3 + $0x80] sm:$0xff] (%p1613_p6)  ;;  %v3313_v1 = vadd.f32 (%p1613_p6), %v4944_v56, %v3258_v33 }
 0x4d4   : > { %3353 = vst [vmem:[#allocation10 + $0x30] sm:$0xff] %v3305_v51  ;;  %3354 = vst [vmem:[#allocation10 + $0x38] sm:$0xff] %v3306_v59  ;;  %v3314_v47 = vadd.f32 %v4944_v56, %v3259_v26  ;;  %v3315_v53 = vadd.f32 %v4944_v56, %v3260_v18  ;;  %v3261_v8 = vld [vmem:[#allocation3 + $0x88] sm:$0xff]  ;;  %v3262_v39 = vld [vmem:[#allocation3 + $0x90] sm:$0xff] }
 0x4d5   : > { %3355 = vst [vmem:[#allocation10 + $0x40] sm:$0xff] %v3307_v15  ;;  %3356 = vst [vmem:[#allocation10 + $0x48] sm:$0xff] %v3308_v55  ;;  %v3263_v14 = vld [vmem:[#allocation3 + $0x98] sm:$0xff]  ;;  %v3316_v58 = vadd.f32 %v4944_v56, %v3261_v8  ;;  %v3317_v62 = vadd.f32 %v4944_v56, %v3262_v39  ;;  %v3264_v50 = vld [vmem:[#allocation3 + $0xa0] sm:$0xff] }
 0x4d6   : > { %3357 = vst [vmem:[#allocation10 + $0x50] sm:$0xff] %v3309_v52  ;;  %3358 = vst [vmem:[#allocation10 + $0x58] sm:$0xff] %v3310_v27  ;;  %v3318_v43 = vadd.f32 %v4944_v56, %v3263_v14  ;;  %v3265_v36 = vld [vmem:[#allocation3 + $0xa8] sm:$0xff]  ;;  %v3266_v13 = vld [vmem:[#allocation3 + $0xb0] sm:$0xff]  ;;  %v3319_v16 = vadd.f32 %v4944_v56, %v3264_v50 }
 0x4d7   : > { %3359 = vst [vmem:[#allocation10 + $0x60] sm:$0xff] %v3311_v45  ;;  %3360 = vst [vmem:[#allocation10 + $0x68] sm:$0xff] %v3312_v35  ;;  %v3320_v17 = vadd.f32 %v4944_v56, %v3265_v36  ;;  %v3321_v19 = vadd.f32 %v4944_v56, %v3266_v13  ;;  %v3267_v3 = vld [vmem:[#allocation3 + $0xb8] sm:$0xff]  ;;  %v3268_v60 = vld [vmem:[#allocation3 + $0xc0] sm:$0xff] }
 0x4d8   : > { %3361 = vst [vmem:[#allocation10 + $0x70] sm:$0xff] %v3313_v1  ;;  %3362 = vst [vmem:[#allocation10 + $0x78] sm:$0xff] %v3314_v47  ;;  %v3269_v21 = vld [vmem:[#allocation3 + $0xc8] sm:$0xff]  ;;  %v3322_v24 = vadd.f32 %v4944_v56, %v3267_v3  ;;  %v3323_v41 = vadd.f32 %v4944_v56, %v3268_v60  ;;  %v3270_v22 = vld [vmem:[#allocation3 + $0xd0] sm:$0xff] }
 0x4d9   : > { %3363 = vst [vmem:[#allocation10 + $0x80] sm:$0xff] %v3315_v53  ;;  %3364 = vst [vmem:[#allocation10 + $0x88] sm:$0xff] %v3316_v58  ;;  %v3324_v5 = vadd.f32 %v4944_v56, %v3269_v21  ;;  %v3271_v54 = vld [vmem:[#allocation3 + $0xd8] sm:$0xff]  ;;  %v3272_v9 = vld [vmem:[#allocation3 + $0xe0] sm:$0xff]  ;;  %v3325_v25 = vadd.f32 %v4944_v56, %v3270_v22 }
 0x4da   : > { %3365 = vst [vmem:[#allocation10 + $0x90] sm:$0xff] %v3317_v62  ;;  %3366 = vst [vmem:[#allocation10 + $0x98] sm:$0xff] %v3318_v43  ;;  %v3326_v28 = vadd.f32 %v4944_v56, %v3271_v54  ;;  %v3327_v61 = vadd.f32 %v4944_v56, %v3272_v9  ;;  %v3273_v29 = vld [vmem:[#allocation3 + $0xe8] sm:$0xff]  ;;  %v3274_v10 = vld [vmem:[#allocation3 + $0xf0] sm:$0xff] }
 0x4db   : > { %3367 = vst [vmem:[#allocation10 + $0xa0] sm:$0xff] %v3319_v16  ;;  %3368 = vst [vmem:[#allocation10 + $0xa8] sm:$0xff] %v3320_v17  ;;  %v3275_v34 = vld [vmem:[#allocation3 + $0xf8] sm:$0xff]  ;;  %v3328_v23 = vadd.f32 %v4944_v56, %v3273_v29  ;;  %v3329_v31 = vadd.f32 %v4944_v56, %v3274_v10  ;;  %v3276_v38 = vld [vmem:[#allocation3 + $0x100] sm:$0xff] }
 0x4dc   : > { %3369 = vst [vmem:[#allocation10 + $0xb0] sm:$0xff] %v3321_v19  ;;  %3370 = vst [vmem:[#allocation10 + $0xb8] sm:$0xff] %v3322_v24  ;;  %v3330_v48 = vadd.f32 %v4944_v56, %v3275_v34  ;;  %v3277_v20 = vld [vmem:[#allocation3 + $0x108] sm:$0xff]  ;;  %v3278_v7 = vld [vmem:[#allocation3 + $0x110] sm:$0xff]  ;;  %v3331_v32 = vadd.f32 %v4944_v56, %v3276_v38 }
 0x4dd   : > { %3371 = vst [vmem:[#allocation10 + $0xc0] sm:$0xff] %v3323_v41  ;;  %3372 = vst [vmem:[#allocation10 + $0xc8] sm:$0xff] %v3324_v5  ;;  %v3332_v0 = vadd.f32 %v4944_v56, %v3277_v20  ;;  %v3333_v12 = vadd.f32 %v4944_v56, %v3278_v7  ;;  %v3279_v57 = vld [vmem:[#allocation3 + $0x118] sm:$0xff]  ;;  %v3280_v37 = vld [vmem:[#allocation3 + $0x120] sm:$0xff] }
 0x4de   : > { %3373 = vst [vmem:[#allocation10 + $0xd0] sm:$0xff] %v3325_v25  ;;  %3374 = vst [vmem:[#allocation10 + $0xd8] sm:$0xff] %v3326_v28  ;;  %v3281_v2 = vld [vmem:[#allocation3 + $0x128] sm:$0xff]  ;;  %v3334_v44 = vadd.f32 %v4944_v56, %v3279_v57  ;;  %v3335_v30 = vadd.f32 %v4944_v56, %v3280_v37  ;;  %v3282_v6 = vld [vmem:[#allocation3 + $0x130] sm:$0xff] }
 0x4df   : > { %3375 = vst [vmem:[#allocation10 + $0xe0] sm:$0xff] %v3327_v61  ;;  %3376 = vst [vmem:[#allocation10 + $0xe8] sm:$0xff] %v3328_v23  ;;  %v3336_v63 = vadd.f32 %v4944_v56, %v3281_v2  ;;  %v3283_v51 = vld [vmem:[#allocation3 + $0x138] sm:$0xff]  ;;  %v3284_v59 = vld [vmem:[#allocation3 + $0x140] sm:$0xff]  ;;  %v3337_v4 = vadd.f32 %v4944_v56, %v3282_v6 }
 0x4e0   : > { %3377 = vst [vmem:[#allocation10 + $0xf0] sm:$0xff] %v3329_v31  ;;  %3378 = vst [vmem:[#allocation10 + $0xf8] sm:$0xff] %v3330_v48  ;;  %v3338_v11 = vadd.f32 %v4944_v56, %v3283_v51  ;;  %v3339_v49 = vadd.f32 %v4944_v56, %v3284_v59  ;;  %v3285_v15 = vld [vmem:[#allocation3 + $0x148] sm:$0xff]  ;;  %v3286_v55 = vld [vmem:[#allocation3 + $0x150] sm:$0xff] }
 0x4e1   : > { %3379 = vst [vmem:[#allocation10 + $0x100] sm:$0xff] %v3331_v32  ;;  %3380 = vst [vmem:[#allocation10 + $0x108] sm:$0xff] %v3332_v0  ;;  %v3287_v52 = vld [vmem:[#allocation3 + $0x158] sm:$0xff]  ;;  %v3340_v40 = vadd.f32 %v4944_v56, %v3285_v15  ;;  %v3341_v46 = vadd.f32 %v4944_v56, %v3286_v55  ;;  %v3288_v27 = vld [vmem:[#allocation3 + $0x160] sm:$0xff] }
 0x4e2   : > { %3381 = vst [vmem:[#allocation10 + $0x110] sm:$0xff] %v3333_v12  ;;  %3382 = vst [vmem:[#allocation10 + $0x118] sm:$0xff] %v3334_v44  ;;  %v3342_v42 = vadd.f32 %v4944_v56, %v3287_v52  ;;  %v3289_v45 = vld [vmem:[#allocation3 + $0x168] sm:$0xff]  ;;  %v3290_v35 = vld [vmem:[#allocation3 + $0x170] sm:$0xff]  ;;  %v3343_v33 = vadd.f32 %v4944_v56, %v3288_v27 }
 0x4e3   : > { %3383 = vst [vmem:[#allocation10 + $0x120] sm:$0xff] %v3335_v30  ;;  %3384 = vst [vmem:[#allocation10 + $0x128] sm:$0xff] %v3336_v63  ;;  %v3344_v26 = vadd.f32 %v4944_v56, %v3289_v45  ;;  %v3345_v18 = vadd.f32 %v4944_v56, %v3290_v35  ;;  %v3291_v1 = vld [vmem:[#allocation3 + $0x178] sm:$0xff] }
 0x4e4   : > { %3385 = vst [vmem:[#allocation10 + $0x130] sm:$0xff] %v3337_v4  ;;  %3386 = vst [vmem:[#allocation10 + $0x138] sm:$0xff] %v3338_v11  ;;  %v3346_v47 = vadd.f32 %v4944_v56, %v3291_v1 }
 0x4e5   : > { %3387 = vst [vmem:[#allocation10 + $0x140] sm:$0xff] %v3339_v49  ;;  %3388 = vst [vmem:[#allocation10 + $0x148] sm:$0xff] %v3340_v40 }
 0x4e6   : > { %3389 = vst [vmem:[#allocation10 + $0x150] sm:$0xff] %v3341_v46  ;;  %3390 = vst [vmem:[#allocation10 + $0x158] sm:$0xff] %v3342_v42 }
 0x4e7   : > { %3391 = vst [vmem:[#allocation10 + $0x160] sm:$0xff] %v3343_v33  ;;  %3392 = vst [vmem:[#allocation10 + $0x168] sm:$0xff] %v3344_v26 }
 0x4e8   : > { %3393 = vst [vmem:[#allocation10 + $0x170] sm:$0xff] %v3345_v18  ;;  %3394 = vst [vmem:[#allocation10 + $0x178] sm:$0xff] %v3346_v47 }
 0x4e9 PF: > { %p4996_p10 = scmp.eq.s32.totalorder %s3513_s23, 1  ;;  %s4535_s14 = smov [#allocation10]  }
 0x4ea   : > { %s3410_s15 = sshll.u32 %s4535_s14, 4  ;;  %s3411_s15 = int_to_ptr.vmem [resolvable:$true] %s3410_s15 }
 0x4eb   : > { %s4463_s16 = scalar_lea.vmem %s3411_s15, 6144  ;;  %s4469_s17 = scalar_lea.vmem %s3411_s15, 12288 }
 0x4ec   : > { %p4464_p11 = scmp.ne.s32.totalorder %s3411_s15, %s4463_s16  ;;  %p4470_p0 = scmp.lt.s32.totalorder %s3411_s15, %s3411_s15 }
 0x4ed   : > { %p4471_p1 = scmp.lt.s32.totalorder %s4469_s17, %s4463_s16 }
 0x4ee   : > { %p4465_p12 = pnand %p4464_p11, %p4996_p10 }
 0x4ef   : > { %p4472_p4 = por %p4471_p1, %p4470_p0 }
 0x4f0   : > { %p4466_p13 = pneg %p4465_p12 }
 0x4f2   : > { %p4473_p7 = pnand %p4472_p4, %p4466_p13 }
 0x4f4   : > { %4476 = shalt.err (!%p4473_p7)
}
 0x4f5   : > { %s4477_s6 = scalar_lea.hbm %s5035_s5, 6144 }
 0x4f6   : > { %p4478_p2 = scmp.ne.s32.totalorder %s5035_s5, %s4477_s6  ;;  %p4483_p5 = scmp.lt.u32.totalorder %s4477_s6, %s5035_s5 }
 0x4f8   : > { %p4479_p8 = pnand %p4478_p2, %p4996_p10 }
 0x4fa   : > { %p4480_p3 = pneg %p4479_p8 }
 0x4fc   : > { %p4485_p6 = pnand %p4483_p5, %p4480_p3 }
 0x4fe   : > { %4488 = shalt.err (!%p4485_p6)
}
 0x4ff   : > { %s4536_s12 = smov 128   ;;  %s4537_s13 = smov 8  }
 0x500   : > { %4092 = dma.vmem_to_hbm [thread:$0]  (%p4996_p10), %s3411_s15, 6144, %s5035_s5, [#allocation6], %s4536_s12, %s4536_s12, %s4537_s13  }
 0x501 PF: > { %p4116_p9 = scmp.ge.s32.totalorder %s4523_s20, 2  ;;  %s5048_s24 = sadd.s32 4294967294, %s4523_s20  }
 0x502   : > { %p4117_p11 = scmp.eq.s32.totalorder %s5048_s24, 1 }
 0x504   : > { %p4106_p12 = pnand %p4117_p11, %p4116_p9 }
 0x506   : > { %4510 = dma.done.wait (!%p4106_p12), [#allocation6], 6144  }
 0x507   : > { %4512 = vsyncadd (!%p4106_p12), [#allocation6], 4294961152  ;;  %s20_s20 = sadd.s32 1, %s4523_s20   ;;  %s5049_s18 = smov %s4519_s19 }
 0x508   : > { %p17_p13 = scmp.ge.s32.totalorder %s20_s20, 4   ;;  %s5050_s19 = smov %s5052_s28 }
 0x50a   :  { %19 = sbr.rel (!%p17_p13) target bundleno = 5 (0x5), region = 109 }
 0x511   :  { %3431 = vsyncpa [#allocation5], 1 }
 0x512   :  { %3433 = vsyncpa [#allocation5 + $0x1], 1 }
 0x513   :  { %3434 = vsyncpa [#allocation8], 1 }
 0x514   :  { %3435 = vsyncpa [#allocation6], 1 }
 0x515   :  { %3437 = vsyncpa [#allocation6 + $0x1], 1 }

</bundles_post_ra>
